<compile_context>
chip_gen: v7x
topology: tpu7x:2x2x1
jax: 0.10.0
libtpu: 0.0.40
codegen_flags: <defaults>
</compile_context>

<pallas_src>
import jax
import jax.numpy as jnp
from jax.experimental import pallas as pl
from jax.experimental.pallas import tpu as pltpu

_DISP_PAD = 128   # disp input padded to a full lane tile for the fused epilogue matmul
_FS_PAD = 128     # fs input padded to a full lane tile for the fused epilogue matmul
_ROW_STRIDE = 8   # one sublane tile per timestep in the VMEM gate/hidden scratch


# ----------------------------------------------------------------------------
# Fused kernel
# ----------------------------------------------------------------------------

def make_fused_kernel(num_layers, seq_len, batch, hp, n_stream):
    """Build the fused forward kernel.

    Ref order (inputs, output, scratch):
      Is, hklss, qs : (B, T)        raw stream inputs
      disp_pad      : (B, 128)      disp_tensor zero-padded to 128 lanes
      fs_pad        : (B, 128)      fs zero-padded to 128 lanes
      per layer l   : w_ih_wide (S x 4HP for l==0, HP x 4HP otherwise),
                      w_hh_wide (HP x 4HP), b_wide (1 x 4HP)
      w_out         : (128 + HP + 128, 4E + F*E)  fused epilogue weight
      b_out         : (1, 4E + F*E)
      out           : (B, 4E + F*E)               single lane-dense output slab
      gp_scr        : (T*8, 4HP)    VMEM scratch, gate projections (row stride 8)
      hs_scr        : (T*8, HP)     VMEM scratch, per-layer hidden sequence
    """
    rs = _ROW_STRIDE
    gw = 4 * hp
    f32 = jnp.float32

    def kernel(*refs):
        is_ref, hk_ref, qs_ref, disp_ref, fs_ref = refs[0:5]
        rest = refs[5:]
        layer_refs = [tuple(rest[3 * l:3 * l + 3]) for l in range(num_layers)]
        w_out_ref, b_out_ref = rest[3 * num_layers:3 * num_layers + 2]
        out_ref = rest[3 * num_layers + 2]
        gp_scr, hs_scr = rest[3 * num_layers + 3:3 * num_layers + 5]

        streams = [is_ref[...], hk_ref[...], qs_ref[...]]      # each (B, T)

        # Pad rows of the hidden-sequence scratch are never consumed, but keep
        # them finite (one cheap whole-slab store, off the critical path).
        hs_scr[...] = jnp.zeros((seq_len * rs, hp), f32)

        # ---- layer-0 input projection, hoisted off the recurrent chain ------
        # K == 1 per stream -> pure VPU broadcast-multiply, no MXU.  Each
        # timestep's gate slab is written at a sublane-tile-aligned offset.
        w0_ref, _, b0_ref = layer_refs[0]
        w0 = w0_ref[...]                                        # (S, 4*HP)
        b0 = b0_ref[...]                                        # (1, 4*HP)
        for t in range(seq_len):
            row = b0 + streams[0][:, t:t + 1] * w0[0:1, :]
            for s in range(1, n_stream):
                row = row + streams[s][:, t:t + 1] * w0[s:s + 1, :]
            gp_scr[t * rs:t * rs + batch, :] = row              # (B, 4*HP), aligned

        # ---- stacked LSTM layers --------------------------------------------
        h_last = None
        for l in range(num_layers):
            w_ih_ref, w_hh_ref, b_ref = layer_refs[l]
            if l > 0:
                # Hoisted input projection of this layer: ONE matmul over the
                # whole (tile-strided) hidden sequence of the previous layer.
                gp_scr[...] = (jnp.dot(hs_scr[...], w_ih_ref[...],
                                       preferred_element_type=f32) + b_ref[...])

            # TODO: hold W_hh resident in the MXU across the unrolled time loop
            # (pltpu.matmul_push_rhs / matmul_acc_lhs / matmul_pop) to avoid
            # re-pushing the 256 KB weight every step; kept as jnp.dot for
            # robustness.
            whh = w_hh_ref[...]                                  # (HP, 4*HP)
            last_layer = l == num_layers - 1
            h = jnp.zeros((batch, hp), f32)
            c = jnp.zeros((batch, hp), f32)
            for t in range(seq_len):          # fully unrolled (T static, small)
                gates = gp_scr[t * rs:t * rs + batch, :] + jnp.dot(
                    h, whh, preferred_element_type=f32)          # (B, 4*HP)
                # 128-lane aligned gate blocks (i, f, g, o); activate per block
                # so the EUP does the minimum work on the serial chain.
                i_g = jax.nn.sigmoid(gates[:, 0 * hp:1 * hp])
                f_g = jax.nn.sigmoid(gates[:, 1 * hp:2 * hp])
                g_g = jnp.tanh(gates[:, 2 * hp:3 * hp])
                o_g = jax.nn.sigmoid(gates[:, 3 * hp:4 * hp])
                c = f_g * c + i_g * g_g
                h = o_g * jnp.tanh(c)
                if not last_layer:
                    hs_scr[t * rs:t * rs + batch, :] = h         # aligned store
            h_last = h                         # (B, HP) = [h_Is | h_hkl | h_qs | 0]

        # ---- fused epilogue: ONE lane-dense (B, 4E + F*E) matmul -------------
        #   [disp_e | Is_e | hklss_e | qs_e | fs_e(flat)] =
        #     [disp_pad | h_last | fs_pad] @ W_out + b_out
        x_out = jnp.concatenate([disp_ref[...], h_last, fs_ref[...]], axis=-1)
        out_ref[...] = (jnp.dot(x_out, w_out_ref[...],
                                preferred_element_type=f32) + b_out_ref[...])

    return kernel


# ----------------------------------------------------------------------------
# Parameter init (PyTorch layout) and host-side packing into the wide layout
# ----------------------------------------------------------------------------

def _uniform(key, shape, bound):
    return jax.random.uniform(key, shape, jnp.float32, minval=-bound, maxval=bound)


def init_raw_params(key, embed_dim, rnn_hidden_dim, rnn_layers):
    keys = jax.random.split(key, 6)

    def init_lstm(k, input_size, hidden, num_layers):
        bound = 1.0 / float(hidden) ** 0.5
        layers = []
        for layer in range(num_layers):
            din = input_size if layer == 0 else hidden
            k, k1, k2, k3, k4 = jax.random.split(k, 5)
            layers.append(dict(
                w_ih=_uniform(k1, (4 * hidden, din), bound),     # PyTorch (4H, Din)
                w_hh=_uniform(k2, (4 * hidden, hidden), bound),  # (4H, H)
                b_ih=_uniform(k3, (4 * hidden,), bound),
                b_hh=_uniform(k4, (4 * hidden,), bound),
            ))
        return layers

    def init_linear(k, din, dout):
        bound = 1.0 / float(din) ** 0.5
        k1, k2 = jax.random.split(k)
        return dict(w=_uniform(k1, (dout, din), bound),          # PyTorch (out, in)
                    b=_uniform(k2, (dout,), bound))

    return dict(
        Is_rnn=init_lstm(keys[0], 1, rnn_hidden_dim, rnn_layers),
        hklss_rnn=init_lstm(keys[1], 1, rnn_hidden_dim, rnn_layers),
        qs_rnn=init_lstm(keys[2], 1, rnn_hidden_dim, rnn_layers),
        fs_embed=init_linear(keys[3], 1, embed_dim),
        disp_embed=init_linear(keys[4], 6, embed_dim),
        fc=init_linear(keys[5], rnn_hidden_dim, embed_dim),
    )


def pack_params(raw, fs_len):
    """Pack PyTorch-layout params into the lane-blocked wide layout."""
    streams = [raw["Is_rnn"], raw["hklss_rnn"], raw["qs_rnn"]]
    n_stream = len(streams)
    num_layers = len(streams[0])
    hidden = streams[0][0]["w_hh"].shape[1]
    hp = max(128, -(-(n_stream * hidden) // 128) * 128)   # 3*32 = 96 -> 128 lanes
    gw = 4 * hp
    embed_dim = raw["fc"]["w"].shape[0]

    lstm_packed = []
    for l in range(num_layers):
        if l == 0:
            w_ih_wide = jnp.zeros((n_stream, gw), jnp.float32)
        else:
            w_ih_wide = jnp.zeros((hp, gw), jnp.float32)
        w_hh_wide = jnp.zeros((hp, gw), jnp.float32)
        b_wide = jnp.zeros((1, gw), jnp.float32)
        for s in range(n_stream):
            p = streams[s][l]
            for g in range(4):                                     # i, f, g, o
                rows = slice(g * hidden, (g + 1) * hidden)
                col0 = g * hp + s * hidden
                cols = slice(col0, col0 + hidden)
                if l == 0:
                    w_ih_wide = w_ih_wide.at[s, cols].set(p["w_ih"][rows, 0])
                else:
                    w_ih_wide = w_ih_wide.at[s * hidden:(s + 1) * hidden, cols].set(
                        p["w_ih"][rows, :].T)
                w_hh_wide = w_hh_wide.at[s * hidden:(s + 1) * hidden, cols].set(
                    p["w_hh"][rows, :].T)
                b_wide = b_wide.at[0, cols].set(p["b_ih"][rows] + p["b_hh"][rows])
        lstm_packed.append((w_ih_wide, w_hh_wide, b_wide))

    # Fused epilogue projection:
    #   [disp_pad(128) | h_wide(HP) | fs_pad(128)] @ W_out + b_out
    # columns: [disp_e(E) | Is_e(E) | hklss_e(E) | qs_e(E) | fs_e flat (F*E)]
    w_disp, b_disp = raw["disp_embed"]["w"], raw["disp_embed"]["b"]   # (E,6), (E,)
    w_fc, b_fc = raw["fc"]["w"], raw["fc"]["b"]                       # (E,H), (E,)
    w_fs, b_fs = raw["fs_embed"]["w"], raw["fs_embed"]["b"]           # (E,1), (E,)

    n_out = (1 + n_stream) * embed_dim + fs_len * embed_dim
    w_out = jnp.zeros((_DISP_PAD + hp + _FS_PAD, n_out), jnp.float32)
    w_out = w_out.at[0:w_disp.shape[1], 0:embed_dim].set(w_disp.T)
    for s in range(n_stream):
        w_out = w_out.at[_DISP_PAD + s * hidden:_DISP_PAD + (s + 1) * hidden,
                         (1 + s) * embed_dim:(2 + s) * embed_dim].set(w_fc.T)
    fs_row0 = _DISP_PAD + hp
    fs_col0 = (1 + n_stream) * embed_dim
    for j in range(fs_len):                                           # block-diag fs
        w_out = w_out.at[fs_row0 + j,
                         fs_col0 + j * embed_dim:fs_col0 + (j + 1) * embed_dim].set(
            w_fs[:, 0])
    b_out = jnp.concatenate([b_disp] + [b_fc] * n_stream
                            + [jnp.tile(b_fs, fs_len)]).reshape(1, n_out)

    return dict(lstm=lstm_packed, w_out=w_out, b_out=b_out)


# ----------------------------------------------------------------------------
# Model forward: ONE pallas_call, minimal XLA glue (two small pads + slicing)
# ----------------------------------------------------------------------------

@jax.jit
def embedding_model_forward(packed, disp_tensor, Is, hklss, fs, qs):
    b_sz, seq_len = Is.shape
    f_len = fs.shape[1]
    lstm_layers = packed["lstm"]
    num_layers = len(lstm_layers)
    hp = lstm_layers[0][1].shape[0]                     # padded wide hidden dim
    n_out = packed["w_out"].shape[1]
    e_dim = n_out // (4 + f_len)
    assert b_sz <= _ROW_STRIDE, "batch must fit in one sublane tile"
    assert disp_tensor.shape[1] <= _DISP_PAD and f_len <= _FS_PAD

    disp_pad = jnp.pad(disp_tensor.astype(jnp.float32),
                       ((0, 0), (0, _DISP_PAD - disp_tensor.shape[1])))
    fs_pad = jnp.pad(fs.astype(jnp.float32), ((0, 0), (0, _FS_PAD - f_len)))

    operands = [Is.astype(jnp.float32), hklss.astype(jnp.float32),
                qs.astype(jnp.float32), disp_pad, fs_pad]
    for layer in lstm_layers:
        operands.extend(layer)
    operands.extend([packed["w_out"], packed["b_out"]])

    vmem = pl.BlockSpec(memory_space=pltpu.MemorySpace.VMEM)
    kernel = make_fused_kernel(num_layers, seq_len, b_sz, hp, n_stream=3)
    out = pl.pallas_call(
        kernel,
        out_shape=jax.ShapeDtypeStruct((b_sz, n_out), jnp.float32),
        in_specs=[vmem] * len(operands),
        out_specs=vmem,
        scratch_shapes=[
            pltpu.VMEM((seq_len * _ROW_STRIDE, 4 * hp), jnp.float32),  # gate slab
            pltpu.VMEM((seq_len * _ROW_STRIDE, hp), jnp.float32),      # hidden seq
        ],
    )(*operands)

    disp_e = out[:, 0 * e_dim:1 * e_dim]
    is_e = out[:, 1 * e_dim:2 * e_dim]
    hk_e = out[:, 2 * e_dim:3 * e_dim]
    qs_e = out[:, 3 * e_dim:4 * e_dim]
    fs_e = out[:, 4 * e_dim:4 * e_dim + f_len * e_dim].reshape(b_sz, f_len, e_dim)
    return disp_e, is_e, hk_e, fs_e, qs_e


# ----------------------------------------------------------------------------
# Pure-JAX reference (uses the RAW PyTorch-layout params -> also checks packing)
# ----------------------------------------------------------------------------

def _ref_lstm(x_bt, layers):
    x = jnp.transpose(x_bt)[:, :, None].astype(jnp.float32)   # (T, B, 1)
    h_last = None
    for p in layers:
        w_ih, w_hh, b_ih, b_hh = p["w_ih"], p["w_hh"], p["b_ih"], p["b_hh"]
        hdim = w_hh.shape[1]
        h = jnp.zeros((x.shape[1], hdim), jnp.float32)
        c = jnp.zeros_like(h)
        outs = []
        for t in range(x.shape[0]):
            gates = x[t] @ w_ih.T + h @ w_hh.T + b_ih + b_hh
            i = jax.nn.sigmoid(gates[:, 0 * hdim:1 * hdim])
            f = jax.nn.sigmoid(gates[:, 1 * hdim:2 * hdim])
            g = jnp.tanh(gates[:, 2 * hdim:3 * hdim])
            o = jax.nn.sigmoid(gates[:, 3 * hdim:4 * hdim])
            c = f * c + i * g
            h = o * jnp.tanh(c)
            outs.append(h)
        x = jnp.stack(outs, axis=0)
        h_last = h
    return h_last


def _ref_forward(raw, disp_tensor, Is, hklss, fs, qs):
    disp_e = disp_tensor @ raw["disp_embed"]["w"].T + raw["disp_embed"]["b"]
    w_fc, b_fc = raw["fc"]["w"], raw["fc"]["b"]
    is_e = _ref_lstm(Is, raw["Is_rnn"]) @ w_fc.T + b_fc
    hk_e = _ref_lstm(hklss, raw["hklss_rnn"]) @ w_fc.T + b_fc
    fs_e = fs[..., None] @ raw["fs_embed"]["w"].T + raw["fs_embed"]["b"]
    qs_e = _ref_lstm(qs, raw["qs_rnn"]) @ w_fc.T + b_fc
    return disp_e, is_e, hk_e, fs_e, qs_e


# ----------------------------------------------------------------------------
# Main
# ----------------------------------------------------------------------------

if __name__ == "__main__":
    EMBED_DIM = 32
    RNN_HIDDEN = 32
    RNN_LAYERS = 2
    B = 2
    T = 8        # sequence length for Is / hklss / qs
    F = 8        # number of fs entries

    root = jax.random.PRNGKey(0)
    k_par, k_disp, k_is, k_hkl, k_fs, k_qs = jax.random.split(root, 6)

    raw_params = init_raw_params(k_par, EMBED_DIM, RNN_HIDDEN, RNN_LAYERS)
    packed_params = pack_params(raw_params, fs_len=F)

    disp_tensor = jax.random.normal(k_disp, (B, 6), jnp.float32)
    Is = jax.random.normal(k_is, (B, T), jnp.float32)
    hklss = jax.random.normal(k_hkl, (B, T), jnp.float32)
    fs = jax.random.normal(k_fs, (B, F), jnp.float32)
    qs = jax.random.normal(k_qs, (B, T), jnp.float32)

    outs = embedding_model_forward(packed_params, disp_tensor, Is, hklss, fs, qs)
    outs = jax.block_until_ready(outs)

    refs = _ref_forward(raw_params, disp_tensor, Is, hklss, fs, qs)
    names = ["disp", "Is", "hklss", "fs", "qs"]
    exp_shapes = [(B, EMBED_DIM), (B, EMBED_DIM), (B, EMBED_DIM),
                  (B, F, EMBED_DIM), (B, EMBED_DIM)]
    for name, o, r, s in zip(names, outs, refs, exp_shapes):
        assert o.shape == s, (name, o.shape, s)
        assert jnp.allclose(o, r, rtol=1e-3, atol=1e-3), name

    print("KERNEL_OK")
</pallas_src>

<mosaic_0001>
module attributes {stable_mosaic.version = 11 : i64} {
  func.func @kernel(%arg0: memref<2x8xf32, #tpu.memory_space<vmem>>, %arg1: memref<2x8xf32, #tpu.memory_space<vmem>>, %arg2: memref<2x8xf32, #tpu.memory_space<vmem>>, %arg3: memref<2x128xf32, #tpu.memory_space<vmem>>, %arg4: memref<2x128xf32, #tpu.memory_space<vmem>>, %arg5: memref<3x512xf32, #tpu.memory_space<vmem>>, %arg6: memref<128x512xf32, #tpu.memory_space<vmem>>, %arg7: memref<1x512xf32, #tpu.memory_space<vmem>>, %arg8: memref<128x512xf32, #tpu.memory_space<vmem>>, %arg9: memref<128x512xf32, #tpu.memory_space<vmem>>, %arg10: memref<1x512xf32, #tpu.memory_space<vmem>>, %arg11: memref<384x384xf32, #tpu.memory_space<vmem>>, %arg12: memref<1x384xf32, #tpu.memory_space<vmem>>, %arg13: memref<2x384xf32, #tpu.memory_space<vmem>>, %arg14: memref<64x512xf32, #tpu.memory_space<vmem>>, %arg15: memref<64x128xf32, #tpu.memory_space<vmem>>) attributes {dimension_semantics = [], scalar_prefetch = 0 : i64, scratch_operands = 2 : i64, tpu.core_type = #tpu.core_type<tc>} {
    %c0 = arith.constant 0 : index
    %c0_0 = arith.constant 0 : index
    %0 = vector.load %arg0[%c0, %c0_0] : memref<2x8xf32, #tpu.memory_space<vmem>>, vector<2x8xf32>
    %c0_1 = arith.constant 0 : index
    %c0_2 = arith.constant 0 : index
    %1 = vector.load %arg1[%c0_1, %c0_2] : memref<2x8xf32, #tpu.memory_space<vmem>>, vector<2x8xf32>
    %c0_3 = arith.constant 0 : index
    %c0_4 = arith.constant 0 : index
    %2 = vector.load %arg2[%c0_3, %c0_4] : memref<2x8xf32, #tpu.memory_space<vmem>>, vector<2x8xf32>
    %cst = arith.constant 0.000000e+00 : f32
    %3 = vector.broadcast %cst : f32 to vector<64x128xf32>
    %c0_5 = arith.constant 0 : index
    %c0_6 = arith.constant 0 : index
    %4 = vector.load %arg15[%c0_5, %c0_6] : memref<64x128xf32, #tpu.memory_space<vmem>>, vector<64x128xf32>
    tpu.vector_store %arg15[%c0_5, %c0_6], %3 {strides = array<i32>} : memref<64x128xf32, #tpu.memory_space<vmem>>, vector<64x128xf32>,
    %c0_7 = arith.constant 0 : index
    %c0_8 = arith.constant 0 : index
    %5 = vector.load %arg5[%c0_7, %c0_8] : memref<3x512xf32, #tpu.memory_space<vmem>>, vector<3x512xf32>
    %c0_9 = arith.constant 0 : index
    %c0_10 = arith.constant 0 : index
    %6 = vector.load %arg7[%c0_9, %c0_10] : memref<1x512xf32, #tpu.memory_space<vmem>>, vector<1x512xf32>
    %7 = vector.extract_strided_slice %0 {offsets = [0, 0], sizes = [2, 1], strides = [1, 1]} : vector<2x8xf32> to vector<2x1xf32>
    %8 = vector.extract_strided_slice %5 {offsets = [0, 0], sizes = [1, 512], strides = [1, 1]} : vector<3x512xf32> to vector<1x512xf32>
    %9 = vector.broadcast %7 : vector<2x1xf32> to vector<2x512xf32>
    %10 = vector.broadcast %8 : vector<1x512xf32> to vector<2x512xf32>
    %11 = arith.mulf %9, %10 : vector<2x512xf32>
    %12 = vector.broadcast %6 : vector<1x512xf32> to vector<2x512xf32>
    %13 = arith.addf %12, %11 : vector<2x512xf32>
    %14 = vector.extract_strided_slice %1 {offsets = [0, 0], sizes = [2, 1], strides = [1, 1]} : vector<2x8xf32> to vector<2x1xf32>
    %15 = vector.extract_strided_slice %5 {offsets = [1, 0], sizes = [1, 512], strides = [1, 1]} : vector<3x512xf32> to vector<1x512xf32>
    %16 = vector.broadcast %14 : vector<2x1xf32> to vector<2x512xf32>
    %17 = vector.broadcast %15 : vector<1x512xf32> to vector<2x512xf32>
    %18 = arith.mulf %16, %17 : vector<2x512xf32>
    %19 = arith.addf %13, %18 : vector<2x512xf32>
    %20 = vector.extract_strided_slice %2 {offsets = [0, 0], sizes = [2, 1], strides = [1, 1]} : vector<2x8xf32> to vector<2x1xf32>
    %21 = vector.extract_strided_slice %5 {offsets = [2, 0], sizes = [1, 512], strides = [1, 1]} : vector<3x512xf32> to vector<1x512xf32>
    %22 = vector.broadcast %20 : vector<2x1xf32> to vector<2x512xf32>
    %23 = vector.broadcast %21 : vector<1x512xf32> to vector<2x512xf32>
    %24 = arith.mulf %22, %23 : vector<2x512xf32>
    %25 = arith.addf %19, %24 : vector<2x512xf32>
    %c0_11 = arith.constant 0 : index
    %c0_12 = arith.constant 0 : index
    %26 = vector.load %arg14[%c0_11, %c0_12] : memref<64x512xf32, #tpu.memory_space<vmem>>, vector<2x512xf32>
    tpu.vector_store %arg14[%c0_11, %c0_12], %25 {strides = array<i32>} : memref<64x512xf32, #tpu.memory_space<vmem>>, vector<2x512xf32>,
    %27 = vector.extract_strided_slice %0 {offsets = [0, 1], sizes = [2, 1], strides = [1, 1]} : vector<2x8xf32> to vector<2x1xf32>
    %28 = vector.extract_strided_slice %5 {offsets = [0, 0], sizes = [1, 512], strides = [1, 1]} : vector<3x512xf32> to vector<1x512xf32>
    %29 = vector.broadcast %27 : vector<2x1xf32> to vector<2x512xf32>
    %30 = vector.broadcast %28 : vector<1x512xf32> to vector<2x512xf32>
    %31 = arith.mulf %29, %30 : vector<2x512xf32>
    %32 = vector.broadcast %6 : vector<1x512xf32> to vector<2x512xf32>
    %33 = arith.addf %32, %31 : vector<2x512xf32>
    %34 = vector.extract_strided_slice %1 {offsets = [0, 1], sizes = [2, 1], strides = [1, 1]} : vector<2x8xf32> to vector<2x1xf32>
    %35 = vector.extract_strided_slice %5 {offsets = [1, 0], sizes = [1, 512], strides = [1, 1]} : vector<3x512xf32> to vector<1x512xf32>
    %36 = vector.broadcast %34 : vector<2x1xf32> to vector<2x512xf32>
    %37 = vector.broadcast %35 : vector<1x512xf32> to vector<2x512xf32>
    %38 = arith.mulf %36, %37 : vector<2x512xf32>
    %39 = arith.addf %33, %38 : vector<2x512xf32>
    %40 = vector.extract_strided_slice %2 {offsets = [0, 1], sizes = [2, 1], strides = [1, 1]} : vector<2x8xf32> to vector<2x1xf32>
    %41 = vector.extract_strided_slice %5 {offsets = [2, 0], sizes = [1, 512], strides = [1, 1]} : vector<3x512xf32> to vector<1x512xf32>
    %42 = vector.broadcast %40 : vector<2x1xf32> to vector<2x512xf32>
    %43 = vector.broadcast %41 : vector<1x512xf32> to vector<2x512xf32>
    %44 = arith.mulf %42, %43 : vector<2x512xf32>
    %45 = arith.addf %39, %44 : vector<2x512xf32>
    %c8 = arith.constant 8 : index
    %c0_13 = arith.constant 0 : index
    %46 = vector.load %arg14[%c8, %c0_13] : memref<64x512xf32, #tpu.memory_space<vmem>>, vector<2x512xf32>
    tpu.vector_store %arg14[%c8, %c0_13], %45 {strides = array<i32>} : memref<64x512xf32, #tpu.memory_space<vmem>>, vector<2x512xf32>,
    %47 = vector.extract_strided_slice %0 {offsets = [0, 2], sizes = [2, 1], strides = [1, 1]} : vector<2x8xf32> to vector<2x1xf32>
    %48 = vector.extract_strided_slice %5 {offsets = [0, 0], sizes = [1, 512], strides = [1, 1]} : vector<3x512xf32> to vector<1x512xf32>
    %49 = vector.broadcast %47 : vector<2x1xf32> to vector<2x512xf32>
    %50 = vector.broadcast %48 : vector<1x512xf32> to vector<2x512xf32>
    %51 = arith.mulf %49, %50 : vector<2x512xf32>
    %52 = vector.broadcast %6 : vector<1x512xf32> to vector<2x512xf32>
    %53 = arith.addf %52, %51 : vector<2x512xf32>
    %54 = vector.extract_strided_slice %1 {offsets = [0, 2], sizes = [2, 1], strides = [1, 1]} : vector<2x8xf32> to vector<2x1xf32>
    %55 = vector.extract_strided_slice %5 {offsets = [1, 0], sizes = [1, 512], strides = [1, 1]} : vector<3x512xf32> to vector<1x512xf32>
    %56 = vector.broadcast %54 : vector<2x1xf32> to vector<2x512xf32>
    %57 = vector.broadcast %55 : vector<1x512xf32> to vector<2x512xf32>
    %58 = arith.mulf %56, %57 : vector<2x512xf32>
    %59 = arith.addf %53, %58 : vector<2x512xf32>
    %60 = vector.extract_strided_slice %2 {offsets = [0, 2], sizes = [2, 1], strides = [1, 1]} : vector<2x8xf32> to vector<2x1xf32>
    %61 = vector.extract_strided_slice %5 {offsets = [2, 0], sizes = [1, 512], strides = [1, 1]} : vector<3x512xf32> to vector<1x512xf32>
    %62 = vector.broadcast %60 : vector<2x1xf32> to vector<2x512xf32>
    %63 = vector.broadcast %61 : vector<1x512xf32> to vector<2x512xf32>
    %64 = arith.mulf %62, %63 : vector<2x512xf32>
    %65 = arith.addf %59, %64 : vector<2x512xf32>
    %c16 = arith.constant 16 : index
    %c0_14 = arith.constant 0 : index
    %66 = vector.load %arg14[%c16, %c0_14] : memref<64x512xf32, #tpu.memory_space<vmem>>, vector<2x512xf32>
    tpu.vector_store %arg14[%c16, %c0_14], %65 {strides = array<i32>} : memref<64x512xf32, #tpu.memory_space<vmem>>, vector<2x512xf32>,
    %67 = vector.extract_strided_slice %0 {offsets = [0, 3], sizes = [2, 1], strides = [1, 1]} : vector<2x8xf32> to vector<2x1xf32>
    %68 = vector.extract_strided_slice %5 {offsets = [0, 0], sizes = [1, 512], strides = [1, 1]} : vector<3x512xf32> to vector<1x512xf32>
    %69 = vector.broadcast %67 : vector<2x1xf32> to vector<2x512xf32>
    %70 = vector.broadcast %68 : vector<1x512xf32> to vector<2x512xf32>
    %71 = arith.mulf %69, %70 : vector<2x512xf32>
    %72 = vector.broadcast %6 : vector<1x512xf32> to vector<2x512xf32>
    %73 = arith.addf %72, %71 : vector<2x512xf32>
    %74 = vector.extract_strided_slice %1 {offsets = [0, 3], sizes = [2, 1], strides = [1, 1]} : vector<2x8xf32> to vector<2x1xf32>
    %75 = vector.extract_strided_slice %5 {offsets = [1, 0], sizes = [1, 512], strides = [1, 1]} : vector<3x512xf32> to vector<1x512xf32>
    %76 = vector.broadcast %74 : vector<2x1xf32> to vector<2x512xf32>
    %77 = vector.broadcast %75 : vector<1x512xf32> to vector<2x512xf32>
    %78 = arith.mulf %76, %77 : vector<2x512xf32>
    %79 = arith.addf %73, %78 : vector<2x512xf32>
    %80 = vector.extract_strided_slice %2 {offsets = [0, 3], sizes = [2, 1], strides = [1, 1]} : vector<2x8xf32> to vector<2x1xf32>
    %81 = vector.extract_strided_slice %5 {offsets = [2, 0], sizes = [1, 512], strides = [1, 1]} : vector<3x512xf32> to vector<1x512xf32>
    %82 = vector.broadcast %80 : vector<2x1xf32> to vector<2x512xf32>
    %83 = vector.broadcast %81 : vector<1x512xf32> to vector<2x512xf32>
    %84 = arith.mulf %82, %83 : vector<2x512xf32>
    %85 = arith.addf %79, %84 : vector<2x512xf32>
    %c24 = arith.constant 24 : index
    %c0_15 = arith.constant 0 : index
    %86 = vector.load %arg14[%c24, %c0_15] : memref<64x512xf32, #tpu.memory_space<vmem>>, vector<2x512xf32>
    tpu.vector_store %arg14[%c24, %c0_15], %85 {strides = array<i32>} : memref<64x512xf32, #tpu.memory_space<vmem>>, vector<2x512xf32>,
    %87 = vector.extract_strided_slice %0 {offsets = [0, 4], sizes = [2, 1], strides = [1, 1]} : vector<2x8xf32> to vector<2x1xf32>
    %88 = vector.extract_strided_slice %5 {offsets = [0, 0], sizes = [1, 512], strides = [1, 1]} : vector<3x512xf32> to vector<1x512xf32>
    %89 = vector.broadcast %87 : vector<2x1xf32> to vector<2x512xf32>
    %90 = vector.broadcast %88 : vector<1x512xf32> to vector<2x512xf32>
    %91 = arith.mulf %89, %90 : vector<2x512xf32>
    %92 = vector.broadcast %6 : vector<1x512xf32> to vector<2x512xf32>
    %93 = arith.addf %92, %91 : vector<2x512xf32>
    %94 = vector.extract_strided_slice %1 {offsets = [0, 4], sizes = [2, 1], strides = [1, 1]} : vector<2x8xf32> to vector<2x1xf32>
    %95 = vector.extract_strided_slice %5 {offsets = [1, 0], sizes = [1, 512], strides = [1, 1]} : vector<3x512xf32> to vector<1x512xf32>
    %96 = vector.broadcast %94 : vector<2x1xf32> to vector<2x512xf32>
    %97 = vector.broadcast %95 : vector<1x512xf32> to vector<2x512xf32>
    %98 = arith.mulf %96, %97 : vector<2x512xf32>
    %99 = arith.addf %93, %98 : vector<2x512xf32>
    %100 = vector.extract_strided_slice %2 {offsets = [0, 4], sizes = [2, 1], strides = [1, 1]} : vector<2x8xf32> to vector<2x1xf32>
    %101 = vector.extract_strided_slice %5 {offsets = [2, 0], sizes = [1, 512], strides = [1, 1]} : vector<3x512xf32> to vector<1x512xf32>
    %102 = vector.broadcast %100 : vector<2x1xf32> to vector<2x512xf32>
    %103 = vector.broadcast %101 : vector<1x512xf32> to vector<2x512xf32>
    %104 = arith.mulf %102, %103 : vector<2x512xf32>
    %105 = arith.addf %99, %104 : vector<2x512xf32>
    %c32 = arith.constant 32 : index
    %c0_16 = arith.constant 0 : index
    %106 = vector.load %arg14[%c32, %c0_16] : memref<64x512xf32, #tpu.memory_space<vmem>>, vector<2x512xf32>
    tpu.vector_store %arg14[%c32, %c0_16], %105 {strides = array<i32>} : memref<64x512xf32, #tpu.memory_space<vmem>>, vector<2x512xf32>,
    %107 = vector.extract_strided_slice %0 {offsets = [0, 5], sizes = [2, 1], strides = [1, 1]} : vector<2x8xf32> to vector<2x1xf32>
    %108 = vector.extract_strided_slice %5 {offsets = [0, 0], sizes = [1, 512], strides = [1, 1]} : vector<3x512xf32> to vector<1x512xf32>
    %109 = vector.broadcast %107 : vector<2x1xf32> to vector<2x512xf32>
    %110 = vector.broadcast %108 : vector<1x512xf32> to vector<2x512xf32>
    %111 = arith.mulf %109, %110 : vector<2x512xf32>
    %112 = vector.broadcast %6 : vector<1x512xf32> to vector<2x512xf32>
    %113 = arith.addf %112, %111 : vector<2x512xf32>
    %114 = vector.extract_strided_slice %1 {offsets = [0, 5], sizes = [2, 1], strides = [1, 1]} : vector<2x8xf32> to vector<2x1xf32>
    %115 = vector.extract_strided_slice %5 {offsets = [1, 0], sizes = [1, 512], strides = [1, 1]} : vector<3x512xf32> to vector<1x512xf32>
    %116 = vector.broadcast %114 : vector<2x1xf32> to vector<2x512xf32>
    %117 = vector.broadcast %115 : vector<1x512xf32> to vector<2x512xf32>
    %118 = arith.mulf %116, %117 : vector<2x512xf32>
    %119 = arith.addf %113, %118 : vector<2x512xf32>
    %120 = vector.extract_strided_slice %2 {offsets = [0, 5], sizes = [2, 1], strides = [1, 1]} : vector<2x8xf32> to vector<2x1xf32>
    %121 = vector.extract_strided_slice %5 {offsets = [2, 0], sizes = [1, 512], strides = [1, 1]} : vector<3x512xf32> to vector<1x512xf32>
    %122 = vector.broadcast %120 : vector<2x1xf32> to vector<2x512xf32>
    %123 = vector.broadcast %121 : vector<1x512xf32> to vector<2x512xf32>
    %124 = arith.mulf %122, %123 : vector<2x512xf32>
    %125 = arith.addf %119, %124 : vector<2x512xf32>
    %c40 = arith.constant 40 : index
    %c0_17 = arith.constant 0 : index
    %126 = vector.load %arg14[%c40, %c0_17] : memref<64x512xf32, #tpu.memory_space<vmem>>, vector<2x512xf32>
    tpu.vector_store %arg14[%c40, %c0_17], %125 {strides = array<i32>} : memref<64x512xf32, #tpu.memory_space<vmem>>, vector<2x512xf32>,
    %127 = vector.extract_strided_slice %0 {offsets = [0, 6], sizes = [2, 1], strides = [1, 1]} : vector<2x8xf32> to vector<2x1xf32>
    %128 = vector.extract_strided_slice %5 {offsets = [0, 0], sizes = [1, 512], strides = [1, 1]} : vector<3x512xf32> to vector<1x512xf32>
    %129 = vector.broadcast %127 : vector<2x1xf32> to vector<2x512xf32>
    %130 = vector.broadcast %128 : vector<1x512xf32> to vector<2x512xf32>
    %131 = arith.mulf %129, %130 : vector<2x512xf32>
    %132 = vector.broadcast %6 : vector<1x512xf32> to vector<2x512xf32>
    %133 = arith.addf %132, %131 : vector<2x512xf32>
    %134 = vector.extract_strided_slice %1 {offsets = [0, 6], sizes = [2, 1], strides = [1, 1]} : vector<2x8xf32> to vector<2x1xf32>
    %135 = vector.extract_strided_slice %5 {offsets = [1, 0], sizes = [1, 512], strides = [1, 1]} : vector<3x512xf32> to vector<1x512xf32>
    %136 = vector.broadcast %134 : vector<2x1xf32> to vector<2x512xf32>
    %137 = vector.broadcast %135 : vector<1x512xf32> to vector<2x512xf32>
    %138 = arith.mulf %136, %137 : vector<2x512xf32>
    %139 = arith.addf %133, %138 : vector<2x512xf32>
    %140 = vector.extract_strided_slice %2 {offsets = [0, 6], sizes = [2, 1], strides = [1, 1]} : vector<2x8xf32> to vector<2x1xf32>
    %141 = vector.extract_strided_slice %5 {offsets = [2, 0], sizes = [1, 512], strides = [1, 1]} : vector<3x512xf32> to vector<1x512xf32>
    %142 = vector.broadcast %140 : vector<2x1xf32> to vector<2x512xf32>
    %143 = vector.broadcast %141 : vector<1x512xf32> to vector<2x512xf32>
    %144 = arith.mulf %142, %143 : vector<2x512xf32>
    %145 = arith.addf %139, %144 : vector<2x512xf32>
    %c48 = arith.constant 48 : index
    %c0_18 = arith.constant 0 : index
    %146 = vector.load %arg14[%c48, %c0_18] : memref<64x512xf32, #tpu.memory_space<vmem>>, vector<2x512xf32>
    tpu.vector_store %arg14[%c48, %c0_18], %145 {strides = array<i32>} : memref<64x512xf32, #tpu.memory_space<vmem>>, vector<2x512xf32>,
    %147 = vector.extract_strided_slice %0 {offsets = [0, 7], sizes = [2, 1], strides = [1, 1]} : vector<2x8xf32> to vector<2x1xf32>
    %148 = vector.extract_strided_slice %5 {offsets = [0, 0], sizes = [1, 512], strides = [1, 1]} : vector<3x512xf32> to vector<1x512xf32>
    %149 = vector.broadcast %147 : vector<2x1xf32> to vector<2x512xf32>
    %150 = vector.broadcast %148 : vector<1x512xf32> to vector<2x512xf32>
    %151 = arith.mulf %149, %150 : vector<2x512xf32>
    %152 = vector.broadcast %6 : vector<1x512xf32> to vector<2x512xf32>
    %153 = arith.addf %152, %151 : vector<2x512xf32>
    %154 = vector.extract_strided_slice %1 {offsets = [0, 7], sizes = [2, 1], strides = [1, 1]} : vector<2x8xf32> to vector<2x1xf32>
    %155 = vector.extract_strided_slice %5 {offsets = [1, 0], sizes = [1, 512], strides = [1, 1]} : vector<3x512xf32> to vector<1x512xf32>
    %156 = vector.broadcast %154 : vector<2x1xf32> to vector<2x512xf32>
    %157 = vector.broadcast %155 : vector<1x512xf32> to vector<2x512xf32>
    %158 = arith.mulf %156, %157 : vector<2x512xf32>
    %159 = arith.addf %153, %158 : vector<2x512xf32>
    %160 = vector.extract_strided_slice %2 {offsets = [0, 7], sizes = [2, 1], strides = [1, 1]} : vector<2x8xf32> to vector<2x1xf32>
    %161 = vector.extract_strided_slice %5 {offsets = [2, 0], sizes = [1, 512], strides = [1, 1]} : vector<3x512xf32> to vector<1x512xf32>
    %162 = vector.broadcast %160 : vector<2x1xf32> to vector<2x512xf32>
    %163 = vector.broadcast %161 : vector<1x512xf32> to vector<2x512xf32>
    %164 = arith.mulf %162, %163 : vector<2x512xf32>
    %165 = arith.addf %159, %164 : vector<2x512xf32>
    %c56 = arith.constant 56 : index
    %c0_19 = arith.constant 0 : index
    %166 = vector.load %arg14[%c56, %c0_19] : memref<64x512xf32, #tpu.memory_space<vmem>>, vector<2x512xf32>
    tpu.vector_store %arg14[%c56, %c0_19], %165 {strides = array<i32>} : memref<64x512xf32, #tpu.memory_space<vmem>>, vector<2x512xf32>,
    %c0_20 = arith.constant 0 : index
    %c0_21 = arith.constant 0 : index
    %167 = vector.load %arg6[%c0_20, %c0_21] : memref<128x512xf32, #tpu.memory_space<vmem>>, vector<128x512xf32>
    %cst_22 = arith.constant 0.000000e+00 : f32
    %168 = vector.broadcast %cst_22 : f32 to vector<2x128xf32>
    %cst_23 = arith.constant 0.000000e+00 : f32
    %169 = vector.broadcast %cst_23 : f32 to vector<2x128xf32>
    %c0_24 = arith.constant 0 : index
    %c0_25 = arith.constant 0 : index
    %170 = vector.load %arg14[%c0_24, %c0_25] : memref<64x512xf32, #tpu.memory_space<vmem>>, vector<2x512xf32>
    %cst_26 = arith.constant dense<0.000000e+00> : vector<2x512xf32>
    %171 = tpu.matmul %168, %167, %cst_26 {dimension_numbers = #tpu.dot_dimension_numbers<[1], [0], [0], [1], [0, 0, 1, 1], [], []>} : vector<2x128xf32>, vector<128x512xf32>, vector<2x512xf32> -> vector<2x512xf32>
    %172 = arith.addf %170, %171 : vector<2x512xf32>
    %173 = vector.extract_strided_slice %172 {offsets = [0, 0], sizes = [2, 128], strides = [1, 1]} : vector<2x512xf32> to vector<2x128xf32>
    %174 = arith.negf %173 : vector<2x128xf32>
    %175 = math.exp %174 : vector<2x128xf32>
    %cst_27 = arith.constant 1.000000e+00 : f32
    %176 = vector.broadcast %cst_27 : f32 to vector<2x128xf32>
    %177 = arith.addf %176, %175 : vector<2x128xf32>
    %178 = arith.divf %176, %177 : vector<2x128xf32>
    %179 = vector.extract_strided_slice %172 {offsets = [0, 128], sizes = [2, 128], strides = [1, 1]} : vector<2x512xf32> to vector<2x128xf32>
    %180 = arith.negf %179 : vector<2x128xf32>
    %181 = math.exp %180 : vector<2x128xf32>
    %cst_28 = arith.constant 1.000000e+00 : f32
    %182 = vector.broadcast %cst_28 : f32 to vector<2x128xf32>
    %183 = arith.addf %182, %181 : vector<2x128xf32>
    %184 = arith.divf %182, %183 : vector<2x128xf32>
    %185 = vector.extract_strided_slice %172 {offsets = [0, 256], sizes = [2, 128], strides = [1, 1]} : vector<2x512xf32> to vector<2x128xf32>
    %186 = math.tanh %185 : vector<2x128xf32>
    %187 = vector.extract_strided_slice %172 {offsets = [0, 384], sizes = [2, 128], strides = [1, 1]} : vector<2x512xf32> to vector<2x128xf32>
    %188 = arith.negf %187 : vector<2x128xf32>
    %189 = math.exp %188 : vector<2x128xf32>
    %cst_29 = arith.constant 1.000000e+00 : f32
    %190 = vector.broadcast %cst_29 : f32 to vector<2x128xf32>
    %191 = arith.addf %190, %189 : vector<2x128xf32>
    %192 = arith.divf %190, %191 : vector<2x128xf32>
    %193 = arith.mulf %184, %169 : vector<2x128xf32>
    %194 = arith.mulf %178, %186 : vector<2x128xf32>
    %195 = arith.addf %193, %194 : vector<2x128xf32>
    %196 = math.tanh %195 : vector<2x128xf32>
    %197 = arith.mulf %192, %196 : vector<2x128xf32>
    %c0_30 = arith.constant 0 : index
    %c0_31 = arith.constant 0 : index
    %198 = vector.load %arg15[%c0_30, %c0_31] : memref<64x128xf32, #tpu.memory_space<vmem>>, vector<2x128xf32>
    tpu.vector_store %arg15[%c0_30, %c0_31], %197 {strides = array<i32>} : memref<64x128xf32, #tpu.memory_space<vmem>>, vector<2x128xf32>,
    %c8_32 = arith.constant 8 : index
    %c0_33 = arith.constant 0 : index
    %199 = vector.load %arg14[%c8_32, %c0_33] : memref<64x512xf32, #tpu.memory_space<vmem>>, vector<2x512xf32>
    %cst_34 = arith.constant dense<0.000000e+00> : vector<2x512xf32>
    %200 = tpu.matmul %197, %167, %cst_34 {dimension_numbers = #tpu.dot_dimension_numbers<[1], [0], [0], [1], [0, 0, 1, 1], [], []>} : vector<2x128xf32>, vector<128x512xf32>, vector<2x512xf32> -> vector<2x512xf32>
    %201 = arith.addf %199, %200 : vector<2x512xf32>
    %202 = vector.extract_strided_slice %201 {offsets = [0, 0], sizes = [2, 128], strides = [1, 1]} : vector<2x512xf32> to vector<2x128xf32>
    %203 = arith.negf %202 : vector<2x128xf32>
    %204 = math.exp %203 : vector<2x128xf32>
    %cst_35 = arith.constant 1.000000e+00 : f32
    %205 = vector.broadcast %cst_35 : f32 to vector<2x128xf32>
    %206 = arith.addf %205, %204 : vector<2x128xf32>
    %207 = arith.divf %205, %206 : vector<2x128xf32>
    %208 = vector.extract_strided_slice %201 {offsets = [0, 128], sizes = [2, 128], strides = [1, 1]} : vector<2x512xf32> to vector<2x128xf32>
    %209 = arith.negf %208 : vector<2x128xf32>
    %210 = math.exp %209 : vector<2x128xf32>
    %cst_36 = arith.constant 1.000000e+00 : f32
    %211 = vector.broadcast %cst_36 : f32 to vector<2x128xf32>
    %212 = arith.addf %211, %210 : vector<2x128xf32>
    %213 = arith.divf %211, %212 : vector<2x128xf32>
    %214 = vector.extract_strided_slice %201 {offsets = [0, 256], sizes = [2, 128], strides = [1, 1]} : vector<2x512xf32> to vector<2x128xf32>
    %215 = math.tanh %214 : vector<2x128xf32>
    %216 = vector.extract_strided_slice %201 {offsets = [0, 384], sizes = [2, 128], strides = [1, 1]} : vector<2x512xf32> to vector<2x128xf32>
    %217 = arith.negf %216 : vector<2x128xf32>
    %218 = math.exp %217 : vector<2x128xf32>
    %cst_37 = arith.constant 1.000000e+00 : f32
    %219 = vector.broadcast %cst_37 : f32 to vector<2x128xf32>
    %220 = arith.addf %219, %218 : vector<2x128xf32>
    %221 = arith.divf %219, %220 : vector<2x128xf32>
    %222 = arith.mulf %213, %195 : vector<2x128xf32>
    %223 = arith.mulf %207, %215 : vector<2x128xf32>
    %224 = arith.addf %222, %223 : vector<2x128xf32>
    %225 = math.tanh %224 : vector<2x128xf32>
    %226 = arith.mulf %221, %225 : vector<2x128xf32>
    %c8_38 = arith.constant 8 : index
    %c0_39 = arith.constant 0 : index
    %227 = vector.load %arg15[%c8_38, %c0_39] : memref<64x128xf32, #tpu.memory_space<vmem>>, vector<2x128xf32>
    tpu.vector_store %arg15[%c8_38, %c0_39], %226 {strides = array<i32>} : memref<64x128xf32, #tpu.memory_space<vmem>>, vector<2x128xf32>,
    %c16_40 = arith.constant 16 : index
    %c0_41 = arith.constant 0 : index
    %228 = vector.load %arg14[%c16_40, %c0_41] : memref<64x512xf32, #tpu.memory_space<vmem>>, vector<2x512xf32>
    %cst_42 = arith.constant dense<0.000000e+00> : vector<2x512xf32>
    %229 = tpu.matmul %226, %167, %cst_42 {dimension_numbers = #tpu.dot_dimension_numbers<[1], [0], [0], [1], [0, 0, 1, 1], [], []>} : vector<2x128xf32>, vector<128x512xf32>, vector<2x512xf32> -> vector<2x512xf32>
    %230 = arith.addf %228, %229 : vector<2x512xf32>
    %231 = vector.extract_strided_slice %230 {offsets = [0, 0], sizes = [2, 128], strides = [1, 1]} : vector<2x512xf32> to vector<2x128xf32>
    %232 = arith.negf %231 : vector<2x128xf32>
    %233 = math.exp %232 : vector<2x128xf32>
    %cst_43 = arith.constant 1.000000e+00 : f32
    %234 = vector.broadcast %cst_43 : f32 to vector<2x128xf32>
    %235 = arith.addf %234, %233 : vector<2x128xf32>
    %236 = arith.divf %234, %235 : vector<2x128xf32>
    %237 = vector.extract_strided_slice %230 {offsets = [0, 128], sizes = [2, 128], strides = [1, 1]} : vector<2x512xf32> to vector<2x128xf32>
    %238 = arith.negf %237 : vector<2x128xf32>
    %239 = math.exp %238 : vector<2x128xf32>
    %cst_44 = arith.constant 1.000000e+00 : f32
    %240 = vector.broadcast %cst_44 : f32 to vector<2x128xf32>
    %241 = arith.addf %240, %239 : vector<2x128xf32>
    %242 = arith.divf %240, %241 : vector<2x128xf32>
    %243 = vector.extract_strided_slice %230 {offsets = [0, 256], sizes = [2, 128], strides = [1, 1]} : vector<2x512xf32> to vector<2x128xf32>
    %244 = math.tanh %243 : vector<2x128xf32>
    %245 = vector.extract_strided_slice %230 {offsets = [0, 384], sizes = [2, 128], strides = [1, 1]} : vector<2x512xf32> to vector<2x128xf32>
    %246 = arith.negf %245 : vector<2x128xf32>
    %247 = math.exp %246 : vector<2x128xf32>
    %cst_45 = arith.constant 1.000000e+00 : f32
    %248 = vector.broadcast %cst_45 : f32 to vector<2x128xf32>
    %249 = arith.addf %248, %247 : vector<2x128xf32>
    %250 = arith.divf %248, %249 : vector<2x128xf32>
    %251 = arith.mulf %242, %224 : vector<2x128xf32>
    %252 = arith.mulf %236, %244 : vector<2x128xf32>
    %253 = arith.addf %251, %252 : vector<2x128xf32>
    %254 = math.tanh %253 : vector<2x128xf32>
    %255 = arith.mulf %250, %254 : vector<2x128xf32>
    %c16_46 = arith.constant 16 : index
    %c0_47 = arith.constant 0 : index
    %256 = vector.load %arg15[%c16_46, %c0_47] : memref<64x128xf32, #tpu.memory_space<vmem>>, vector<2x128xf32>
    tpu.vector_store %arg15[%c16_46, %c0_47], %255 {strides = array<i32>} : memref<64x128xf32, #tpu.memory_space<vmem>>, vector<2x128xf32>,
    %c24_48 = arith.constant 24 : index
    %c0_49 = arith.constant 0 : index
    %257 = vector.load %arg14[%c24_48, %c0_49] : memref<64x512xf32, #tpu.memory_space<vmem>>, vector<2x512xf32>
    %cst_50 = arith.constant dense<0.000000e+00> : vector<2x512xf32>
    %258 = tpu.matmul %255, %167, %cst_50 {dimension_numbers = #tpu.dot_dimension_numbers<[1], [0], [0], [1], [0, 0, 1, 1], [], []>} : vector<2x128xf32>, vector<128x512xf32>, vector<2x512xf32> -> vector<2x512xf32>
    %259 = arith.addf %257, %258 : vector<2x512xf32>
    %260 = vector.extract_strided_slice %259 {offsets = [0, 0], sizes = [2, 128], strides = [1, 1]} : vector<2x512xf32> to vector<2x128xf32>
    %261 = arith.negf %260 : vector<2x128xf32>
    %262 = math.exp %261 : vector<2x128xf32>
    %cst_51 = arith.constant 1.000000e+00 : f32
    %263 = vector.broadcast %cst_51 : f32 to vector<2x128xf32>
    %264 = arith.addf %263, %262 : vector<2x128xf32>
    %265 = arith.divf %263, %264 : vector<2x128xf32>
    %266 = vector.extract_strided_slice %259 {offsets = [0, 128], sizes = [2, 128], strides = [1, 1]} : vector<2x512xf32> to vector<2x128xf32>
    %267 = arith.negf %266 : vector<2x128xf32>
    %268 = math.exp %267 : vector<2x128xf32>
    %cst_52 = arith.constant 1.000000e+00 : f32
    %269 = vector.broadcast %cst_52 : f32 to vector<2x128xf32>
    %270 = arith.addf %269, %268 : vector<2x128xf32>
    %271 = arith.divf %269, %270 : vector<2x128xf32>
    %272 = vector.extract_strided_slice %259 {offsets = [0, 256], sizes = [2, 128], strides = [1, 1]} : vector<2x512xf32> to vector<2x128xf32>
    %273 = math.tanh %272 : vector<2x128xf32>
    %274 = vector.extract_strided_slice %259 {offsets = [0, 384], sizes = [2, 128], strides = [1, 1]} : vector<2x512xf32> to vector<2x128xf32>
    %275 = arith.negf %274 : vector<2x128xf32>
    %276 = math.exp %275 : vector<2x128xf32>
    %cst_53 = arith.constant 1.000000e+00 : f32
    %277 = vector.broadcast %cst_53 : f32 to vector<2x128xf32>
    %278 = arith.addf %277, %276 : vector<2x128xf32>
    %279 = arith.divf %277, %278 : vector<2x128xf32>
    %280 = arith.mulf %271, %253 : vector<2x128xf32>
    %281 = arith.mulf %265, %273 : vector<2x128xf32>
    %282 = arith.addf %280, %281 : vector<2x128xf32>
    %283 = math.tanh %282 : vector<2x128xf32>
    %284 = arith.mulf %279, %283 : vector<2x128xf32>
    %c24_54 = arith.constant 24 : index
    %c0_55 = arith.constant 0 : index
    %285 = vector.load %arg15[%c24_54, %c0_55] : memref<64x128xf32, #tpu.memory_space<vmem>>, vector<2x128xf32>
    tpu.vector_store %arg15[%c24_54, %c0_55], %284 {strides = array<i32>} : memref<64x128xf32, #tpu.memory_space<vmem>>, vector<2x128xf32>,
    %c32_56 = arith.constant 32 : index
    %c0_57 = arith.constant 0 : index
    %286 = vector.load %arg14[%c32_56, %c0_57] : memref<64x512xf32, #tpu.memory_space<vmem>>, vector<2x512xf32>
    %cst_58 = arith.constant dense<0.000000e+00> : vector<2x512xf32>
    %287 = tpu.matmul %284, %167, %cst_58 {dimension_numbers = #tpu.dot_dimension_numbers<[1], [0], [0], [1], [0, 0, 1, 1], [], []>} : vector<2x128xf32>, vector<128x512xf32>, vector<2x512xf32> -> vector<2x512xf32>
    %288 = arith.addf %286, %287 : vector<2x512xf32>
    %289 = vector.extract_strided_slice %288 {offsets = [0, 0], sizes = [2, 128], strides = [1, 1]} : vector<2x512xf32> to vector<2x128xf32>
    %290 = arith.negf %289 : vector<2x128xf32>
    %291 = math.exp %290 : vector<2x128xf32>
    %cst_59 = arith.constant 1.000000e+00 : f32
    %292 = vector.broadcast %cst_59 : f32 to vector<2x128xf32>
    %293 = arith.addf %292, %291 : vector<2x128xf32>
    %294 = arith.divf %292, %293 : vector<2x128xf32>
    %295 = vector.extract_strided_slice %288 {offsets = [0, 128], sizes = [2, 128], strides = [1, 1]} : vector<2x512xf32> to vector<2x128xf32>
    %296 = arith.negf %295 : vector<2x128xf32>
    %297 = math.exp %296 : vector<2x128xf32>
    %cst_60 = arith.constant 1.000000e+00 : f32
    %298 = vector.broadcast %cst_60 : f32 to vector<2x128xf32>
    %299 = arith.addf %298, %297 : vector<2x128xf32>
    %300 = arith.divf %298, %299 : vector<2x128xf32>
    %301 = vector.extract_strided_slice %288 {offsets = [0, 256], sizes = [2, 128], strides = [1, 1]} : vector<2x512xf32> to vector<2x128xf32>
    %302 = math.tanh %301 : vector<2x128xf32>
    %303 = vector.extract_strided_slice %288 {offsets = [0, 384], sizes = [2, 128], strides = [1, 1]} : vector<2x512xf32> to vector<2x128xf32>
    %304 = arith.negf %303 : vector<2x128xf32>
    %305 = math.exp %304 : vector<2x128xf32>
    %cst_61 = arith.constant 1.000000e+00 : f32
    %306 = vector.broadcast %cst_61 : f32 to vector<2x128xf32>
    %307 = arith.addf %306, %305 : vector<2x128xf32>
    %308 = arith.divf %306, %307 : vector<2x128xf32>
    %309 = arith.mulf %300, %282 : vector<2x128xf32>
    %310 = arith.mulf %294, %302 : vector<2x128xf32>
    %311 = arith.addf %309, %310 : vector<2x128xf32>
    %312 = math.tanh %311 : vector<2x128xf32>
    %313 = arith.mulf %308, %312 : vector<2x128xf32>
    %c32_62 = arith.constant 32 : index
    %c0_63 = arith.constant 0 : index
    %314 = vector.load %arg15[%c32_62, %c0_63] : memref<64x128xf32, #tpu.memory_space<vmem>>, vector<2x128xf32>
    tpu.vector_store %arg15[%c32_62, %c0_63], %313 {strides = array<i32>} : memref<64x128xf32, #tpu.memory_space<vmem>>, vector<2x128xf32>,
    %c40_64 = arith.constant 40 : index
    %c0_65 = arith.constant 0 : index
    %315 = vector.load %arg14[%c40_64, %c0_65] : memref<64x512xf32, #tpu.memory_space<vmem>>, vector<2x512xf32>
    %cst_66 = arith.constant dense<0.000000e+00> : vector<2x512xf32>
    %316 = tpu.matmul %313, %167, %cst_66 {dimension_numbers = #tpu.dot_dimension_numbers<[1], [0], [0], [1], [0, 0, 1, 1], [], []>} : vector<2x128xf32>, vector<128x512xf32>, vector<2x512xf32> -> vector<2x512xf32>
    %317 = arith.addf %315, %316 : vector<2x512xf32>
    %318 = vector.extract_strided_slice %317 {offsets = [0, 0], sizes = [2, 128], strides = [1, 1]} : vector<2x512xf32> to vector<2x128xf32>
    %319 = arith.negf %318 : vector<2x128xf32>
    %320 = math.exp %319 : vector<2x128xf32>
    %cst_67 = arith.constant 1.000000e+00 : f32
    %321 = vector.broadcast %cst_67 : f32 to vector<2x128xf32>
    %322 = arith.addf %321, %320 : vector<2x128xf32>
    %323 = arith.divf %321, %322 : vector<2x128xf32>
    %324 = vector.extract_strided_slice %317 {offsets = [0, 128], sizes = [2, 128], strides = [1, 1]} : vector<2x512xf32> to vector<2x128xf32>
    %325 = arith.negf %324 : vector<2x128xf32>
    %326 = math.exp %325 : vector<2x128xf32>
    %cst_68 = arith.constant 1.000000e+00 : f32
    %327 = vector.broadcast %cst_68 : f32 to vector<2x128xf32>
    %328 = arith.addf %327, %326 : vector<2x128xf32>
    %329 = arith.divf %327, %328 : vector<2x128xf32>
    %330 = vector.extract_strided_slice %317 {offsets = [0, 256], sizes = [2, 128], strides = [1, 1]} : vector<2x512xf32> to vector<2x128xf32>
    %331 = math.tanh %330 : vector<2x128xf32>
    %332 = vector.extract_strided_slice %317 {offsets = [0, 384], sizes = [2, 128], strides = [1, 1]} : vector<2x512xf32> to vector<2x128xf32>
    %333 = arith.negf %332 : vector<2x128xf32>
    %334 = math.exp %333 : vector<2x128xf32>
    %cst_69 = arith.constant 1.000000e+00 : f32
    %335 = vector.broadcast %cst_69 : f32 to vector<2x128xf32>
    %336 = arith.addf %335, %334 : vector<2x128xf32>
    %337 = arith.divf %335, %336 : vector<2x128xf32>
    %338 = arith.mulf %329, %311 : vector<2x128xf32>
    %339 = arith.mulf %323, %331 : vector<2x128xf32>
    %340 = arith.addf %338, %339 : vector<2x128xf32>
    %341 = math.tanh %340 : vector<2x128xf32>
    %342 = arith.mulf %337, %341 : vector<2x128xf32>
    %c40_70 = arith.constant 40 : index
    %c0_71 = arith.constant 0 : index
    %343 = vector.load %arg15[%c40_70, %c0_71] : memref<64x128xf32, #tpu.memory_space<vmem>>, vector<2x128xf32>
    tpu.vector_store %arg15[%c40_70, %c0_71], %342 {strides = array<i32>} : memref<64x128xf32, #tpu.memory_space<vmem>>, vector<2x128xf32>,
    %c48_72 = arith.constant 48 : index
    %c0_73 = arith.constant 0 : index
    %344 = vector.load %arg14[%c48_72, %c0_73] : memref<64x512xf32, #tpu.memory_space<vmem>>, vector<2x512xf32>
    %cst_74 = arith.constant dense<0.000000e+00> : vector<2x512xf32>
    %345 = tpu.matmul %342, %167, %cst_74 {dimension_numbers = #tpu.dot_dimension_numbers<[1], [0], [0], [1], [0, 0, 1, 1], [], []>} : vector<2x128xf32>, vector<128x512xf32>, vector<2x512xf32> -> vector<2x512xf32>
    %346 = arith.addf %344, %345 : vector<2x512xf32>
    %347 = vector.extract_strided_slice %346 {offsets = [0, 0], sizes = [2, 128], strides = [1, 1]} : vector<2x512xf32> to vector<2x128xf32>
    %348 = arith.negf %347 : vector<2x128xf32>
    %349 = math.exp %348 : vector<2x128xf32>
    %cst_75 = arith.constant 1.000000e+00 : f32
    %350 = vector.broadcast %cst_75 : f32 to vector<2x128xf32>
    %351 = arith.addf %350, %349 : vector<2x128xf32>
    %352 = arith.divf %350, %351 : vector<2x128xf32>
    %353 = vector.extract_strided_slice %346 {offsets = [0, 128], sizes = [2, 128], strides = [1, 1]} : vector<2x512xf32> to vector<2x128xf32>
    %354 = arith.negf %353 : vector<2x128xf32>
    %355 = math.exp %354 : vector<2x128xf32>
    %cst_76 = arith.constant 1.000000e+00 : f32
    %356 = vector.broadcast %cst_76 : f32 to vector<2x128xf32>
    %357 = arith.addf %356, %355 : vector<2x128xf32>
    %358 = arith.divf %356, %357 : vector<2x128xf32>
    %359 = vector.extract_strided_slice %346 {offsets = [0, 256], sizes = [2, 128], strides = [1, 1]} : vector<2x512xf32> to vector<2x128xf32>
    %360 = math.tanh %359 : vector<2x128xf32>
    %361 = vector.extract_strided_slice %346 {offsets = [0, 384], sizes = [2, 128], strides = [1, 1]} : vector<2x512xf32> to vector<2x128xf32>
    %362 = arith.negf %361 : vector<2x128xf32>
    %363 = math.exp %362 : vector<2x128xf32>
    %cst_77 = arith.constant 1.000000e+00 : f32
    %364 = vector.broadcast %cst_77 : f32 to vector<2x128xf32>
    %365 = arith.addf %364, %363 : vector<2x128xf32>
    %366 = arith.divf %364, %365 : vector<2x128xf32>
    %367 = arith.mulf %358, %340 : vector<2x128xf32>
    %368 = arith.mulf %352, %360 : vector<2x128xf32>
    %369 = arith.addf %367, %368 : vector<2x128xf32>
    %370 = math.tanh %369 : vector<2x128xf32>
    %371 = arith.mulf %366, %370 : vector<2x128xf32>
    %c48_78 = arith.constant 48 : index
    %c0_79 = arith.constant 0 : index
    %372 = vector.load %arg15[%c48_78, %c0_79] : memref<64x128xf32, #tpu.memory_space<vmem>>, vector<2x128xf32>
    tpu.vector_store %arg15[%c48_78, %c0_79], %371 {strides = array<i32>} : memref<64x128xf32, #tpu.memory_space<vmem>>, vector<2x128xf32>,
    %c56_80 = arith.constant 56 : index
    %c0_81 = arith.constant 0 : index
    %373 = vector.load %arg14[%c56_80, %c0_81] : memref<64x512xf32, #tpu.memory_space<vmem>>, vector<2x512xf32>
    %cst_82 = arith.constant dense<0.000000e+00> : vector<2x512xf32>
    %374 = tpu.matmul %371, %167, %cst_82 {dimension_numbers = #tpu.dot_dimension_numbers<[1], [0], [0], [1], [0, 0, 1, 1], [], []>} : vector<2x128xf32>, vector<128x512xf32>, vector<2x512xf32> -> vector<2x512xf32>
    %375 = arith.addf %373, %374 : vector<2x512xf32>
    %376 = vector.extract_strided_slice %375 {offsets = [0, 0], sizes = [2, 128], strides = [1, 1]} : vector<2x512xf32> to vector<2x128xf32>
    %377 = arith.negf %376 : vector<2x128xf32>
    %378 = math.exp %377 : vector<2x128xf32>
    %cst_83 = arith.constant 1.000000e+00 : f32
    %379 = vector.broadcast %cst_83 : f32 to vector<2x128xf32>
    %380 = arith.addf %379, %378 : vector<2x128xf32>
    %381 = arith.divf %379, %380 : vector<2x128xf32>
    %382 = vector.extract_strided_slice %375 {offsets = [0, 128], sizes = [2, 128], strides = [1, 1]} : vector<2x512xf32> to vector<2x128xf32>
    %383 = arith.negf %382 : vector<2x128xf32>
    %384 = math.exp %383 : vector<2x128xf32>
    %cst_84 = arith.constant 1.000000e+00 : f32
    %385 = vector.broadcast %cst_84 : f32 to vector<2x128xf32>
    %386 = arith.addf %385, %384 : vector<2x128xf32>
    %387 = arith.divf %385, %386 : vector<2x128xf32>
    %388 = vector.extract_strided_slice %375 {offsets = [0, 256], sizes = [2, 128], strides = [1, 1]} : vector<2x512xf32> to vector<2x128xf32>
    %389 = math.tanh %388 : vector<2x128xf32>
    %390 = vector.extract_strided_slice %375 {offsets = [0, 384], sizes = [2, 128], strides = [1, 1]} : vector<2x512xf32> to vector<2x128xf32>
    %391 = arith.negf %390 : vector<2x128xf32>
    %392 = math.exp %391 : vector<2x128xf32>
    %cst_85 = arith.constant 1.000000e+00 : f32
    %393 = vector.broadcast %cst_85 : f32 to vector<2x128xf32>
    %394 = arith.addf %393, %392 : vector<2x128xf32>
    %395 = arith.divf %393, %394 : vector<2x128xf32>
    %396 = arith.mulf %387, %369 : vector<2x128xf32>
    %397 = arith.mulf %381, %389 : vector<2x128xf32>
    %398 = arith.addf %396, %397 : vector<2x128xf32>
    %399 = math.tanh %398 : vector<2x128xf32>
    %400 = arith.mulf %395, %399 : vector<2x128xf32>
    %c56_86 = arith.constant 56 : index
    %c0_87 = arith.constant 0 : index
    %401 = vector.load %arg15[%c56_86, %c0_87] : memref<64x128xf32, #tpu.memory_space<vmem>>, vector<2x128xf32>
    tpu.vector_store %arg15[%c56_86, %c0_87], %400 {strides = array<i32>} : memref<64x128xf32, #tpu.memory_space<vmem>>, vector<2x128xf32>,
    %c0_88 = arith.constant 0 : index
    %c0_89 = arith.constant 0 : index
    %402 = vector.load %arg15[%c0_88, %c0_89] : memref<64x128xf32, #tpu.memory_space<vmem>>, vector<64x128xf32>
    %c0_90 = arith.constant 0 : index
    %c0_91 = arith.constant 0 : index
    %403 = vector.load %arg8[%c0_90, %c0_91] : memref<128x512xf32, #tpu.memory_space<vmem>>, vector<128x512xf32>
    %cst_92 = arith.constant dense<0.000000e+00> : vector<64x512xf32>
    %404 = tpu.matmul %402, %403, %cst_92 {dimension_numbers = #tpu.dot_dimension_numbers<[1], [0], [0], [1], [0, 0, 1, 1], [], []>} : vector<64x128xf32>, vector<128x512xf32>, vector<64x512xf32> -> vector<64x512xf32>
    %c0_93 = arith.constant 0 : index
    %c0_94 = arith.constant 0 : index
    %405 = vector.load %arg10[%c0_93, %c0_94] : memref<1x512xf32, #tpu.memory_space<vmem>>, vector<1x512xf32>
    %406 = vector.broadcast %405 : vector<1x512xf32> to vector<64x512xf32>
    %407 = arith.addf %404, %406 : vector<64x512xf32>
    %c0_95 = arith.constant 0 : index
    %c0_96 = arith.constant 0 : index
    %408 = vector.load %arg14[%c0_95, %c0_96] : memref<64x512xf32, #tpu.memory_space<vmem>>, vector<64x512xf32>
    tpu.vector_store %arg14[%c0_95, %c0_96], %407 {strides = array<i32>} : memref<64x512xf32, #tpu.memory_space<vmem>>, vector<64x512xf32>,
    %c0_97 = arith.constant 0 : index
    %c0_98 = arith.constant 0 : index
    %409 = vector.load %arg9[%c0_97, %c0_98] : memref<128x512xf32, #tpu.memory_space<vmem>>, vector<128x512xf32>
    %cst_99 = arith.constant 0.000000e+00 : f32
    %410 = vector.broadcast %cst_99 : f32 to vector<2x128xf32>
    %cst_100 = arith.constant 0.000000e+00 : f32
    %411 = vector.broadcast %cst_100 : f32 to vector<2x128xf32>
    %c0_101 = arith.constant 0 : index
    %c0_102 = arith.constant 0 : index
    %412 = vector.load %arg14[%c0_101, %c0_102] : memref<64x512xf32, #tpu.memory_space<vmem>>, vector<2x512xf32>
    %cst_103 = arith.constant dense<0.000000e+00> : vector<2x512xf32>
    %413 = tpu.matmul %410, %409, %cst_103 {dimension_numbers = #tpu.dot_dimension_numbers<[1], [0], [0], [1], [0, 0, 1, 1], [], []>} : vector<2x128xf32>, vector<128x512xf32>, vector<2x512xf32> -> vector<2x512xf32>
    %414 = arith.addf %412, %413 : vector<2x512xf32>
    %415 = vector.extract_strided_slice %414 {offsets = [0, 0], sizes = [2, 128], strides = [1, 1]} : vector<2x512xf32> to vector<2x128xf32>
    %416 = arith.negf %415 : vector<2x128xf32>
    %417 = math.exp %416 : vector<2x128xf32>
    %cst_104 = arith.constant 1.000000e+00 : f32
    %418 = vector.broadcast %cst_104 : f32 to vector<2x128xf32>
    %419 = arith.addf %418, %417 : vector<2x128xf32>
    %420 = arith.divf %418, %419 : vector<2x128xf32>
    %421 = vector.extract_strided_slice %414 {offsets = [0, 128], sizes = [2, 128], strides = [1, 1]} : vector<2x512xf32> to vector<2x128xf32>
    %422 = arith.negf %421 : vector<2x128xf32>
    %423 = math.exp %422 : vector<2x128xf32>
    %cst_105 = arith.constant 1.000000e+00 : f32
    %424 = vector.broadcast %cst_105 : f32 to vector<2x128xf32>
    %425 = arith.addf %424, %423 : vector<2x128xf32>
    %426 = arith.divf %424, %425 : vector<2x128xf32>
    %427 = vector.extract_strided_slice %414 {offsets = [0, 256], sizes = [2, 128], strides = [1, 1]} : vector<2x512xf32> to vector<2x128xf32>
    %428 = math.tanh %427 : vector<2x128xf32>
    %429 = vector.extract_strided_slice %414 {offsets = [0, 384], sizes = [2, 128], strides = [1, 1]} : vector<2x512xf32> to vector<2x128xf32>
    %430 = arith.negf %429 : vector<2x128xf32>
    %431 = math.exp %430 : vector<2x128xf32>
    %cst_106 = arith.constant 1.000000e+00 : f32
    %432 = vector.broadcast %cst_106 : f32 to vector<2x128xf32>
    %433 = arith.addf %432, %431 : vector<2x128xf32>
    %434 = arith.divf %432, %433 : vector<2x128xf32>
    %435 = arith.mulf %426, %411 : vector<2x128xf32>
    %436 = arith.mulf %420, %428 : vector<2x128xf32>
    %437 = arith.addf %435, %436 : vector<2x128xf32>
    %438 = math.tanh %437 : vector<2x128xf32>
    %439 = arith.mulf %434, %438 : vector<2x128xf32>
    %c8_107 = arith.constant 8 : index
    %c0_108 = arith.constant 0 : index
    %440 = vector.load %arg14[%c8_107, %c0_108] : memref<64x512xf32, #tpu.memory_space<vmem>>, vector<2x512xf32>
    %cst_109 = arith.constant dense<0.000000e+00> : vector<2x512xf32>
    %441 = tpu.matmul %439, %409, %cst_109 {dimension_numbers = #tpu.dot_dimension_numbers<[1], [0], [0], [1], [0, 0, 1, 1], [], []>} : vector<2x128xf32>, vector<128x512xf32>, vector<2x512xf32> -> vector<2x512xf32>
    %442 = arith.addf %440, %441 : vector<2x512xf32>
    %443 = vector.extract_strided_slice %442 {offsets = [0, 0], sizes = [2, 128], strides = [1, 1]} : vector<2x512xf32> to vector<2x128xf32>
    %444 = arith.negf %443 : vector<2x128xf32>
    %445 = math.exp %444 : vector<2x128xf32>
    %cst_110 = arith.constant 1.000000e+00 : f32
    %446 = vector.broadcast %cst_110 : f32 to vector<2x128xf32>
    %447 = arith.addf %446, %445 : vector<2x128xf32>
    %448 = arith.divf %446, %447 : vector<2x128xf32>
    %449 = vector.extract_strided_slice %442 {offsets = [0, 128], sizes = [2, 128], strides = [1, 1]} : vector<2x512xf32> to vector<2x128xf32>
    %450 = arith.negf %449 : vector<2x128xf32>
    %451 = math.exp %450 : vector<2x128xf32>
    %cst_111 = arith.constant 1.000000e+00 : f32
    %452 = vector.broadcast %cst_111 : f32 to vector<2x128xf32>
    %453 = arith.addf %452, %451 : vector<2x128xf32>
    %454 = arith.divf %452, %453 : vector<2x128xf32>
    %455 = vector.extract_strided_slice %442 {offsets = [0, 256], sizes = [2, 128], strides = [1, 1]} : vector<2x512xf32> to vector<2x128xf32>
    %456 = math.tanh %455 : vector<2x128xf32>
    %457 = vector.extract_strided_slice %442 {offsets = [0, 384], sizes = [2, 128], strides = [1, 1]} : vector<2x512xf32> to vector<2x128xf32>
    %458 = arith.negf %457 : vector<2x128xf32>
    %459 = math.exp %458 : vector<2x128xf32>
    %cst_112 = arith.constant 1.000000e+00 : f32
    %460 = vector.broadcast %cst_112 : f32 to vector<2x128xf32>
    %461 = arith.addf %460, %459 : vector<2x128xf32>
    %462 = arith.divf %460, %461 : vector<2x128xf32>
    %463 = arith.mulf %454, %437 : vector<2x128xf32>
    %464 = arith.mulf %448, %456 : vector<2x128xf32>
    %465 = arith.addf %463, %464 : vector<2x128xf32>
    %466 = math.tanh %465 : vector<2x128xf32>
    %467 = arith.mulf %462, %466 : vector<2x128xf32>
    %c16_113 = arith.constant 16 : index
    %c0_114 = arith.constant 0 : index
    %468 = vector.load %arg14[%c16_113, %c0_114] : memref<64x512xf32, #tpu.memory_space<vmem>>, vector<2x512xf32>
    %cst_115 = arith.constant dense<0.000000e+00> : vector<2x512xf32>
    %469 = tpu.matmul %467, %409, %cst_115 {dimension_numbers = #tpu.dot_dimension_numbers<[1], [0], [0], [1], [0, 0, 1, 1], [], []>} : vector<2x128xf32>, vector<128x512xf32>, vector<2x512xf32> -> vector<2x512xf32>
    %470 = arith.addf %468, %469 : vector<2x512xf32>
    %471 = vector.extract_strided_slice %470 {offsets = [0, 0], sizes = [2, 128], strides = [1, 1]} : vector<2x512xf32> to vector<2x128xf32>
    %472 = arith.negf %471 : vector<2x128xf32>
    %473 = math.exp %472 : vector<2x128xf32>
    %cst_116 = arith.constant 1.000000e+00 : f32
    %474 = vector.broadcast %cst_116 : f32 to vector<2x128xf32>
    %475 = arith.addf %474, %473 : vector<2x128xf32>
    %476 = arith.divf %474, %475 : vector<2x128xf32>
    %477 = vector.extract_strided_slice %470 {offsets = [0, 128], sizes = [2, 128], strides = [1, 1]} : vector<2x512xf32> to vector<2x128xf32>
    %478 = arith.negf %477 : vector<2x128xf32>
    %479 = math.exp %478 : vector<2x128xf32>
    %cst_117 = arith.constant 1.000000e+00 : f32
    %480 = vector.broadcast %cst_117 : f32 to vector<2x128xf32>
    %481 = arith.addf %480, %479 : vector<2x128xf32>
    %482 = arith.divf %480, %481 : vector<2x128xf32>
    %483 = vector.extract_strided_slice %470 {offsets = [0, 256], sizes = [2, 128], strides = [1, 1]} : vector<2x512xf32> to vector<2x128xf32>
    %484 = math.tanh %483 : vector<2x128xf32>
    %485 = vector.extract_strided_slice %470 {offsets = [0, 384], sizes = [2, 128], strides = [1, 1]} : vector<2x512xf32> to vector<2x128xf32>
    %486 = arith.negf %485 : vector<2x128xf32>
    %487 = math.exp %486 : vector<2x128xf32>
    %cst_118 = arith.constant 1.000000e+00 : f32
    %488 = vector.broadcast %cst_118 : f32 to vector<2x128xf32>
    %489 = arith.addf %488, %487 : vector<2x128xf32>
    %490 = arith.divf %488, %489 : vector<2x128xf32>
    %491 = arith.mulf %482, %465 : vector<2x128xf32>
    %492 = arith.mulf %476, %484 : vector<2x128xf32>
    %493 = arith.addf %491, %492 : vector<2x128xf32>
    %494 = math.tanh %493 : vector<2x128xf32>
    %495 = arith.mulf %490, %494 : vector<2x128xf32>
    %c24_119 = arith.constant 24 : index
    %c0_120 = arith.constant 0 : index
    %496 = vector.load %arg14[%c24_119, %c0_120] : memref<64x512xf32, #tpu.memory_space<vmem>>, vector<2x512xf32>
    %cst_121 = arith.constant dense<0.000000e+00> : vector<2x512xf32>
    %497 = tpu.matmul %495, %409, %cst_121 {dimension_numbers = #tpu.dot_dimension_numbers<[1], [0], [0], [1], [0, 0, 1, 1], [], []>} : vector<2x128xf32>, vector<128x512xf32>, vector<2x512xf32> -> vector<2x512xf32>
    %498 = arith.addf %496, %497 : vector<2x512xf32>
    %499 = vector.extract_strided_slice %498 {offsets = [0, 0], sizes = [2, 128], strides = [1, 1]} : vector<2x512xf32> to vector<2x128xf32>
    %500 = arith.negf %499 : vector<2x128xf32>
    %501 = math.exp %500 : vector<2x128xf32>
    %cst_122 = arith.constant 1.000000e+00 : f32
    %502 = vector.broadcast %cst_122 : f32 to vector<2x128xf32>
    %503 = arith.addf %502, %501 : vector<2x128xf32>
    %504 = arith.divf %502, %503 : vector<2x128xf32>
    %505 = vector.extract_strided_slice %498 {offsets = [0, 128], sizes = [2, 128], strides = [1, 1]} : vector<2x512xf32> to vector<2x128xf32>
    %506 = arith.negf %505 : vector<2x128xf32>
    %507 = math.exp %506 : vector<2x128xf32>
    %cst_123 = arith.constant 1.000000e+00 : f32
    %508 = vector.broadcast %cst_123 : f32 to vector<2x128xf32>
    %509 = arith.addf %508, %507 : vector<2x128xf32>
    %510 = arith.divf %508, %509 : vector<2x128xf32>
    %511 = vector.extract_strided_slice %498 {offsets = [0, 256], sizes = [2, 128], strides = [1, 1]} : vector<2x512xf32> to vector<2x128xf32>
    %512 = math.tanh %511 : vector<2x128xf32>
    %513 = vector.extract_strided_slice %498 {offsets = [0, 384], sizes = [2, 128], strides = [1, 1]} : vector<2x512xf32> to vector<2x128xf32>
    %514 = arith.negf %513 : vector<2x128xf32>
    %515 = math.exp %514 : vector<2x128xf32>
    %cst_124 = arith.constant 1.000000e+00 : f32
    %516 = vector.broadcast %cst_124 : f32 to vector<2x128xf32>
    %517 = arith.addf %516, %515 : vector<2x128xf32>
    %518 = arith.divf %516, %517 : vector<2x128xf32>
    %519 = arith.mulf %510, %493 : vector<2x128xf32>
    %520 = arith.mulf %504, %512 : vector<2x128xf32>
    %521 = arith.addf %519, %520 : vector<2x128xf32>
    %522 = math.tanh %521 : vector<2x128xf32>
    %523 = arith.mulf %518, %522 : vector<2x128xf32>
    %c32_125 = arith.constant 32 : index
    %c0_126 = arith.constant 0 : index
    %524 = vector.load %arg14[%c32_125, %c0_126] : memref<64x512xf32, #tpu.memory_space<vmem>>, vector<2x512xf32>
    %cst_127 = arith.constant dense<0.000000e+00> : vector<2x512xf32>
    %525 = tpu.matmul %523, %409, %cst_127 {dimension_numbers = #tpu.dot_dimension_numbers<[1], [0], [0], [1], [0, 0, 1, 1], [], []>} : vector<2x128xf32>, vector<128x512xf32>, vector<2x512xf32> -> vector<2x512xf32>
    %526 = arith.addf %524, %525 : vector<2x512xf32>
    %527 = vector.extract_strided_slice %526 {offsets = [0, 0], sizes = [2, 128], strides = [1, 1]} : vector<2x512xf32> to vector<2x128xf32>
    %528 = arith.negf %527 : vector<2x128xf32>
    %529 = math.exp %528 : vector<2x128xf32>
    %cst_128 = arith.constant 1.000000e+00 : f32
    %530 = vector.broadcast %cst_128 : f32 to vector<2x128xf32>
    %531 = arith.addf %530, %529 : vector<2x128xf32>
    %532 = arith.divf %530, %531 : vector<2x128xf32>
    %533 = vector.extract_strided_slice %526 {offsets = [0, 128], sizes = [2, 128], strides = [1, 1]} : vector<2x512xf32> to vector<2x128xf32>
    %534 = arith.negf %533 : vector<2x128xf32>
    %535 = math.exp %534 : vector<2x128xf32>
    %cst_129 = arith.constant 1.000000e+00 : f32
    %536 = vector.broadcast %cst_129 : f32 to vector<2x128xf32>
    %537 = arith.addf %536, %535 : vector<2x128xf32>
    %538 = arith.divf %536, %537 : vector<2x128xf32>
    %539 = vector.extract_strided_slice %526 {offsets = [0, 256], sizes = [2, 128], strides = [1, 1]} : vector<2x512xf32> to vector<2x128xf32>
    %540 = math.tanh %539 : vector<2x128xf32>
    %541 = vector.extract_strided_slice %526 {offsets = [0, 384], sizes = [2, 128], strides = [1, 1]} : vector<2x512xf32> to vector<2x128xf32>
    %542 = arith.negf %541 : vector<2x128xf32>
    %543 = math.exp %542 : vector<2x128xf32>
    %cst_130 = arith.constant 1.000000e+00 : f32
    %544 = vector.broadcast %cst_130 : f32 to vector<2x128xf32>
    %545 = arith.addf %544, %543 : vector<2x128xf32>
    %546 = arith.divf %544, %545 : vector<2x128xf32>
    %547 = arith.mulf %538, %521 : vector<2x128xf32>
    %548 = arith.mulf %532, %540 : vector<2x128xf32>
    %549 = arith.addf %547, %548 : vector<2x128xf32>
    %550 = math.tanh %549 : vector<2x128xf32>
    %551 = arith.mulf %546, %550 : vector<2x128xf32>
    %c40_131 = arith.constant 40 : index
    %c0_132 = arith.constant 0 : index
    %552 = vector.load %arg14[%c40_131, %c0_132] : memref<64x512xf32, #tpu.memory_space<vmem>>, vector<2x512xf32>
    %cst_133 = arith.constant dense<0.000000e+00> : vector<2x512xf32>
    %553 = tpu.matmul %551, %409, %cst_133 {dimension_numbers = #tpu.dot_dimension_numbers<[1], [0], [0], [1], [0, 0, 1, 1], [], []>} : vector<2x128xf32>, vector<128x512xf32>, vector<2x512xf32> -> vector<2x512xf32>
    %554 = arith.addf %552, %553 : vector<2x512xf32>
    %555 = vector.extract_strided_slice %554 {offsets = [0, 0], sizes = [2, 128], strides = [1, 1]} : vector<2x512xf32> to vector<2x128xf32>
    %556 = arith.negf %555 : vector<2x128xf32>
    %557 = math.exp %556 : vector<2x128xf32>
    %cst_134 = arith.constant 1.000000e+00 : f32
    %558 = vector.broadcast %cst_134 : f32 to vector<2x128xf32>
    %559 = arith.addf %558, %557 : vector<2x128xf32>
    %560 = arith.divf %558, %559 : vector<2x128xf32>
    %561 = vector.extract_strided_slice %554 {offsets = [0, 128], sizes = [2, 128], strides = [1, 1]} : vector<2x512xf32> to vector<2x128xf32>
    %562 = arith.negf %561 : vector<2x128xf32>
    %563 = math.exp %562 : vector<2x128xf32>
    %cst_135 = arith.constant 1.000000e+00 : f32
    %564 = vector.broadcast %cst_135 : f32 to vector<2x128xf32>
    %565 = arith.addf %564, %563 : vector<2x128xf32>
    %566 = arith.divf %564, %565 : vector<2x128xf32>
    %567 = vector.extract_strided_slice %554 {offsets = [0, 256], sizes = [2, 128], strides = [1, 1]} : vector<2x512xf32> to vector<2x128xf32>
    %568 = math.tanh %567 : vector<2x128xf32>
    %569 = vector.extract_strided_slice %554 {offsets = [0, 384], sizes = [2, 128], strides = [1, 1]} : vector<2x512xf32> to vector<2x128xf32>
    %570 = arith.negf %569 : vector<2x128xf32>
    %571 = math.exp %570 : vector<2x128xf32>
    %cst_136 = arith.constant 1.000000e+00 : f32
    %572 = vector.broadcast %cst_136 : f32 to vector<2x128xf32>
    %573 = arith.addf %572, %571 : vector<2x128xf32>
    %574 = arith.divf %572, %573 : vector<2x128xf32>
    %575 = arith.mulf %566, %549 : vector<2x128xf32>
    %576 = arith.mulf %560, %568 : vector<2x128xf32>
    %577 = arith.addf %575, %576 : vector<2x128xf32>
    %578 = math.tanh %577 : vector<2x128xf32>
    %579 = arith.mulf %574, %578 : vector<2x128xf32>
    %c48_137 = arith.constant 48 : index
    %c0_138 = arith.constant 0 : index
    %580 = vector.load %arg14[%c48_137, %c0_138] : memref<64x512xf32, #tpu.memory_space<vmem>>, vector<2x512xf32>
    %cst_139 = arith.constant dense<0.000000e+00> : vector<2x512xf32>
    %581 = tpu.matmul %579, %409, %cst_139 {dimension_numbers = #tpu.dot_dimension_numbers<[1], [0], [0], [1], [0, 0, 1, 1], [], []>} : vector<2x128xf32>, vector<128x512xf32>, vector<2x512xf32> -> vector<2x512xf32>
    %582 = arith.addf %580, %581 : vector<2x512xf32>
    %583 = vector.extract_strided_slice %582 {offsets = [0, 0], sizes = [2, 128], strides = [1, 1]} : vector<2x512xf32> to vector<2x128xf32>
    %584 = arith.negf %583 : vector<2x128xf32>
    %585 = math.exp %584 : vector<2x128xf32>
    %cst_140 = arith.constant 1.000000e+00 : f32
    %586 = vector.broadcast %cst_140 : f32 to vector<2x128xf32>
    %587 = arith.addf %586, %585 : vector<2x128xf32>
    %588 = arith.divf %586, %587 : vector<2x128xf32>
    %589 = vector.extract_strided_slice %582 {offsets = [0, 128], sizes = [2, 128], strides = [1, 1]} : vector<2x512xf32> to vector<2x128xf32>
    %590 = arith.negf %589 : vector<2x128xf32>
    %591 = math.exp %590 : vector<2x128xf32>
    %cst_141 = arith.constant 1.000000e+00 : f32
    %592 = vector.broadcast %cst_141 : f32 to vector<2x128xf32>
    %593 = arith.addf %592, %591 : vector<2x128xf32>
    %594 = arith.divf %592, %593 : vector<2x128xf32>
    %595 = vector.extract_strided_slice %582 {offsets = [0, 256], sizes = [2, 128], strides = [1, 1]} : vector<2x512xf32> to vector<2x128xf32>
    %596 = math.tanh %595 : vector<2x128xf32>
    %597 = vector.extract_strided_slice %582 {offsets = [0, 384], sizes = [2, 128], strides = [1, 1]} : vector<2x512xf32> to vector<2x128xf32>
    %598 = arith.negf %597 : vector<2x128xf32>
    %599 = math.exp %598 : vector<2x128xf32>
    %cst_142 = arith.constant 1.000000e+00 : f32
    %600 = vector.broadcast %cst_142 : f32 to vector<2x128xf32>
    %601 = arith.addf %600, %599 : vector<2x128xf32>
    %602 = arith.divf %600, %601 : vector<2x128xf32>
    %603 = arith.mulf %594, %577 : vector<2x128xf32>
    %604 = arith.mulf %588, %596 : vector<2x128xf32>
    %605 = arith.addf %603, %604 : vector<2x128xf32>
    %606 = math.tanh %605 : vector<2x128xf32>
    %607 = arith.mulf %602, %606 : vector<2x128xf32>
    %c56_143 = arith.constant 56 : index
    %c0_144 = arith.constant 0 : index
    %608 = vector.load %arg14[%c56_143, %c0_144] : memref<64x512xf32, #tpu.memory_space<vmem>>, vector<2x512xf32>
    %cst_145 = arith.constant dense<0.000000e+00> : vector<2x512xf32>
    %609 = tpu.matmul %607, %409, %cst_145 {dimension_numbers = #tpu.dot_dimension_numbers<[1], [0], [0], [1], [0, 0, 1, 1], [], []>} : vector<2x128xf32>, vector<128x512xf32>, vector<2x512xf32> -> vector<2x512xf32>
    %610 = arith.addf %608, %609 : vector<2x512xf32>
    %611 = vector.extract_strided_slice %610 {offsets = [0, 0], sizes = [2, 128], strides = [1, 1]} : vector<2x512xf32> to vector<2x128xf32>
    %612 = arith.negf %611 : vector<2x128xf32>
    %613 = math.exp %612 : vector<2x128xf32>
    %cst_146 = arith.constant 1.000000e+00 : f32
    %614 = vector.broadcast %cst_146 : f32 to vector<2x128xf32>
    %615 = arith.addf %614, %613 : vector<2x128xf32>
    %616 = arith.divf %614, %615 : vector<2x128xf32>
    %617 = vector.extract_strided_slice %610 {offsets = [0, 128], sizes = [2, 128], strides = [1, 1]} : vector<2x512xf32> to vector<2x128xf32>
    %618 = arith.negf %617 : vector<2x128xf32>
    %619 = math.exp %618 : vector<2x128xf32>
    %cst_147 = arith.constant 1.000000e+00 : f32
    %620 = vector.broadcast %cst_147 : f32 to vector<2x128xf32>
    %621 = arith.addf %620, %619 : vector<2x128xf32>
    %622 = arith.divf %620, %621 : vector<2x128xf32>
    %623 = vector.extract_strided_slice %610 {offsets = [0, 256], sizes = [2, 128], strides = [1, 1]} : vector<2x512xf32> to vector<2x128xf32>
    %624 = math.tanh %623 : vector<2x128xf32>
    %625 = vector.extract_strided_slice %610 {offsets = [0, 384], sizes = [2, 128], strides = [1, 1]} : vector<2x512xf32> to vector<2x128xf32>
    %626 = arith.negf %625 : vector<2x128xf32>
    %627 = math.exp %626 : vector<2x128xf32>
    %cst_148 = arith.constant 1.000000e+00 : f32
    %628 = vector.broadcast %cst_148 : f32 to vector<2x128xf32>
    %629 = arith.addf %628, %627 : vector<2x128xf32>
    %630 = arith.divf %628, %629 : vector<2x128xf32>
    %631 = arith.mulf %622, %605 : vector<2x128xf32>
    %632 = arith.mulf %616, %624 : vector<2x128xf32>
    %633 = arith.addf %631, %632 : vector<2x128xf32>
    %634 = math.tanh %633 : vector<2x128xf32>
    %635 = arith.mulf %630, %634 : vector<2x128xf32>
    %c0_149 = arith.constant 0 : index
    %c0_150 = arith.constant 0 : index
    %636 = vector.load %arg3[%c0_149, %c0_150] : memref<2x128xf32, #tpu.memory_space<vmem>>, vector<2x128xf32>
    %c0_151 = arith.constant 0 : index
    %c0_152 = arith.constant 0 : index
    %637 = vector.load %arg4[%c0_151, %c0_152] : memref<2x128xf32, #tpu.memory_space<vmem>>, vector<2x128xf32>
    %638 = tpu.concatenate %636, %635, %637 in 1 : vector<2x128xf32>, vector<2x128xf32>, vector<2x128xf32> -> vector<2x384xf32>
    %c0_153 = arith.constant 0 : index
    %c0_154 = arith.constant 0 : index
    %639 = vector.load %arg11[%c0_153, %c0_154] : memref<384x384xf32, #tpu.memory_space<vmem>>, vector<384x384xf32>
    %cst_155 = arith.constant dense<0.000000e+00> : vector<2x384xf32>
    %640 = tpu.matmul %638, %639, %cst_155 {dimension_numbers = #tpu.dot_dimension_numbers<[1], [0], [0], [1], [0, 0, 1, 1], [], []>} : vector<2x384xf32>, vector<384x384xf32>, vector<2x384xf32> -> vector<2x384xf32>
    %c0_156 = arith.constant 0 : index
    %c0_157 = arith.constant 0 : index
    %641 = vector.load %arg12[%c0_156, %c0_157] : memref<1x384xf32, #tpu.memory_space<vmem>>, vector<1x384xf32>
    %642 = vector.broadcast %641 : vector<1x384xf32> to vector<2x384xf32>
    %643 = arith.addf %640, %642 : vector<2x384xf32>
    %c0_158 = arith.constant 0 : index
    %c0_159 = arith.constant 0 : index
    %644 = vector.load %arg13[%c0_158, %c0_159] : memref<2x384xf32, #tpu.memory_space<vmem>>, vector<2x384xf32>
    tpu.vector_store %arg13[%c0_158, %c0_159], %643 {strides = array<i32>} : memref<2x384xf32, #tpu.memory_space<vmem>>, vector<2x384xf32>,
    return
  }
}

</mosaic_0001>

<bundles_post_ra>
// kernel: embedding_model_forward.1
= control target key start
LH: loop header
LB: loop body
LE: loop exit
PB: predicated region body
PF: predicated region fallthrough
CT: control target
= control target key end

     0   :  { %18 = vsyncpa [#allocation5], 0  ;;  %s7413_s0 = inlined_call_operand.vmem [shape: f32[2,8], index: 0, kind: input, shape index: {}]   ;;  %s7414_s1 = inlined_call_operand.vmem [shape: f32[2,8], index: 1, kind: input, shape index: {}]   ;;  %s7415_s2 = inlined_call_operand.vmem [shape: f32[2,8], index: 2, kind: input, shape index: {}]   ;;  %s7416_s3 = inlined_call_operand.vmem [shape: f32[2,128], index: 3, kind: input, shape index: {}]   ;;  %s7417_s4 = inlined_call_operand.vmem [shape: f32[2,128], index: 4, kind: input, shape index: {}]   ;;  %s7418_s5 = inlined_call_operand.hbm [shape: f32[3,512], index: 5, kind: input, shape index: {}]   ;;  %s7419_s6 = inlined_call_operand.hbm [shape: f32[128,512], index: 6, kind: input, shape index: {}]   ;;  %s7420_s7 = inlined_call_operand.vmem [shape: f32[1,512], index: 7, kind: input, shape index: {}]   ;;  %s7421_s8 = inlined_call_operand.hbm [shape: f32[128,512], index: 8, kind: input, shape index: {}]   ;;  %s7422_s9 = inlined_call_operand.hbm [shape: f32[128,512], index: 9, kind: input, shape index: {}]   ;;  %s7423_s10 = inlined_call_operand.vmem [shape: f32[1,512], index: 10, kind: input, shape index: {}]   ;;  %s7424_s11 = inlined_call_operand.hbm [shape: f32[384,384], index: 11, kind: input, shape index: {}]   ;;  %s7425_s12 = inlined_call_operand.hbm [shape: f32[1,384], index: 12, kind: input, shape index: {}]   ;;  %s7426_s13 = inlined_call_operand.vmem [shape: f32[2,384], index: 13, kind: output, shape index: {}]  }
   0x1   :  { %19 = vsyncpa [#allocation7], 0 }
   0x2   :  { %20 = vsyncpa [#allocation10], 0 }
   0x3   :  { %21 = vsyncpa [#allocation13], 0  ;;  %s6154_s25 = smov [#allocation6]   ;;  %s6014_s29 = scalar_lea.hbm %s7419_s6, 8192 }
   0x4   :  { %s47_s26 = sshll.u32 %s6154_s25, 4  ;;  %p6015_p0 = scmp.ne.s32.totalorder %s7419_s6, %s6014_s29  ;;  %s48_s26 = int_to_ptr.vmem [resolvable:$true] %s47_s26 }
   0x5   :  { %p6018_p1 = scmp.lt.u32.totalorder %s6014_s29, %s7419_s6 }
   0x7   :  { %p6020_p2 = pnand %p6018_p1, %p6015_p0 }
   0x9   :  { %6023 = shalt.err (!%p6020_p2)
}
   0xa   :  { %s6024_s17 = scalar_lea.vmem %s48_s26, 8192  ;;  %p6029_p4 = scmp.lt.s32.totalorder %s48_s26, %s48_s26 }
   0xb   :  { %p6025_p3 = scmp.ne.s32.totalorder %s48_s26, %s6024_s17  ;;  %p6030_p5 = scmp.lt.s32.totalorder %s6024_s17, %s6024_s17 }
   0xd   :  { %p6031_p6 = por %p6030_p5, %p6029_p4 }
   0xf   :  { %p6032_p7 = pnand %p6031_p6, %p6025_p3 }
  0x11   :  { %6035 = shalt.err (!%p6032_p7)
}
  0x12   :  { %s6155_s18 = smov 512   ;;  %s6156_s19 = smov 32  }
  0x13   :  { %53 = dma.hbm_to_vmem [thread:$0]  %s7419_s6, 8192, %s48_s26, [#allocation7], %s6155_s18, %s6155_s18, %s6156_s19  }
  0x14   :  { %s6157_s22 = smov [#allocation9]   ;;  %s6158_s24 = smov [#allocation4]  }
  0x15   :  { %s73_s23 = sshll.u32 %s6157_s22, 4  ;;  %s38_s25 = sshll.u32 %s6158_s24, 4  ;;  %s74_s23 = int_to_ptr.vmem [resolvable:$true] %s73_s23  ;;  %s39_s25 = int_to_ptr.vmem [resolvable:$true] %s38_s25 }
  0x16   :  { %s6036_s29 = scalar_lea.hbm %s7422_s9, 8192 }
  0x17   :  { %p6037_p8 = scmp.ne.s32.totalorder %s7422_s9, %s6036_s29  ;;  %p6040_p9 = scmp.lt.u32.totalorder %s6036_s29, %s7422_s9 }
  0x19   :  { %p6042_p10 = pnand %p6040_p9, %p6037_p8 }
  0x1b   :  { %6045 = shalt.err (!%p6042_p10)
}
  0x1c   :  { %s6046_s6 = scalar_lea.vmem %s74_s23, 8192  ;;  %p6051_p12 = scmp.lt.s32.totalorder %s74_s23, %s74_s23 }
  0x1d   :  { %p6047_p11 = scmp.ne.s32.totalorder %s74_s23, %s6046_s6  ;;  %p6052_p13 = scmp.lt.s32.totalorder %s6046_s6, %s6046_s6 }
  0x1f   :  { %p6053_p0 = por %p6052_p13, %p6051_p12 }
  0x21   :  { %p6054_p1 = pnand %p6053_p0, %p6047_p11 }
  0x23   :  { %6057 = shalt.err (!%p6054_p1)
}
  0x24   :  { %79 = dma.hbm_to_vmem [thread:$0]  %s7422_s9, 8192, %s74_s23, [#allocation10], %s6155_s18, %s6155_s18, %s6156_s19  }
  0x25   :  { %s6058_s22 = scalar_lea.hbm %s7418_s5, 256 }
  0x26   :  { %p6059_p2 = scmp.ne.s32.totalorder %s7418_s5, %s6058_s22  ;;  %p6062_p3 = scmp.lt.u32.totalorder %s6058_s22, %s7418_s5 }
  0x28   :  { %p6064_p4 = pnand %p6062_p3, %p6059_p2 }
  0x2a   :  { %6067 = shalt.err (!%p6064_p4)
}
  0x2b   :  { %s6068_s30 = scalar_lea.vmem %s39_s25, 256  ;;  %p6073_p6 = scmp.lt.s32.totalorder %s39_s25, %s39_s25 }
  0x2c   :  { %p6069_p5 = scmp.ne.s32.totalorder %s39_s25, %s6068_s30  ;;  %p6074_p7 = scmp.lt.s32.totalorder %s6068_s30, %s6068_s30 }
  0x2e   :  { %p6075_p8 = por %p6074_p7, %p6073_p6 }
  0x30   :  { %p6076_p9 = pnand %p6075_p8, %p6069_p5 }
  0x32   :  { %6079 = shalt.err (!%p6076_p9)
}
  0x33   :  { %41 = dma.hbm_to_vmem [thread:$0]  %s7418_s5, 256, %s39_s25, [#allocation5]  }
  0x34   :  { %s6159_s14 = smov [#allocation8]   ;;  %s6160_s16 = smov [#allocation11]  }
  0x35   :  { %s61_s15 = sshll.u32 %s6159_s14, 4  ;;  %s87_s6 = sshll.u32 %s6160_s16, 4  ;;  %s62_s15 = int_to_ptr.vmem [resolvable:$true] %s61_s15  ;;  %s88_s6 = int_to_ptr.vmem [resolvable:$true] %s87_s6 }
  0x36   :  { %s6080_s20 = scalar_lea.hbm %s7421_s8, 8192 }
  0x37   :  { %p6081_p10 = scmp.ne.s32.totalorder %s7421_s8, %s6080_s20  ;;  %p6084_p11 = scmp.lt.u32.totalorder %s6080_s20, %s7421_s8 }
  0x39   :  { %p6086_p12 = pnand %p6084_p11, %p6081_p10 }
  0x3b   :  { %6089 = shalt.err (!%p6086_p12)
}
  0x3c   :  { %s6090_s5 = scalar_lea.vmem %s62_s15, 8192  ;;  %p6095_p0 = scmp.lt.s32.totalorder %s62_s15, %s62_s15 }
  0x3d   :  { %p6091_p13 = scmp.ne.s32.totalorder %s62_s15, %s6090_s5  ;;  %p6096_p1 = scmp.lt.s32.totalorder %s6090_s5, %s6090_s5 }
  0x3f   :  { %p6097_p2 = por %p6096_p1, %p6095_p0 }
  0x41   :  { %p6098_p3 = pnand %p6097_p2, %p6091_p13 }
  0x43   :  { %6101 = shalt.err (!%p6098_p3)
}
  0x44   :  { %67 = dma.hbm_to_vmem [thread:$0]  %s7421_s8, 8192, %s62_s15, [#allocation7], %s6155_s18, %s6155_s18, %s6156_s19  }
  0x45   :  { %s6102_s9 = scalar_lea.hbm %s7424_s11, 18432 }
  0x46   :  { %p6103_p4 = scmp.ne.s32.totalorder %s7424_s11, %s6102_s9  ;;  %p6106_p5 = scmp.lt.u32.totalorder %s6102_s9, %s7424_s11 }
  0x48   :  { %p6108_p6 = pnand %p6106_p5, %p6103_p4 }
  0x4a   :  { %6111 = shalt.err (!%p6108_p6)
}
  0x4b   :  { %s6112_s17 = scalar_lea.vmem %s88_s6, 18432  ;;  %p6117_p8 = scmp.lt.s32.totalorder %s88_s6, %s88_s6 }
  0x4c   :  { %p6113_p7 = scmp.ne.s32.totalorder %s88_s6, %s6112_s17  ;;  %p6118_p9 = scmp.lt.s32.totalorder %s6112_s17, %s6112_s17 }
  0x4e   :  { %p6119_p10 = por %p6118_p9, %p6117_p8 }
  0x50   :  { %p6120_p11 = pnand %p6119_p10, %p6113_p7 }
  0x52   :  { %6123 = shalt.err (!%p6120_p11)
}
  0x53   :  { %s6161_s8 = smov 384   ;;  %s6162_s18 = smov 24  }
  0x54   :  { %93 = dma.hbm_to_vmem [thread:$0]  %s7424_s11, 18432, %s88_s6, [#allocation10], %s6161_s8, %s6161_s8, %s6162_s18  }
  0x55   :  { %s6163_s20 = smov [#allocation12]   ;;  %s6124_s27 = scalar_lea.hbm %s7425_s12, 48 }
  0x56   :  { %s100_s21 = sshll.u32 %s6163_s20, 4  ;;  %p6125_p12 = scmp.ne.s32.totalorder %s7425_s12, %s6124_s27  ;;  %s101_s21 = int_to_ptr.vmem [resolvable:$true] %s100_s21 }
  0x57   :  { %p6128_p13 = scmp.lt.u32.totalorder %s6124_s27, %s7425_s12 }
  0x59   :  { %p6130_p0 = pnand %p6128_p13, %p6125_p12 }
  0x5b   :  { %6133 = shalt.err (!%p6130_p0)
}
  0x5c   :  { %s6134_s30 = scalar_lea.vmem %s101_s21, 48  ;;  %s6138_s11 = scalar_lea.vmem %s101_s21, 64 }
  0x5d   :  { %p6135_p1 = scmp.ne.s32.totalorder %s101_s21, %s6134_s30  ;;  %p6139_p2 = scmp.lt.s32.totalorder %s101_s21, %s101_s21 }
  0x5e   :  { %p6140_p3 = scmp.lt.s32.totalorder %s6138_s11, %s6134_s30 }
  0x60   :  { %p6141_p4 = por %p6140_p3, %p6139_p2 }
  0x62   :  { %p6142_p5 = pnand %p6141_p4, %p6135_p1 }
  0x64   :  { %6145 = shalt.err (!%p6142_p5)
}
  0x65   :  { %103 = dma.hbm_to_vmem [thread:$0]  %s7425_s12, 48, %s101_s21, [#allocation13]  }
  0x66   :  { %6146 = dma.done.wait [#allocation5], 256  }
  0x67   :  { %6147 = vsyncadd [#allocation5], 4294967040 }
  0x68   :  { %6148 = dma.done.wait [#allocation7], 16384  }
  0x69   :  { %6149 = vsyncadd [#allocation7], 4294950912 }
  0x6a   :  { %6150 = dma.done.wait [#allocation10], 26624  }
  0x6b   :  { %6151 = vsyncadd [#allocation10], 4294940672 }
  0x6c   :  { %6152 = dma.done.wait [#allocation13], 48  }
  0x6d   :  { %6153 = vsyncadd [#allocation13], 4294967248  ;;  %v7427_v0 = vmov 0.0   ;;  %v6165_v1 = vmov 0   ;;  %v591_v2 = vld [vmem:[#allocation6 + $0x8] sm:$0xff]  ;;  %v593_v4 = vld [vmem:[#allocation6 + $0x18] sm:$0xff] }
  0x6e   :  { %722 = vmatprep.mubr.f32.mxu0 %v7427_v0  ;;  %125 = vst [vmem:[#allocation3] sm:$0xff] %v7427_v0  ;;  %126 = vst [vmem:[#allocation3 + $0x8] sm:$0xff] %v7427_v0  ;;  %793 = vmatprep.mubr.f32.mxu1 %v7427_v0  ;;  %v595_v3 = vld [vmem:[#allocation6 + $0x28] sm:$0xff]  ;;  %v597_v6 = vld [vmem:[#allocation6 + $0x38] sm:$0xff]  ;;  %vm6174_vm0 = vmmov 0  }
  0x6f   :  { %127 = vst [vmem:[#allocation3 + $0x10] sm:$0xff] %v7427_v0  ;;  %128 = vst [vmem:[#allocation3 + $0x18] sm:$0xff] %v7427_v0  ;;  %5737 = vset.pattern.permute.xlu0 %v6165_v1  ;;  %5738 = vset.pattern.permute.xlu1 %v6165_v1  ;;  %v6337_v5 = vpack.c.bf16 %v595_v3, %v591_v2  ;;  %v590_v7 = vld [vmem:[#allocation6] sm:$0xff]  ;;  %v6339_v9 = vpack.c.bf16 %v597_v6, %v593_v4  ;;  %v592_v11 = vld [vmem:[#allocation6 + $0x10] sm:$0xff] }
  0x70   :  { %129 = vst [vmem:[#allocation3 + $0x20] sm:$0xff] %v7427_v0  ;;  %130 = vst [vmem:[#allocation3 + $0x28] sm:$0xff] %v7427_v0  ;;  %v594_v8 = vld [vmem:[#allocation6 + $0x20] sm:$0xff]  ;;  %v596_v12 = vld [vmem:[#allocation6 + $0x30] sm:$0xff] }
  0x71   :  { %131 = vst [vmem:[#allocation3 + $0x30] sm:$0xff] %v7427_v0  ;;  %132 = vst [vmem:[#allocation3 + $0x38] sm:$0xff] %v7427_v0  ;;  %v6341_v10 = vpack.c.bf16 %v594_v8, %v590_v7  ;;  %v599_v13 = vld [vmem:[#allocation6 + $0x48] sm:$0xff]  ;;  %4472 = vmatprep.subr.bf16.mxu0 %v6337_v5  ;;  %v6344_v14 = vpack.c.bf16 %v596_v12, %v592_v11  ;;  %v601_v16 = vld [vmem:[#allocation6 + $0x58] sm:$0xff]  ;;  %4504 = vmatprep.subr.bf16.mxu1 %v6339_v9 }
  0x72   :  { %7470 = vst [vmem:[#allocation18_spill] sm:$0xff] %v6337_v5  ;;  %7471 = vst [vmem:[#allocation19_spill] sm:$0xff] %v6339_v9  ;;  %v603_v15 = vld [vmem:[#allocation6 + $0x68] sm:$0xff]  ;;  %v605_v17 = vld [vmem:[#allocation6 + $0x78] sm:$0xff] }
  0x73   :  { %4474 = vmatpush1.bf16.msra.mxu0 %v6341_v10  ;;  %v6348_v18 = vpack.c.bf16 %v603_v15, %v599_v13  ;;  %v6350_v19 = vpack.c.bf16 %v605_v17, %v601_v16  ;;  %v598_v20 = vld [vmem:[#allocation6 + $0x40] sm:$0xff]  ;;  %v600_v22 = vld [vmem:[#allocation6 + $0x50] sm:$0xff]  ;;  %4506 = vmatpush1.bf16.msra.mxu1 %v6344_v14  ;;  %v607_v25 = vld [vmem:[#allocation6 + $0x88] sm:$0xff] }
  0x74   :  { %v602_v21 = vld [vmem:[#allocation6 + $0x60] sm:$0xff]  ;;  %v604_v24 = vld [vmem:[#allocation6 + $0x70] sm:$0xff]  ;;  %v611_v26 = vld [vmem:[#allocation6 + $0xa8] sm:$0xff] }
  0x75   :  { %v6353_v23 = vpack.c.bf16 %v602_v21, %v598_v20  ;;  %4476 = vmatprep.subr.bf16.mxu0 %v6348_v18  ;;  %4508 = vmatprep.subr.bf16.mxu1 %v6350_v19  ;;  %v6357_v27 = vpack.c.bf16 %v604_v24, %v600_v22  ;;  %v6359_v28 = vpack.c.bf16 %v611_v26, %v607_v25  ;;  %v609_v29 = vld [vmem:[#allocation6 + $0x98] sm:$0xff]  ;;  %v606_v31 = vld [vmem:[#allocation6 + $0x80] sm:$0xff]  ;;  %v608_v34 = vld [vmem:[#allocation6 + $0x90] sm:$0xff] }
  0x76   :  { %v613_v30 = vld [vmem:[#allocation6 + $0xb8] sm:$0xff]  ;;  %v610_v33 = vld [vmem:[#allocation6 + $0xa0] sm:$0xff]  ;;  %v612_v35 = vld [vmem:[#allocation6 + $0xb0] sm:$0xff] }
  0x77   :  { %7472 = vst [vmem:[#allocation20_spill] sm:$0xff] %v6357_v27  ;;  %v6361_v32 = vpack.c.bf16 %v613_v30, %v609_v29  ;;  %4478 = vmatpush1.bf16.msra.mxu0 %v6353_v23  ;;  %v6364_v36 = vpack.c.bf16 %v610_v33, %v606_v31  ;;  %v615_v37 = vld [vmem:[#allocation6 + $0xc8] sm:$0xff]  ;;  %v617_v39 = vld [vmem:[#allocation6 + $0xd8] sm:$0xff]  ;;  %4510 = vmatpush1.bf16.msra.mxu1 %v6357_v27  ;;  %v614_v43 = vld [vmem:[#allocation6 + $0xc0] sm:$0xff] }
  0x78   :  { %v619_v38 = vld [vmem:[#allocation6 + $0xe8] sm:$0xff]  ;;  %4480 = vmatprep.subr.bf16.mxu0 %v6359_v28  ;;  %v6368_v40 = vpack.c.bf16 %v612_v35, %v608_v34  ;;  %v621_v42 = vld [vmem:[#allocation6 + $0xf8] sm:$0xff]  ;;  %v618_v44 = vld [vmem:[#allocation6 + $0xe0] sm:$0xff] }
  0x79   :  { %v6370_v41 = vpack.c.bf16 %v619_v38, %v615_v37  ;;  %4512 = vmatprep.subr.bf16.mxu1 %v6361_v32  ;;  %v6373_v45 = vpack.c.bf16 %v621_v42, %v617_v39  ;;  %v616_v46 = vld [vmem:[#allocation6 + $0xd0] sm:$0xff]  ;;  %v623_v48 = vld [vmem:[#allocation6 + $0x108] sm:$0xff]  ;;  %v625_v50 = vld [vmem:[#allocation6 + $0x118] sm:$0xff]  ;;  %v6376_v52 = vpack.c.bf16 %v618_v44, %v614_v43 }
  0x7a   :  { %v620_v47 = vld [vmem:[#allocation6 + $0xf0] sm:$0xff]  ;;  %v627_v49 = vld [vmem:[#allocation6 + $0x128] sm:$0xff]  ;;  %v629_v51 = vld [vmem:[#allocation6 + $0x138] sm:$0xff] }
  0x7b   :  { %4482 = vmatpush1.bf16.msra.mxu0 %v6364_v36  ;;  %4514 = vmatpush1.bf16.msra.mxu1 %v6368_v40  ;;  %v6380_v53 = vpack.c.bf16 %v620_v47, %v616_v46  ;;  %v6382_v54 = vpack.c.bf16 %v627_v49, %v623_v48  ;;  %v622_v55 = vld [vmem:[#allocation6 + $0x100] sm:$0xff]  ;;  %v624_v57 = vld [vmem:[#allocation6 + $0x110] sm:$0xff]  ;;  %v6385_v58 = vpack.c.bf16 %v629_v51, %v625_v50  ;;  %v631_v60 = vld [vmem:[#allocation6 + $0x148] sm:$0xff] }
  0x7c   :  { %4484 = vmatprep.subr.bf16.mxu0 %v6370_v41  ;;  %v626_v56 = vld [vmem:[#allocation6 + $0x120] sm:$0xff]  ;;  %4516 = vmatprep.subr.bf16.mxu1 %v6373_v45  ;;  %v628_v59 = vld [vmem:[#allocation6 + $0x130] sm:$0xff]  ;;  %v635_v61 = vld [vmem:[#allocation6 + $0x168] sm:$0xff] }
  0x7d   :  { %v633_v62 = vld [vmem:[#allocation6 + $0x158] sm:$0xff]  ;;  %v6388_v1 = vpack.c.bf16 %v626_v56, %v622_v55  ;;  %v6392_v2 = vpack.c.bf16 %v628_v59, %v624_v57  ;;  %v6394_v3 = vpack.c.bf16 %v635_v61, %v631_v60  ;;  %v630_v4 = vld [vmem:[#allocation6 + $0x140] sm:$0xff]  ;;  %v632_v7 = vld [vmem:[#allocation6 + $0x150] sm:$0xff]  ;;  %v143_v55 = vlaneseq }
  0x7e   :  { %v637_v63 = vld [vmem:[#allocation6 + $0x178] sm:$0xff]  ;;  %v634_v6 = vld [vmem:[#allocation6 + $0x160] sm:$0xff]  ;;  %v636_v11 = vld [vmem:[#allocation6 + $0x170] sm:$0xff] }
  0x7f   :  { %4486 = vmatpush1.bf16.msra.mxu0 %v6376_v52  ;;  %4518 = vmatpush1.bf16.msra.mxu1 %v6380_v53  ;;  %v6397_v8 = vpack.c.bf16 %v637_v63, %v633_v62  ;;  %v639_v12 = vld [vmem:[#allocation6 + $0x188] sm:$0xff]  ;;  %v641_v15 = vld [vmem:[#allocation6 + $0x198] sm:$0xff]  ;;  %v6400_v17 = vpack.c.bf16 %v634_v6, %v630_v4  ;;  %v638_v20 = vld [vmem:[#allocation6 + $0x180] sm:$0xff]  ;;  %v6404_v22 = vpack.c.bf16 %v636_v11, %v632_v7  ;;  %v6489_v56 = vshrl.u32 %v143_v55, 7 }
  0x80   :  { %4488 = vmatprep.subr.bf16.mxu0 %v6382_v54  ;;  %4520 = vmatprep.subr.bf16.mxu1 %v6385_v58  ;;  %v643_v13 = vld [vmem:[#allocation6 + $0x1a8] sm:$0xff]  ;;  %v645_v16 = vld [vmem:[#allocation6 + $0x1b8] sm:$0xff]  ;;  %v642_v21 = vld [vmem:[#allocation6 + $0x1a0] sm:$0xff] }
  0x81   :  { %v6406_v24 = vpack.c.bf16 %v643_v13, %v639_v12  ;;  %v640_v25 = vld [vmem:[#allocation6 + $0x190] sm:$0xff]  ;;  %v6414_v30 = vpack.c.bf16 %v645_v16, %v641_v15  ;;  %v647_v31 = vld [vmem:[#allocation6 + $0x1c8] sm:$0xff]  ;;  %v649_v35 = vld [vmem:[#allocation6 + $0x1d8] sm:$0xff]  ;;  %v6429_v39 = vpack.c.bf16 %v642_v21, %v638_v20  ;;  %7483 = vst [vmem:[#allocation31_spill] sm:$0xff] %v6489_v56  ;;  %v6492_v57 = vsub.s32 0, %v6489_v56 }
  0x82   :  { %v644_v26 = vld [vmem:[#allocation6 + $0x1b0] sm:$0xff]  ;;  %v651_v33 = vld [vmem:[#allocation6 + $0x1e8] sm:$0xff]  ;;  %v653_v37 = vld [vmem:[#allocation6 + $0x1f8] sm:$0xff]  ;;  %v149_v59 = vsub.s32 4, %v6489_v56  ;;  %v6496_v62 = vsub.s32 1, %v6489_v56  ;;  %v219_v63 = vsub.s32 5, %v6489_v56 }
  0x83   :  { %4490 = vmatpush1.bf16.msra.mxu0 %v6388_v1  ;;  %4522 = vmatpush1.bf16.msra.mxu1 %v6392_v2  ;;  %v6411_v29 = vld [vmem:[%s7413_s0] sm:$0x3]  ;;  %7474 = vst [vmem:[#allocation22_spill] sm:$0xff] %v6414_v30  ;;  %7477 = vst [vmem:[#allocation25_spill] sm:$0xff] %v6429_v39  ;;  %v6433_v42 = vpack.c.bf16 %v644_v26, %v640_v25  ;;  %v6435_v43 = vpack.c.bf16 %v651_v33, %v647_v31  ;;  %v646_v44 = vld [vmem:[#allocation6 + $0x1c0] sm:$0xff]  ;;  %v6500_v4 = vsub.s32 2, %v6489_v56 }
  0x84   :  { %4492 = vmatprep.subr.bf16.mxu0 %v6394_v3  ;;  %7473 = vst [vmem:[#allocation21_spill] sm:$0xff] %v6411_v29  ;;  %4524 = vmatprep.subr.bf16.mxu1 %v6397_v8  ;;  %v6420_v34 = vld [vmem:[%s7415_s2] sm:$0x3]  ;;  %v650_v46 = vld [vmem:[#allocation6 + $0x1e0] sm:$0xff]  ;;  %v6438_v47 = vpack.c.bf16 %v653_v37, %v649_v35  ;;  %7484 = vst [vmem:[#allocation32_spill] sm:$0xff] %v6492_v57  ;;  %v268_v6 = vsub.s32 6, %v6489_v56 }
  0x85   :  { %138 = vperm.xlu0 %5737, %v6411_v29   ;;  %7475 = vst [vmem:[#allocation23_spill] sm:$0xff] %v6420_v34  ;;  %v6425_v38 = vld [vmem:[%s7414_s1] sm:$0x3]  ;;  %259 = vperm.xlu1 %5738, %v6420_v34   ;;  %7478 = vst [vmem:[#allocation26_spill] sm:$0xff] %v6433_v42  ;;  %v6442_v50 = vpack.c.bf16 %v650_v46, %v646_v44  ;;  %v134_v61 = vld [vmem:[#allocation4 + $0x8] sm:$0x77] }
  0x86   :  { %7476 = vst [vmem:[#allocation24_spill] sm:$0xff] %v6425_v38  ;;  %7479 = vst [vmem:[#allocation27_spill] sm:$0xff] %v6435_v43  ;;  %v648_v48 = vld [vmem:[#allocation6 + $0x1d0] sm:$0xff]  ;;  %v154_v12 = vrot.slane %v134_v61, %v6492_v57  ;;  %v158_v13 = vrot.slane %v134_v61, %v149_v59  ;;  %v7429_v15 = vsub.s32 3, %v6489_v56  ;;  %v224_v25 = vrot.slane %v134_v61, %v6496_v62 }
  0x87   :  { %4494 = vmatpush1.bf16.msra.mxu0 %v6400_v17  ;;  %4526 = vmatpush1.bf16.msra.mxu1 %v6404_v22  ;;  %7480 = vst [vmem:[#allocation28_spill] sm:$0xff] %v6438_v47  ;;  %v652_v49 = vld [vmem:[#allocation6 + $0x1f0] sm:$0xff]  ;;  %7481 = vst [vmem:[#allocation29_spill] sm:$0xff] %v6442_v50  ;;  %v228_v26 = vrot.slane %v134_v61, %v219_v63  ;;  %v273_v35 = vrot.slane %v134_v61, %v6500_v4 }
  0x88   :  { %4496 = vmatprep.subr.bf16.mxu0 %v6406_v24  ;;  %4528 = vmatprep.subr.bf16.mxu1 %v6414_v30  ;;  %v6446_v51 = vpack.c.bf16 %v652_v49, %v648_v48  ;;  %v133_v60 = vld [vmem:[#allocation4] sm:$0x77]  ;;  %7485 = vst [vmem:[#allocation33_spill] sm:$0xff] %v6496_v62  ;;  %7486 = vst [vmem:[#allocation34_spill] sm:$0xff] %v6500_v4  ;;  %v277_v37 = vrot.slane %v134_v61, %v268_v6 }
  0x89   :  { %210 = vperm.xlu0 %5737, %v6425_v38   ;;  %v146_v7 = vrot.slane %v133_v60, %v6492_v57  ;;  %v150_v11 = vrot.slane %v133_v60, %v149_v59  ;;  %v135_v16 = vld [vmem:[%s7420_s7] sm:$0xf]  ;;  %v216_v20 = vrot.slane %v133_v60, %v6496_v62  ;;  %v220_v21 = vrot.slane %v133_v60, %v219_v63 }
  0x8a   :  { %7482 = vst [vmem:[#allocation30_spill] sm:$0xff] %v6446_v51  ;;  %v265_v31 = vrot.slane %v133_v60, %v6500_v4  ;;  %v269_v33 = vrot.slane %v133_v60, %v268_v6  ;;  %v6520_v48 = vrot.slane %v154_v12, %v6492_v57  ;;  %v6523_v49 = vrot.slane %v158_v13, %v6492_v57 }
  0x8b   :  { %4498 = vmatpush1.bf16.msra.mxu0 %v6429_v39  ;;  %4530 = vmatpush1.bf16.msra.mxu1 %v6433_v42  ;;  %v6514_v44 = vrot.slane %v146_v7, %v6492_v57  ;;  %v6517_v46 = vrot.slane %v150_v11, %v6492_v57  ;;  %v6526_v55 = vrot.slane %v135_v16, %v6492_v57 }
  0x8c   :  { %4500 = vmatprep.subr.bf16.mxu0 %v6435_v43  ;;  %4532 = vmatprep.subr.bf16.mxu1 %v6438_v47  ;;  %v6529_v59 = vrot.slane %v135_v16, %v6496_v62  ;;  %v6532_v60 = vrot.slane %v135_v16, %v6500_v4  ;;  %v6536_v61 = vrot.slane %v135_v16, %v7429_v15 }
  0x8d   :  { %v6539_v63 = vrot.slane %v216_v20, %v6496_v62  ;;  %v6542_v6 = vrot.slane %v220_v21, %v6496_v62  ;;  %v6545_v7 = vrot.slane %v224_v25, %v6496_v62  ;;  %v6548_v11 = vrot.slane %v228_v26, %v6496_v62 }
  0x8e   :  { %v6551_v13 = vrot.slane %v265_v31, %v6500_v4  ;;  %v6557_v16 = vrot.slane %v273_v35, %v6500_v4  ;;  %v6560_v20 = vrot.slane %v277_v37, %v6500_v4 }
  0x8f   :  { %4502 = vmatpush1.bf16.msra.mxu0 %v6442_v50  ;;  %4534 = vmatpush1.bf16.msra.mxu1 %v6446_v51 }
  0x90   :  { %4536 = vmatprep.subr.bf16.mxu0 %v6337_v5  ;;  %4568 = vmatprep.subr.bf16.mxu1 %v6339_v9 }
  0x92   :  { %723 = vmatmul.mubr.f32.vlgmr.msra.gmra.mrb[0].mxu0 %v7427_v0  ;;  %794 = vmatmul.mubr.f32.vlgmr.msra.gmra.mrb[0].mxu1 %v7427_v0 }
  0x93   :  { %4538 = vmatpush1.bf16.msra.mxu0 %v6341_v10  ;;  %4570 = vmatpush1.bf16.msra.mxu1 %v6344_v14 }
  0x94   :  { %4540 = vmatprep.subr.bf16.mxu0 %v6348_v18  ;;  %4572 = vmatprep.subr.bf16.mxu1 %v6350_v19 }
  0x95   :  { %897 = vmatprep.mubr.f32.mxu0 %v7427_v0  ;;  %968 = vmatprep.mubr.f32.mxu1 %v7427_v0  ;;  %v6554_v0 = vrot.slane %v269_v33, %v6500_v4 }
  0x97   :  { %4542 = vmatpush1.bf16.msra.mxu0 %v6353_v23  ;;  %4574 = vmatpush1.bf16.msra.mxu1 %v6357_v27 }
  0x98   :  { %4544 = vmatprep.subr.bf16.mxu0 %v6359_v28  ;;  %4576 = vmatprep.subr.bf16.mxu1 %v6361_v32 }
  0x9b   :  { %4546 = vmatpush1.bf16.msra.mxu0 %v6364_v36  ;;  %4578 = vmatpush1.bf16.msra.mxu1 %v6368_v40 }
  0x9c   :  { %4548 = vmatprep.subr.bf16.mxu0 %v6370_v41  ;;  %4580 = vmatprep.subr.bf16.mxu1 %v6373_v45 }
  0x9f   :  { %4550 = vmatpush1.bf16.msra.mxu0 %v6376_v52  ;;  %4582 = vmatpush1.bf16.msra.mxu1 %v6380_v53 }
  0xa0   :  { %4552 = vmatprep.subr.bf16.mxu0 %v6382_v54  ;;  %4584 = vmatprep.subr.bf16.mxu1 %v6385_v58 }
  0xa3   :  { %4554 = vmatpush1.bf16.msra.mxu0 %v6388_v1  ;;  %4586 = vmatpush1.bf16.msra.mxu1 %v6392_v2 }
  0xa4   :  { %4556 = vmatprep.subr.bf16.mxu0 %v6394_v3  ;;  %4588 = vmatprep.subr.bf16.mxu1 %v6397_v8 }
  0xa7   :  { %4558 = vmatpush1.bf16.msra.mxu0 %v6400_v17  ;;  %4590 = vmatpush1.bf16.msra.mxu1 %v6404_v22 }
  0xa8   :  { %4560 = vmatprep.subr.bf16.mxu0 %v6406_v24  ;;  %4592 = vmatprep.subr.bf16.mxu1 %v6414_v30 }
  0xab   :  { %4562 = vmatpush1.bf16.msra.mxu0 %v6429_v39  ;;  %4594 = vmatpush1.bf16.msra.mxu1 %v6433_v42 }
  0xac   :  { %4564 = vmatprep.subr.bf16.mxu0 %v6435_v43  ;;  %4596 = vmatprep.subr.bf16.mxu1 %v6438_v47 }
  0xaf   :  { %4566 = vmatpush1.bf16.msra.mxu0 %v6442_v50  ;;  %4598 = vmatpush1.bf16.msra.mxu1 %v6446_v51 }
  0xb0   :  { %4600 = vmatprep.subr.bf16.mxu0 %v6337_v5  ;;  %4632 = vmatprep.subr.bf16.mxu1 %v6339_v9 }
 0x104   :  { %v139_v12 = vpop.permute.xlu0 %138  ;;  %v260_v56 = vpop.permute.xlu1 %259 }
 0x105   :  { %v179_v21 = vmul.f32 %v6514_v44, %v139_v12  ;;  %v180_v25 = vmul.f32 %v6517_v46, %v139_v12  ;;  %v181_v26 = vmul.f32 %v6520_v48, %v139_v12  ;;  %v182_v15 = vmul.f32 %v6523_v49, %v139_v12 }
 0x106   :  { %v298_v37 = vmul.f32 %v6551_v13, %v260_v56  ;;  %v299_v4 = vmul.f32 %v6554_v0, %v260_v56  ;;  %v300_v9 = vmul.f32 %v6557_v16, %v260_v56  ;;  %v301_v5 = vmul.f32 %v6560_v20, %v260_v56 }
 0x107   :  { %v204_v31 = vadd.f32 %v6526_v55, %v179_v21  ;;  %v205_v33 = vadd.f32 %v6529_v59, %v180_v25  ;;  %v206_v62 = vadd.f32 %v6532_v60, %v181_v26  ;;  %v207_v35 = vadd.f32 %v6536_v61, %v182_v15 }
 0x108   :  { %v211_v57 = vpop.permute.xlu0 %210  ;;  %v6166_v56 = vmov 1  }
 0x109   :  { %v249_v12 = vmul.f32 %v6539_v63, %v211_v57  ;;  %v250_v51 = vmul.f32 %v6542_v6, %v211_v57  ;;  %v251_v21 = vmul.f32 %v6545_v7, %v211_v57  ;;  %v252_v25 = vmul.f32 %v6548_v11, %v211_v57  ;;  %5739 = vset.pattern.permute.xlu1 %v6166_v56 }
 0x10a   :  { %5740 = vset.pattern.permute.xlu0 %v6166_v56  ;;  %311 = vperm.xlu1 %5739, %v6411_v29  }
 0x10b   :  { %v253_v26 = vadd.f32 %v249_v12, %v204_v31  ;;  %v254_v50 = vadd.f32 %v250_v51, %v205_v33  ;;  %v255_v15 = vadd.f32 %v251_v21, %v206_v62  ;;  %v256_v47 = vadd.f32 %v252_v25, %v207_v35  ;;  %323 = vperm.xlu0 %5740, %v6425_v38  }
 0x10d   :  { %v302_v43 = vadd.f32 %v298_v37, %v253_v26  ;;  %v303_v42 = vadd.f32 %v299_v4, %v254_v50  ;;  %v304_v39 = vadd.f32 %v300_v9, %v255_v15  ;;  %v305_v30 = vadd.f32 %v301_v5, %v256_v47 }
 0x10e   :  { %335 = vperm.xlu1 %5739, %v6420_v34  }
 0x10f   :  { %306 = vst [vmem:[#allocation2] sm:$0x3] %v302_v43  ;;  %307 = vst [vmem:[#allocation2 + $0x8] sm:$0x3] %v303_v42 }
 0x110   :  { %308 = vst [vmem:[#allocation2 + $0x10] sm:$0x3] %v304_v39  ;;  %309 = vst [vmem:[#allocation2 + $0x18] sm:$0x3] %v305_v30 }
 0x116   :  { %v654_v51 = vld [vmem:[#allocation2] sm:$0x3]  ;;  %v655_v50 = vld [vmem:[#allocation2 + $0x8] sm:$0x3] }
 0x117   :  { %v657_v30 = vld [vmem:[#allocation2 + $0x18] sm:$0x3]  ;;  %v656_v4 = vld [vmem:[#allocation2 + $0x10] sm:$0x3] }
 0x165   :  { %v724_v57 = vpop.f32.mrb[0].mxu0  ;;  %v795_v31 = vpop.f32.mrb[0].mxu1 }
 0x166   :  { %v800_v62 = vadd.f32 %v724_v57, %v654_v51  ;;  %v726_v9 = vpop.f32.mrb[1].mxu0  ;;  %v797_v43 = vpop.f32.mrb[1].mxu1  ;;  %v802_v35 = vadd.f32 %v795_v31, %v656_v4 }
 0x167   :  { %v801_v5 = vadd.f32 %v726_v9, %v655_v50  ;;  %v803_v47 = vadd.f32 %v797_v43, %v657_v30 }
 0x168   :  { %v4336_v42 = vmul.f32 -1.442695, %v800_v62 }
 0x169   :  { %v4337_v39 = vmul.f32 -1.442695, %v801_v5  ;;  %v4338_v33 = vmul.f32 -1.442695, %v803_v47 }
 0x16a   :  { %5753 = vpow2.f32 %v4336_v42 }
 0x16b   :  { %5755 = vpow2.f32 %v4337_v39 }
 0x16c   :  { %5757 = vpow2.f32 %v4338_v33 }
 0x16d   :  { %5759 = vtanh.f32 %v802_v35 }
 0x174   :  { %v5754_v37 = vpop.eup %5753 }
 0x175   :  { %v5756_v12 = vpop.eup %5755  ;;  %v807_v21 = vadd.f32 1.0, %v5754_v37 }
 0x176   :  { %v813_v25 = vadd.f32 1.0, %v5756_v12  ;;  %v5758_v26 = vpop.eup %5757 }
 0x177   :  { %5761 = vrcp.f32 %v807_v21  ;;  %v5760_v15 = vpop.eup %5759  ;;  %v820_v62 = vadd.f32 1.0, %v5758_v26 }
 0x178   :  { %5763 = vrcp.f32 %v813_v25 }
 0x179   :  { %5765 = vrcp.f32 %v820_v62 }
 0x181   :  { %v5762_v56 = vpop.eup %5761 }
 0x182   :  { %v5764_v51 = vpop.eup %5763  ;;  %v824_v57 = vmul.f32 %v5762_v56, %v5760_v15 }
 0x183   :  { %v823_v50 = vmul.f32 0.0, %v5764_v51  ;;  %v5766_v31 = vpop.eup %5765  ;;  %v7487_v51 = vmov 0.0  }
 0x185   :  { %v6581_v9 = vadd.f32 %v824_v57, %v823_v50 }
 0x187   :  { %5767 = vtanh.f32 %v6581_v9 }
 0x189   :  { %v312_v42 = vpop.permute.xlu1 %311 }
 0x18a   :  { %v324_v39 = vpop.permute.xlu0 %323  ;;  %v314_v30 = vmul.f32 %v312_v42, %v6514_v44  ;;  %v315_v47 = vmul.f32 %v312_v42, %v6517_v46  ;;  %v316_v4 = vmul.f32 %v312_v42, %v6520_v48  ;;  %v317_v33 = vmul.f32 %v312_v42, %v6523_v49 }
 0x18b   :  { %v326_v35 = vmul.f32 %v324_v39, %v6539_v63  ;;  %v327_v37 = vmul.f32 %v324_v39, %v6542_v6  ;;  %v328_v12 = vmul.f32 %v324_v39, %v6545_v7  ;;  %v329_v21 = vmul.f32 %v324_v39, %v6548_v11 }
 0x18c   :  { %v318_v25 = vadd.f32 %v314_v30, %v6526_v55  ;;  %v319_v26 = vadd.f32 %v315_v47, %v6529_v59  ;;  %v320_v15 = vadd.f32 %v316_v4, %v6532_v60  ;;  %v321_v56 = vadd.f32 %v317_v33, %v6536_v61 }
 0x18d   :  { %v336_v57 = vpop.permute.xlu1 %335 }
 0x18e   :  { %v330_v62 = vadd.f32 %v326_v35, %v318_v25  ;;  %v331_v50 = vadd.f32 %v327_v37, %v319_v26  ;;  %v339_v42 = vmul.f32 %v336_v57, %v6554_v0  ;;  %v340_v39 = vmul.f32 %v336_v57, %v6557_v16  ;;  %v7488_v37 = vld [vmem:[#allocation22_spill] sm:$0xff]  ;;  %v7491_v25 = vld [vmem:[#allocation27_spill] sm:$0xff]  ;;  %v7492_v26 = vld [vmem:[#allocation28_spill] sm:$0xff] }
 0x18f   :  { %v341_v30 = vmul.f32 %v336_v57, %v6560_v20 }
 0x190   :  { %v343_v4 = vadd.f32 %v339_v42, %v331_v50  ;;  %v6167_v50 = vmov 2  }
 0x191   :  { %v5768_v5 = vpop.eup %5767  ;;  %5741 = vset.pattern.permute.xlu1 %v6167_v50  ;;  %5742 = vset.pattern.permute.xlu0 %v6167_v50 }
 0x192   :  { %v827_v43 = vmul.f32 %v5768_v5, %v5766_v31  ;;  %v332_v31 = vadd.f32 %v328_v12, %v320_v15  ;;  %v333_v5 = vadd.f32 %v329_v21, %v321_v56  ;;  %347 = vst [vmem:[#allocation2 + $0x28] sm:$0x3] %v343_v4  ;;  %v7489_v12 = vld [vmem:[#allocation25_spill] sm:$0xff]  ;;  %v7490_v21 = vld [vmem:[#allocation26_spill] sm:$0xff]  ;;  %351 = vperm.xlu1 %5741, %v6411_v29  }
 0x193   :  { %v7493_v15 = vld [vmem:[#allocation29_spill] sm:$0xff]  ;;  %v7494_v56 = vld [vmem:[#allocation30_spill] sm:$0xff]  ;;  %363 = vperm.xlu0 %5742, %v6425_v38  }
 0x194   :  { %828 = vst [vmem:[#allocation3] sm:$0x3] %v827_v43  ;;  %898 = vmatmul.mubr.f32.vlgmr.msra.gmra.mrb[2].mxu0 %v827_v43  ;;  %969 = vmatmul.mubr.f32.vlgmr.msra.gmra.mrb[2].mxu1 %v827_v43  ;;  %v338_v43 = vmul.f32 %v336_v57, %v6551_v13  ;;  %v344_v33 = vadd.f32 %v340_v39, %v332_v31  ;;  %v7495_v57 = vld [vmem:[#allocation18_spill] sm:$0xff] }
 0x195   :  { %4602 = vmatpush1.bf16.msra.mxu0 %v6341_v10  ;;  %4634 = vmatpush1.bf16.msra.mxu1 %v6344_v14  ;;  %v345_v35 = vadd.f32 %v341_v30, %v333_v5 }
 0x196   :  { %4604 = vmatprep.subr.bf16.mxu0 %v6348_v18  ;;  %4636 = vmatprep.subr.bf16.mxu1 %v6350_v19  ;;  %v342_v47 = vadd.f32 %v338_v43, %v330_v62  ;;  %348 = vst [vmem:[#allocation2 + $0x30] sm:$0x3] %v344_v33  ;;  %v7496_v62 = vld [vmem:[#allocation19_spill] sm:$0xff] }
 0x197   :  { %1072 = vmatprep.mubr.f32.mxu0 %v7487_v51  ;;  %1143 = vmatprep.mubr.f32.mxu1 %v7487_v51  ;;  %349 = vst [vmem:[#allocation2 + $0x38] sm:$0x3] %v345_v35 }
 0x198   :  { %346 = vst [vmem:[#allocation2 + $0x20] sm:$0x3] %v342_v47  ;;  %375 = vperm.xlu1 %5741, %v6420_v34  }
 0x199   :  { %4606 = vmatpush1.bf16.msra.mxu0 %v6353_v23  ;;  %4638 = vmatpush1.bf16.msra.mxu1 %v6357_v27  ;;  %v830_v39 = vld [vmem:[#allocation2 + $0x28] sm:$0x3] }
 0x19a   :  { %4608 = vmatprep.subr.bf16.mxu0 %v6359_v28  ;;  %4640 = vmatprep.subr.bf16.mxu1 %v6361_v32 }
 0x19d   :  { %4610 = vmatpush1.bf16.msra.mxu0 %v6364_v36  ;;  %4642 = vmatpush1.bf16.msra.mxu1 %v6368_v40 }
 0x19e   :  { %4612 = vmatprep.subr.bf16.mxu0 %v6370_v41  ;;  %4644 = vmatprep.subr.bf16.mxu1 %v6373_v45 }
 0x19f   :  { %v829_v31 = vld [vmem:[#allocation2 + $0x20] sm:$0x3] }
 0x1a1   :  { %4614 = vmatpush1.bf16.msra.mxu0 %v6376_v52  ;;  %4646 = vmatpush1.bf16.msra.mxu1 %v6380_v53 }
 0x1a2   :  { %4616 = vmatprep.subr.bf16.mxu0 %v6382_v54  ;;  %4648 = vmatprep.subr.bf16.mxu1 %v6385_v58 }
 0x1a5   :  { %4618 = vmatpush1.bf16.msra.mxu0 %v6388_v1  ;;  %4650 = vmatpush1.bf16.msra.mxu1 %v6392_v2 }
 0x1a6   :  { %4620 = vmatprep.subr.bf16.mxu0 %v6394_v3  ;;  %4652 = vmatprep.subr.bf16.mxu1 %v6397_v8 }
 0x1a9   :  { %4622 = vmatpush1.bf16.msra.mxu0 %v6400_v17  ;;  %4654 = vmatpush1.bf16.msra.mxu1 %v6404_v22 }
 0x1aa   :  { %4624 = vmatprep.subr.bf16.mxu0 %v6406_v24  ;;  %4656 = vmatprep.subr.bf16.mxu1 %v7488_v37 }
 0x1ad   :  { %4626 = vmatpush1.bf16.msra.mxu0 %v7489_v12  ;;  %4658 = vmatpush1.bf16.msra.mxu1 %v7490_v21 }
 0x1ae   :  { %4628 = vmatprep.subr.bf16.mxu0 %v7491_v25  ;;  %4660 = vmatprep.subr.bf16.mxu1 %v7492_v26 }
 0x1b1   :  { %4630 = vmatpush1.bf16.msra.mxu0 %v7493_v15  ;;  %4662 = vmatpush1.bf16.msra.mxu1 %v7494_v56 }
 0x1b2   :  { %4664 = vmatprep.subr.bf16.mxu0 %v7495_v57  ;;  %4696 = vmatprep.subr.bf16.mxu1 %v7496_v62  ;;  %v832_v62 = vld [vmem:[#allocation2 + $0x38] sm:$0x3]  ;;  %v831_v57 = vld [vmem:[#allocation2 + $0x30] sm:$0x3] }
 0x267   :  { %v899_v5 = vpop.f32.mrb[2].mxu0  ;;  %v970_v43 = vpop.f32.mrb[2].mxu1 }
 0x268   :  { %v975_v42 = vadd.f32 %v899_v5, %v829_v31  ;;  %v901_v30 = vpop.f32.mrb[3].mxu0  ;;  %v972_v47 = vpop.f32.mrb[3].mxu1  ;;  %v977_v56 = vadd.f32 %v970_v43, %v831_v57 }
 0x269   :  { %v976_v4 = vadd.f32 %v901_v30, %v830_v39  ;;  %v978_v50 = vadd.f32 %v972_v47, %v832_v62 }
 0x26a   :  { %v4339_v33 = vmul.f32 -1.442695, %v975_v42 }
 0x26b   :  { %v4340_v35 = vmul.f32 -1.442695, %v976_v4  ;;  %v4341_v29 = vmul.f32 -1.442695, %v978_v50 }
 0x26c   :  { %5769 = vpow2.f32 %v4339_v33 }
 0x26d   :  { %5771 = vpow2.f32 %v4340_v35 }
 0x26e   :  { %5773 = vpow2.f32 %v4341_v29 }
 0x26f   :  { %5775 = vtanh.f32 %v977_v56 }
 0x276   :  { %v5770_v38 = vpop.eup %5769 }
 0x277   :  { %v5772_v15 = vpop.eup %5771  ;;  %v982_v34 = vadd.f32 1.0, %v5770_v38 }
 0x278   :  { %v988_v26 = vadd.f32 1.0, %v5772_v15  ;;  %v5774_v31 = vpop.eup %5773 }
 0x279   :  { %5777 = vrcp.f32 %v982_v34  ;;  %v5776_v5 = vpop.eup %5775  ;;  %v995_v4 = vadd.f32 1.0, %v5774_v31  ;;  %v352_v34 = vpop.permute.xlu1 %351 }
 0x27a   :  { %5779 = vrcp.f32 %v988_v26  ;;  %v364_v26 = vpop.permute.xlu0 %363  ;;  %v354_v15 = vmul.f32 %v352_v34, %v6514_v44  ;;  %v356_v56 = vmul.f32 %v352_v34, %v6520_v48  ;;  %v357_v43 = vmul.f32 %v352_v34, %v6523_v49 }
 0x27b   :  { %5781 = vrcp.f32 %v995_v4  ;;  %v366_v47 = vmul.f32 %v364_v26, %v6539_v63  ;;  %v367_v35 = vmul.f32 %v364_v26, %v6542_v6  ;;  %v368_v50 = vmul.f32 %v364_v26, %v6545_v7 }
 0x27c   :  { %v369_v31 = vmul.f32 %v364_v26, %v6548_v11 }
 0x27d   :  { %v376_v4 = vpop.permute.xlu1 %375 }
 0x27e   :  { %v379_v26 = vmul.f32 %v376_v4, %v6554_v0 }
 0x283   :  { %v5778_v39 = vpop.eup %5777 }
 0x284   :  { %v5780_v42 = vpop.eup %5779  ;;  %v999_v30 = vmul.f32 %v5778_v39, %v5776_v5  ;;  %v358_v5 = vadd.f32 %v354_v15, %v6526_v55  ;;  %v380_v15 = vmul.f32 %v376_v4, %v6557_v16 }
 0x285   :  { %v998_v33 = vmul.f32 %v5780_v42, %v6581_v9  ;;  %v5782_v57 = vpop.eup %5781  ;;  %v355_v9 = vmul.f32 %v352_v34, %v6517_v46  ;;  %v360_v42 = vadd.f32 %v356_v56, %v6532_v60  ;;  %v378_v34 = vmul.f32 %v376_v4, %v6551_v13 }
 0x287   :  { %v6638_v62 = vadd.f32 %v999_v30, %v998_v33  ;;  %v359_v39 = vadd.f32 %v355_v9, %v6529_v59  ;;  %v361_v30 = vadd.f32 %v357_v43, %v6536_v61  ;;  %v370_v33 = vadd.f32 %v366_v47, %v358_v5  ;;  %v7500_v5 = vld [vmem:[#allocation18_spill] sm:$0xff] }
 0x288   :  { %v381_v9 = vmul.f32 %v376_v4, %v6560_v20  ;;  %v7503_v4 = vld [vmem:[#allocation24_spill] sm:$0xff] }
 0x289   :  { %5783 = vtanh.f32 %v6638_v62  ;;  %v382_v56 = vadd.f32 %v378_v34, %v370_v33  ;;  %v7504_v33 = vld [vmem:[#allocation23_spill] sm:$0xff] }
 0x28b   :  { %386 = vst [vmem:[#allocation2 + $0x40] sm:$0x3] %v382_v56 }
 0x293   :  { %v5784_v38 = vpop.eup %5783 }
 0x294   :  { %v1002_v29 = vmul.f32 %v5784_v38, %v5782_v57  ;;  %v371_v57 = vadd.f32 %v367_v35, %v359_v39  ;;  %v372_v38 = vadd.f32 %v368_v50, %v360_v42  ;;  %v7498_v50 = vld [vmem:[#allocation29_spill] sm:$0xff]  ;;  %v7501_v39 = vld [vmem:[#allocation19_spill] sm:$0xff]  ;;  %v6168_v42 = vmov 3  }
 0x295   :  { %5743 = vset.pattern.permute.xlu1 %v6168_v42  ;;  %5744 = vset.pattern.permute.xlu0 %v6168_v42 }
 0x296   :  { %1003 = vst [vmem:[#allocation3 + $0x8] sm:$0x3] %v1002_v29  ;;  %1073 = vmatmul.mubr.f32.vlgmr.msra.gmra.mrb[4].mxu0 %v1002_v29  ;;  %1144 = vmatmul.mubr.f32.vlgmr.msra.gmra.mrb[4].mxu1 %v1002_v29  ;;  %v373_v29 = vadd.f32 %v369_v31, %v361_v30  ;;  %v383_v43 = vadd.f32 %v379_v26, %v371_v57  ;;  %v7499_v31 = vld [vmem:[#allocation30_spill] sm:$0xff]  ;;  %v7502_v30 = vld [vmem:[#allocation21_spill] sm:$0xff]  ;;  %v1004_v57 = vld [vmem:[#allocation2 + $0x40] sm:$0x3] }
 0x297   :  { %4666 = vmatpush1.bf16.msra.mxu0 %v6341_v10  ;;  %4698 = vmatpush1.bf16.msra.mxu1 %v6344_v14  ;;  %v384_v47 = vadd.f32 %v380_v15, %v372_v38 }
 0x298   :  { %4668 = vmatprep.subr.bf16.mxu0 %v6348_v18  ;;  %4700 = vmatprep.subr.bf16.mxu1 %v6350_v19  ;;  %v385_v35 = vadd.f32 %v381_v9, %v373_v29  ;;  %387 = vst [vmem:[#allocation2 + $0x48] sm:$0x3] %v383_v43 }
 0x299   :  { %1247 = vmatprep.mubr.f32.mxu0 %v7487_v51  ;;  %1318 = vmatprep.mubr.f32.mxu1 %v7487_v51  ;;  %388 = vst [vmem:[#allocation2 + $0x50] sm:$0x3] %v384_v47  ;;  %v7497_v51 = vld [vmem:[#allocation28_spill] sm:$0xff] }
 0x29a   :  { %389 = vst [vmem:[#allocation2 + $0x58] sm:$0x3] %v385_v35  ;;  %391 = vperm.xlu1 %5743, %v7502_v30   ;;  %403 = vperm.xlu0 %5744, %v7503_v4  }
 0x29b   :  { %4670 = vmatpush1.bf16.msra.mxu0 %v6353_v23  ;;  %4702 = vmatpush1.bf16.msra.mxu1 %v6357_v27 }
 0x29c   :  { %4672 = vmatprep.subr.bf16.mxu0 %v6359_v28  ;;  %4704 = vmatprep.subr.bf16.mxu1 %v6361_v32 }
 0x29e   :  { %415 = vperm.xlu1 %5743, %v7504_v33  }
 0x29f   :  { %4674 = vmatpush1.bf16.msra.mxu0 %v6364_v36  ;;  %4706 = vmatpush1.bf16.msra.mxu1 %v6368_v40  ;;  %v1005_v26 = vld [vmem:[#allocation2 + $0x48] sm:$0x3] }
 0x2a0   :  { %4676 = vmatprep.subr.bf16.mxu0 %v6370_v41  ;;  %4708 = vmatprep.subr.bf16.mxu1 %v6373_v45 }
 0x2a1   :  { %v1007_v35 = vld [vmem:[#allocation2 + $0x58] sm:$0x3] }
 0x2a3   :  { %4678 = vmatpush1.bf16.msra.mxu0 %v6376_v52  ;;  %4710 = vmatpush1.bf16.msra.mxu1 %v6380_v53 }
 0x2a4   :  { %4680 = vmatprep.subr.bf16.mxu0 %v6382_v54  ;;  %4712 = vmatprep.subr.bf16.mxu1 %v6385_v58 }
 0x2a7   :  { %4682 = vmatpush1.bf16.msra.mxu0 %v6388_v1  ;;  %4714 = vmatpush1.bf16.msra.mxu1 %v6392_v2 }
 0x2a8   :  { %4684 = vmatprep.subr.bf16.mxu0 %v6394_v3  ;;  %4716 = vmatprep.subr.bf16.mxu1 %v6397_v8 }
 0x2ab   :  { %4686 = vmatpush1.bf16.msra.mxu0 %v6400_v17  ;;  %4718 = vmatpush1.bf16.msra.mxu1 %v6404_v22 }
 0x2ac   :  { %4688 = vmatprep.subr.bf16.mxu0 %v6406_v24  ;;  %4720 = vmatprep.subr.bf16.mxu1 %v7488_v37 }
 0x2af   :  { %4690 = vmatpush1.bf16.msra.mxu0 %v7489_v12  ;;  %4722 = vmatpush1.bf16.msra.mxu1 %v7490_v21 }
 0x2b0   :  { %4692 = vmatprep.subr.bf16.mxu0 %v7491_v25  ;;  %4724 = vmatprep.subr.bf16.mxu1 %v7497_v51 }
 0x2b3   :  { %4694 = vmatpush1.bf16.msra.mxu0 %v7498_v50  ;;  %4726 = vmatpush1.bf16.msra.mxu1 %v7499_v31 }
 0x2b4   :  { %4728 = vmatprep.subr.bf16.mxu0 %v7500_v5  ;;  %4760 = vmatprep.subr.bf16.mxu1 %v7501_v39  ;;  %v1006_v39 = vld [vmem:[#allocation2 + $0x50] sm:$0x3] }
 0x369   :  { %v1074_v38 = vpop.f32.mrb[4].mxu0  ;;  %v1145_v29 = vpop.f32.mrb[4].mxu1 }
 0x36a   :  { %v1150_v34 = vadd.f32 %v1074_v38, %v1004_v57  ;;  %v1076_v15 = vpop.f32.mrb[5].mxu0  ;;  %v1147_v9 = vpop.f32.mrb[5].mxu1  ;;  %v1152_v5 = vadd.f32 %v1145_v29, %v1006_v39 }
 0x36b   :  { %v1151_v56 = vadd.f32 %v1076_v15, %v1005_v26  ;;  %v1153_v42 = vadd.f32 %v1147_v9, %v1007_v35 }
 0x36c   :  { %v4342_v43 = vmul.f32 -1.442695, %v1150_v34 }
 0x36d   :  { %v4343_v47 = vmul.f32 -1.442695, %v1151_v56  ;;  %v4344_v30 = vmul.f32 -1.442695, %v1153_v42 }
 0x36e   :  { %5785 = vpow2.f32 %v4342_v43 }
 0x36f   :  { %5787 = vpow2.f32 %v4343_v47 }
 0x370   :  { %5789 = vpow2.f32 %v4344_v30 }
 0x371   :  { %5791 = vtanh.f32 %v1152_v5 }
 0x378   :  { %v5786_v4 = vpop.eup %5785 }
 0x379   :  { %v5788_v31 = vpop.eup %5787  ;;  %v1157_v33 = vadd.f32 1.0, %v5786_v4 }
 0x37a   :  { %v1163_v50 = vadd.f32 1.0, %v5788_v31  ;;  %v5790_v57 = vpop.eup %5789  ;;  %v404_v31 = vpop.permute.xlu0 %403 }
 0x37b   :  { %5793 = vrcp.f32 %v1157_v33  ;;  %v5792_v38 = vpop.eup %5791  ;;  %v1170_v56 = vadd.f32 1.0, %v5790_v57  ;;  %v406_v47 = vmul.f32 %v404_v31, %v6539_v63  ;;  %v407_v35 = vmul.f32 %v404_v31, %v6542_v6 }
 0x37c   :  { %5795 = vrcp.f32 %v1163_v50  ;;  %v392_v50 = vpop.permute.xlu1 %391  ;;  %v408_v42 = vmul.f32 %v404_v31, %v6545_v7  ;;  %v409_v57 = vmul.f32 %v404_v31, %v6548_v11 }
 0x37d   :  { %5797 = vrcp.f32 %v1170_v56  ;;  %v394_v5 = vmul.f32 %v392_v50, %v6514_v44  ;;  %v396_v33 = vmul.f32 %v392_v50, %v6520_v48  ;;  %v397_v29 = vmul.f32 %v392_v50, %v6523_v49  ;;  %v6714_v56 = vld [vmem:[#allocation3 + $0x18] sm:$0xff] }
 0x385   :  { %v5794_v26 = vpop.eup %5793 }
 0x386   :  { %v5796_v34 = vpop.eup %5795  ;;  %v1174_v15 = vmul.f32 %v5794_v26, %v5792_v38  ;;  %v398_v38 = vadd.f32 %v394_v5, %v6526_v55 }
 0x387   :  { %v1173_v43 = vmul.f32 %v5796_v34, %v6638_v62  ;;  %v5798_v39 = vpop.eup %5797  ;;  %v395_v62 = vmul.f32 %v392_v50, %v6517_v46  ;;  %v400_v34 = vadd.f32 %v396_v33, %v6532_v60 }
 0x389   :  { %v6695_v9 = vadd.f32 %v1174_v15, %v1173_v43  ;;  %v399_v26 = vadd.f32 %v395_v62, %v6529_v59  ;;  %v401_v15 = vadd.f32 %v397_v29, %v6536_v61  ;;  %v416_v43 = vpop.permute.xlu1 %415 }
 0x38a   :  { %v418_v31 = vmul.f32 %v416_v43, %v6551_v13  ;;  %v419_v5 = vmul.f32 %v416_v43, %v6554_v0  ;;  %v420_v62 = vmul.f32 %v416_v43, %v6557_v16  ;;  %v421_v33 = vmul.f32 %v416_v43, %v6560_v20  ;;  %v7511_v43 = vld [vmem:[#allocation23_spill] sm:$0xff] }
 0x38b   :  { %5799 = vtanh.f32 %v6695_v9  ;;  %v413_v50 = vadd.f32 %v409_v57, %v401_v15  ;;  %v7507_v57 = vld [vmem:[#allocation18_spill] sm:$0xff]  ;;  %v7510_v15 = vld [vmem:[#allocation24_spill] sm:$0xff] }
 0x395   :  { %v5800_v4 = vpop.eup %5799 }
 0x396   :  { %v1177_v30 = vmul.f32 %v5800_v4, %v5798_v39  ;;  %v410_v39 = vadd.f32 %v406_v47, %v398_v38  ;;  %v411_v4 = vadd.f32 %v407_v35, %v399_v26  ;;  %v425_v35 = vadd.f32 %v421_v33, %v413_v50  ;;  %v7508_v38 = vld [vmem:[#allocation19_spill] sm:$0xff] }
 0x397   :  { %v6169_v26 = vmov 4  }
 0x398   :  { %1178 = vst [vmem:[#allocation3 + $0x10] sm:$0x3] %v1177_v30  ;;  %1248 = vmatmul.mubr.f32.vlgmr.msra.gmra.mrb[6].mxu0 %v1177_v30  ;;  %1319 = vmatmul.mubr.f32.vlgmr.msra.gmra.mrb[6].mxu1 %v1177_v30  ;;  %v412_v30 = vadd.f32 %v408_v42, %v400_v34  ;;  %v422_v29 = vadd.f32 %v418_v31, %v410_v39  ;;  %429 = vst [vmem:[#allocation2 + $0x78] sm:$0x3] %v425_v35  ;;  %v7506_v42 = vld [vmem:[#allocation30_spill] sm:$0xff]  ;;  %v7509_v34 = vld [vmem:[#allocation21_spill] sm:$0xff] }
 0x399   :  { %4730 = vmatpush1.bf16.msra.mxu0 %v6341_v10  ;;  %4762 = vmatpush1.bf16.msra.mxu1 %v6344_v14 }
 0x39a   :  { %4732 = vmatprep.subr.bf16.mxu0 %v6348_v18  ;;  %4764 = vmatprep.subr.bf16.mxu1 %v6350_v19  ;;  %v424_v47 = vadd.f32 %v420_v62, %v412_v30  ;;  %426 = vst [vmem:[#allocation2 + $0x60] sm:$0x3] %v422_v29 }
 0x39b   :  { %1422 = vmatprep.mubr.f32.mxu0 %v6714_v56  ;;  %1493 = vmatprep.mubr.f32.mxu1 %v6714_v56 }
 0x39c   :  { %428 = vst [vmem:[#allocation2 + $0x70] sm:$0x3] %v424_v47  ;;  %5745 = vset.pattern.permute.xlu1 %v6169_v26  ;;  %5746 = vset.pattern.permute.xlu0 %v6169_v26 }
 0x39d   :  { %4734 = vmatpush1.bf16.msra.mxu0 %v6353_v23  ;;  %4766 = vmatpush1.bf16.msra.mxu1 %v6357_v27  ;;  %v423_v27 = vadd.f32 %v419_v5, %v411_v4 }
 0x39e   :  { %4736 = vmatprep.subr.bf16.mxu0 %v6359_v28  ;;  %4768 = vmatprep.subr.bf16.mxu1 %v6361_v32 }
 0x39f   :  { %427 = vst [vmem:[#allocation2 + $0x68] sm:$0x3] %v423_v27  ;;  %v7505_v27 = vld [vmem:[#allocation29_spill] sm:$0xff]  ;;  %431 = vperm.xlu1 %5745, %v7509_v34   ;;  %443 = vperm.xlu0 %5746, %v7510_v15   ;;  %v1182_v35 = vld [vmem:[#allocation2 + $0x78] sm:$0x3] }
 0x3a1   :  { %4738 = vmatpush1.bf16.msra.mxu0 %v6364_v36  ;;  %4770 = vmatpush1.bf16.msra.mxu1 %v6368_v40  ;;  %v1179_v39 = vld [vmem:[#allocation2 + $0x60] sm:$0x3] }
 0x3a2   :  { %4740 = vmatprep.subr.bf16.mxu0 %v6370_v41  ;;  %4772 = vmatprep.subr.bf16.mxu1 %v6373_v45 }
 0x3a3   :  { %455 = vperm.xlu1 %5745, %v7511_v43  }
 0x3a5   :  { %4742 = vmatpush1.bf16.msra.mxu0 %v6376_v52  ;;  %4774 = vmatpush1.bf16.msra.mxu1 %v6380_v53 }
 0x3a6   :  { %4744 = vmatprep.subr.bf16.mxu0 %v6382_v54  ;;  %4776 = vmatprep.subr.bf16.mxu1 %v6385_v58  ;;  %v1180_v31 = vld [vmem:[#allocation2 + $0x68] sm:$0x3] }
 0x3a9   :  { %4746 = vmatpush1.bf16.msra.mxu0 %v6388_v1  ;;  %4778 = vmatpush1.bf16.msra.mxu1 %v6392_v2 }
 0x3aa   :  { %4748 = vmatprep.subr.bf16.mxu0 %v6394_v3  ;;  %4780 = vmatprep.subr.bf16.mxu1 %v6397_v8 }
 0x3ad   :  { %4750 = vmatpush1.bf16.msra.mxu0 %v6400_v17  ;;  %4782 = vmatpush1.bf16.msra.mxu1 %v6404_v22 }
 0x3ae   :  { %4752 = vmatprep.subr.bf16.mxu0 %v6406_v24  ;;  %4784 = vmatprep.subr.bf16.mxu1 %v7488_v37 }
 0x3b1   :  { %4754 = vmatpush1.bf16.msra.mxu0 %v7489_v12  ;;  %4786 = vmatpush1.bf16.msra.mxu1 %v7490_v21 }
 0x3b2   :  { %4756 = vmatprep.subr.bf16.mxu0 %v7491_v25  ;;  %4788 = vmatprep.subr.bf16.mxu1 %v7497_v51 }
 0x3b5   :  { %4758 = vmatpush1.bf16.msra.mxu0 %v7505_v27  ;;  %4790 = vmatpush1.bf16.msra.mxu1 %v7506_v42 }
 0x3b6   :  { %4792 = vmatprep.subr.bf16.mxu0 %v7507_v57  ;;  %4824 = vmatprep.subr.bf16.mxu1 %v7508_v38  ;;  %v1181_v38 = vld [vmem:[#allocation2 + $0x70] sm:$0x3] }
 0x46b   :  { %v1249_v4 = vpop.f32.mrb[6].mxu0  ;;  %v1320_v30 = vpop.f32.mrb[6].mxu1 }
 0x46c   :  { %v1325_v50 = vadd.f32 %v1249_v4, %v1179_v39  ;;  %v1251_v5 = vpop.f32.mrb[7].mxu0  ;;  %v1322_v62 = vpop.f32.mrb[7].mxu1  ;;  %v1327_v57 = vadd.f32 %v1320_v30, %v1181_v38 }
 0x46d   :  { %v1326_v33 = vadd.f32 %v1251_v5, %v1180_v31  ;;  %v1328_v26 = vadd.f32 %v1322_v62, %v1182_v35 }
 0x46e   :  { %v4345_v29 = vmul.f32 -1.442695, %v1325_v50 }
 0x46f   :  { %v4346_v47 = vmul.f32 -1.442695, %v1326_v33  ;;  %v4347_v34 = vmul.f32 -1.442695, %v1328_v26 }
 0x470   :  { %5801 = vpow2.f32 %v4345_v29 }
 0x471   :  { %5803 = vpow2.f32 %v4346_v47 }
 0x472   :  { %5805 = vpow2.f32 %v4347_v34 }
 0x473   :  { %5807 = vtanh.f32 %v1327_v57 }
 0x47a   :  { %v5802_v15 = vpop.eup %5801 }
 0x47b   :  { %v5804_v42 = vpop.eup %5803  ;;  %v1332_v43 = vadd.f32 1.0, %v5802_v15 }
 0x47c   :  { %v1338_v27 = vadd.f32 1.0, %v5804_v42  ;;  %v5806_v39 = vpop.eup %5805  ;;  %v444_v42 = vpop.permute.xlu0 %443 }
 0x47d   :  { %5809 = vrcp.f32 %v1332_v43  ;;  %v5808_v4 = vpop.eup %5807  ;;  %v1345_v33 = vadd.f32 1.0, %v5806_v39  ;;  %v446_v34 = vmul.f32 %v444_v42, %v6539_v63  ;;  %v447_v15 = vmul.f32 %v444_v42, %v6542_v6 }
 0x47e   :  { %5811 = vrcp.f32 %v1338_v27  ;;  %v432_v27 = vpop.permute.xlu1 %431  ;;  %v448_v43 = vmul.f32 %v444_v42, %v6545_v7  ;;  %v449_v39 = vmul.f32 %v444_v42, %v6548_v11 }
 0x47f   :  { %5813 = vrcp.f32 %v1345_v33  ;;  %v434_v57 = vmul.f32 %v432_v27, %v6514_v44  ;;  %v436_v35 = vmul.f32 %v432_v27, %v6520_v48  ;;  %v437_v26 = vmul.f32 %v432_v27, %v6523_v49 }
 0x482   :  { %v456_v33 = vpop.permute.xlu1 %455 }
 0x483   :  { %v458_v42 = vmul.f32 %v456_v33, %v6551_v13 }
 0x487   :  { %v5810_v31 = vpop.eup %5809 }
 0x488   :  { %v5812_v50 = vpop.eup %5811  ;;  %v1349_v5 = vmul.f32 %v5810_v31, %v5808_v4  ;;  %v438_v4 = vadd.f32 %v434_v57, %v6526_v55  ;;  %v459_v57 = vmul.f32 %v456_v33, %v6554_v0 }
 0x489   :  { %v1348_v29 = vmul.f32 %v5812_v50, %v6695_v9  ;;  %v5814_v38 = vpop.eup %5813  ;;  %v435_v9 = vmul.f32 %v432_v27, %v6517_v46  ;;  %v440_v50 = vadd.f32 %v436_v35, %v6532_v60  ;;  %v461_v35 = vmul.f32 %v456_v33, %v6560_v20 }
 0x48b   :  { %v6754_v62 = vadd.f32 %v1349_v5, %v1348_v29  ;;  %v439_v31 = vadd.f32 %v435_v9, %v6529_v59  ;;  %v441_v5 = vadd.f32 %v437_v26, %v6536_v61  ;;  %v7512_v29 = vld [vmem:[#allocation20_spill] sm:$0xff]  ;;  %v460_v9 = vmul.f32 %v456_v33, %v6557_v16  ;;  %v6816_v33 = vld [vmem:[%s7414_s1] sm:$0x3] }
 0x48c   :  { %7518 = vst [vmem:[#allocation25_spill] sm:$0xff] %v6816_v33 }
 0x48d   :  { %5815 = vtanh.f32 %v6754_v62  ;;  %v453_v27 = vadd.f32 %v449_v39, %v441_v5  ;;  %v7514_v39 = vld [vmem:[#allocation30_spill] sm:$0xff]  ;;  %v6810_v5 = vld [vmem:[%s7413_s0] sm:$0x3] }
 0x48e   :  { %7517 = vst [vmem:[#allocation22_spill] sm:$0xff] %v6810_v5 }
 0x497   :  { %v5816_v30 = vpop.eup %5815 }
 0x498   :  { %v1352_v47 = vmul.f32 %v5816_v30, %v5814_v38  ;;  %v450_v38 = vadd.f32 %v446_v34, %v438_v4  ;;  %v451_v30 = vadd.f32 %v447_v15, %v439_v31  ;;  %v465_v15 = vadd.f32 %v461_v35, %v453_v27  ;;  %v7515_v4 = vld [vmem:[#allocation18_spill] sm:$0xff]  ;;  %v7516_v31 = vld [vmem:[#allocation19_spill] sm:$0xff] }
 0x49a   :  { %1353 = vst [vmem:[#allocation3 + $0x18] sm:$0x3] %v1352_v47  ;;  %1423 = vmatmul.mubr.f32.vlgmr.msra.gmra.mrb[8].mxu0 %v1352_v47  ;;  %1494 = vmatmul.mubr.f32.vlgmr.msra.gmra.mrb[8].mxu1 %v1352_v47  ;;  %v452_v47 = vadd.f32 %v448_v43, %v440_v50  ;;  %v462_v26 = vadd.f32 %v458_v42, %v450_v38  ;;  %469 = vst [vmem:[#allocation2 + $0x98] sm:$0x3] %v465_v15  ;;  %v7513_v43 = vld [vmem:[#allocation29_spill] sm:$0xff]  ;;  %v6170_v50 = vmov 5  }
 0x49b   :  { %4794 = vmatpush1.bf16.msra.mxu0 %v6341_v10  ;;  %4826 = vmatpush1.bf16.msra.mxu1 %v6344_v14 }
 0x49c   :  { %4796 = vmatprep.subr.bf16.mxu0 %v6348_v18  ;;  %4828 = vmatprep.subr.bf16.mxu1 %v6350_v19  ;;  %v464_v34 = vadd.f32 %v460_v9, %v452_v47  ;;  %466 = vst [vmem:[#allocation2 + $0x80] sm:$0x3] %v462_v26 }
 0x49d   :  { %1597 = vmatprep.mubr.f32.mxu0 %v6714_v56  ;;  %1668 = vmatprep.mubr.f32.mxu1 %v6714_v56 }
 0x49e   :  { %468 = vst [vmem:[#allocation2 + $0x90] sm:$0x3] %v464_v34  ;;  %5747 = vset.pattern.permute.xlu1 %v6170_v50  ;;  %5748 = vset.pattern.permute.xlu0 %v6170_v50 }
 0x49f   :  { %4798 = vmatpush1.bf16.msra.mxu0 %v6353_v23  ;;  %4830 = vmatpush1.bf16.msra.mxu1 %v7512_v29  ;;  %v463_v29 = vadd.f32 %v459_v57, %v451_v30 }
 0x4a0   :  { %4800 = vmatprep.subr.bf16.mxu0 %v6359_v28  ;;  %4832 = vmatprep.subr.bf16.mxu1 %v6361_v32 }
 0x4a1   :  { %467 = vst [vmem:[#allocation2 + $0x88] sm:$0x3] %v463_v29  ;;  %471 = vperm.xlu1 %5747, %v6810_v5   ;;  %483 = vperm.xlu0 %5748, %v6816_v33   ;;  %v6822_v29 = vld [vmem:[%s7415_s2] sm:$0x3]  ;;  %v1357_v15 = vld [vmem:[#allocation2 + $0x98] sm:$0x3] }
 0x4a2   :  { %7519 = vst [vmem:[#allocation26_spill] sm:$0xff] %v6822_v29 }
 0x4a3   :  { %4802 = vmatpush1.bf16.msra.mxu0 %v6364_v36  ;;  %4834 = vmatpush1.bf16.msra.mxu1 %v6368_v40  ;;  %v1354_v38 = vld [vmem:[#allocation2 + $0x80] sm:$0x3] }
 0x4a4   :  { %4804 = vmatprep.subr.bf16.mxu0 %v6370_v41  ;;  %4836 = vmatprep.subr.bf16.mxu1 %v6373_v45 }
 0x4a5   :  { %495 = vperm.xlu1 %5747, %v6822_v29   ;;  %v1356_v33 = vld [vmem:[#allocation2 + $0x90] sm:$0x3] }
 0x4a7   :  { %4806 = vmatpush1.bf16.msra.mxu0 %v6376_v52  ;;  %4838 = vmatpush1.bf16.msra.mxu1 %v6380_v53 }
 0x4a8   :  { %4808 = vmatprep.subr.bf16.mxu0 %v6382_v54  ;;  %4840 = vmatprep.subr.bf16.mxu1 %v6385_v58  ;;  %v1355_v42 = vld [vmem:[#allocation2 + $0x88] sm:$0x3] }
 0x4ab   :  { %4810 = vmatpush1.bf16.msra.mxu0 %v6388_v1  ;;  %4842 = vmatpush1.bf16.msra.mxu1 %v6392_v2 }
 0x4ac   :  { %4812 = vmatprep.subr.bf16.mxu0 %v6394_v3  ;;  %4844 = vmatprep.subr.bf16.mxu1 %v6397_v8 }
 0x4af   :  { %4814 = vmatpush1.bf16.msra.mxu0 %v6400_v17  ;;  %4846 = vmatpush1.bf16.msra.mxu1 %v6404_v22 }
 0x4b0   :  { %4816 = vmatprep.subr.bf16.mxu0 %v6406_v24  ;;  %4848 = vmatprep.subr.bf16.mxu1 %v7488_v37 }
 0x4b3   :  { %4818 = vmatpush1.bf16.msra.mxu0 %v7489_v12  ;;  %4850 = vmatpush1.bf16.msra.mxu1 %v7490_v21 }
 0x4b4   :  { %4820 = vmatprep.subr.bf16.mxu0 %v7491_v25  ;;  %4852 = vmatprep.subr.bf16.mxu1 %v7497_v51 }
 0x4b7   :  { %4822 = vmatpush1.bf16.msra.mxu0 %v7513_v43  ;;  %4854 = vmatpush1.bf16.msra.mxu1 %v7514_v39 }
 0x4b8   :  { %4856 = vmatprep.subr.bf16.mxu0 %v7515_v4  ;;  %4888 = vmatprep.subr.bf16.mxu1 %v7516_v31 }
 0x56d   :  { %v1424_v30 = vpop.f32.mrb[8].mxu0  ;;  %v1495_v47 = vpop.f32.mrb[8].mxu1 }
 0x56e   :  { %v1500_v27 = vadd.f32 %v1424_v30, %v1354_v38  ;;  %v1426_v57 = vpop.f32.mrb[9].mxu0  ;;  %v1497_v9 = vpop.f32.mrb[9].mxu1  ;;  %v1502_v31 = vadd.f32 %v1495_v47, %v1356_v33 }
 0x56f   :  { %v1501_v35 = vadd.f32 %v1426_v57, %v1355_v42  ;;  %v1503_v50 = vadd.f32 %v1497_v9, %v1357_v15 }
 0x570   :  { %v4348_v26 = vmul.f32 -1.442695, %v1500_v27 }
 0x571   :  { %v4349_v34 = vmul.f32 -1.442695, %v1501_v35  ;;  %v4350_v5 = vmul.f32 -1.442695, %v1503_v50 }
 0x572   :  { %5817 = vpow2.f32 %v4348_v26 }
 0x573   :  { %5819 = vpow2.f32 %v4349_v34 }
 0x574   :  { %5821 = vpow2.f32 %v4350_v5 }
 0x575   :  { %5823 = vtanh.f32 %v1502_v31 }
 0x57c   :  { %v5818_v4 = vpop.eup %5817 }
 0x57d   :  { %v5820_v39 = vpop.eup %5819  ;;  %v1507_v29 = vadd.f32 1.0, %v5818_v4 }
 0x57e   :  { %v1513_v43 = vadd.f32 1.0, %v5820_v39  ;;  %v5822_v38 = vpop.eup %5821  ;;  %v484_v39 = vpop.permute.xlu0 %483 }
 0x57f   :  { %5825 = vrcp.f32 %v1507_v29  ;;  %v5824_v30 = vpop.eup %5823  ;;  %v1520_v35 = vadd.f32 1.0, %v5822_v38  ;;  %v486_v34 = vmul.f32 %v484_v39, %v6539_v63  ;;  %v487_v15 = vmul.f32 %v484_v39, %v6542_v6 }
 0x580   :  { %5827 = vrcp.f32 %v1513_v43  ;;  %v472_v43 = vpop.permute.xlu1 %471  ;;  %v488_v50 = vmul.f32 %v484_v39, %v6545_v7  ;;  %v489_v38 = vmul.f32 %v484_v39, %v6548_v11 }
 0x581   :  { %5829 = vrcp.f32 %v1520_v35  ;;  %v474_v31 = vmul.f32 %v472_v43, %v6514_v44  ;;  %v476_v29 = vmul.f32 %v472_v43, %v6520_v48  ;;  %v477_v47 = vmul.f32 %v472_v43, %v6523_v49 }
 0x584   :  { %v496_v35 = vpop.permute.xlu1 %495 }
 0x585   :  { %v498_v39 = vmul.f32 %v496_v35, %v6551_v13 }
 0x589   :  { %v5826_v42 = vpop.eup %5825 }
 0x58a   :  { %v5828_v27 = vpop.eup %5827  ;;  %v1524_v57 = vmul.f32 %v5826_v42, %v5824_v30  ;;  %v478_v30 = vadd.f32 %v474_v31, %v6526_v55  ;;  %v499_v31 = vmul.f32 %v496_v35, %v6554_v0 }
 0x58b   :  { %v1523_v26 = vmul.f32 %v5828_v27, %v6754_v62  ;;  %v5830_v33 = vpop.eup %5829  ;;  %v475_v62 = vmul.f32 %v472_v43, %v6517_v46  ;;  %v480_v27 = vadd.f32 %v476_v29, %v6532_v60  ;;  %v501_v29 = vmul.f32 %v496_v35, %v6560_v20 }
 0x58d   :  { %v6826_v9 = vadd.f32 %v1524_v57, %v1523_v26  ;;  %v479_v42 = vadd.f32 %v475_v62, %v6529_v59  ;;  %v481_v57 = vadd.f32 %v477_v47, %v6536_v61  ;;  %v7520_v26 = vld [vmem:[#allocation20_spill] sm:$0xff]  ;;  %v500_v62 = vmul.f32 %v496_v35, %v6557_v16  ;;  %v7526_v35 = vld [vmem:[#allocation25_spill] sm:$0xff] }
 0x58f   :  { %5831 = vtanh.f32 %v6826_v9  ;;  %v493_v43 = vadd.f32 %v489_v38, %v481_v57  ;;  %v7522_v38 = vld [vmem:[#allocation30_spill] sm:$0xff] }
 0x590   :  { %v7525_v57 = vld [vmem:[#allocation22_spill] sm:$0xff] }
 0x599   :  { %v5832_v4 = vpop.eup %5831 }
 0x59a   :  { %v1527_v5 = vmul.f32 %v5832_v4, %v5830_v33  ;;  %v490_v33 = vadd.f32 %v486_v34, %v478_v30  ;;  %v491_v4 = vadd.f32 %v487_v15, %v479_v42  ;;  %v505_v15 = vadd.f32 %v501_v29, %v493_v43  ;;  %v7523_v30 = vld [vmem:[#allocation18_spill] sm:$0xff]  ;;  %v7524_v42 = vld [vmem:[#allocation19_spill] sm:$0xff] }
 0x59c   :  { %1528 = vst [vmem:[#allocation3 + $0x20] sm:$0x3] %v1527_v5  ;;  %1598 = vmatmul.mubr.f32.vlgmr.msra.gmra.mrb[10].mxu0 %v1527_v5  ;;  %1669 = vmatmul.mubr.f32.vlgmr.msra.gmra.mrb[10].mxu1 %v1527_v5  ;;  %v492_v5 = vadd.f32 %v488_v50, %v480_v27  ;;  %v502_v47 = vadd.f32 %v498_v39, %v490_v33  ;;  %509 = vst [vmem:[#allocation2 + $0xb8] sm:$0x3] %v505_v15  ;;  %v7521_v50 = vld [vmem:[#allocation29_spill] sm:$0xff]  ;;  %v6171_v27 = vmov 6  }
 0x59d   :  { %4858 = vmatpush1.bf16.msra.mxu0 %v6341_v10  ;;  %4890 = vmatpush1.bf16.msra.mxu1 %v6344_v14 }
 0x59e   :  { %4860 = vmatprep.subr.bf16.mxu0 %v6348_v18  ;;  %4892 = vmatprep.subr.bf16.mxu1 %v6350_v19  ;;  %v504_v34 = vadd.f32 %v500_v62, %v492_v5  ;;  %506 = vst [vmem:[#allocation2 + $0xa0] sm:$0x3] %v502_v47 }
 0x59f   :  { %1772 = vmatprep.mubr.f32.mxu0 %v6714_v56  ;;  %1843 = vmatprep.mubr.f32.mxu1 %v6714_v56 }
 0x5a0   :  { %508 = vst [vmem:[#allocation2 + $0xb0] sm:$0x3] %v504_v34  ;;  %5749 = vset.pattern.permute.xlu1 %v6171_v27  ;;  %5750 = vset.pattern.permute.xlu0 %v6171_v27 }
 0x5a1   :  { %4862 = vmatpush1.bf16.msra.mxu0 %v6353_v23  ;;  %4894 = vmatpush1.bf16.msra.mxu1 %v7520_v26  ;;  %v503_v26 = vadd.f32 %v499_v31, %v491_v4 }
 0x5a2   :  { %4864 = vmatprep.subr.bf16.mxu0 %v6359_v28  ;;  %4896 = vmatprep.subr.bf16.mxu1 %v6361_v32 }
 0x5a3   :  { %507 = vst [vmem:[#allocation2 + $0xa8] sm:$0x3] %v503_v26  ;;  %511 = vperm.xlu1 %5749, %v7525_v57   ;;  %523 = vperm.xlu0 %5750, %v7526_v35   ;;  %v7527_v26 = vld [vmem:[#allocation26_spill] sm:$0xff] }
 0x5a4   :  { %v1532_v15 = vld [vmem:[#allocation2 + $0xb8] sm:$0x3] }
 0x5a5   :  { %4866 = vmatpush1.bf16.msra.mxu0 %v6364_v36  ;;  %4898 = vmatpush1.bf16.msra.mxu1 %v6368_v40  ;;  %v1529_v33 = vld [vmem:[#allocation2 + $0xa0] sm:$0x3] }
 0x5a6   :  { %4868 = vmatprep.subr.bf16.mxu0 %v6370_v41  ;;  %4900 = vmatprep.subr.bf16.mxu1 %v6373_v45 }
 0x5a7   :  { %535 = vperm.xlu1 %5749, %v7527_v26  }
 0x5a9   :  { %4870 = vmatpush1.bf16.msra.mxu0 %v6376_v52  ;;  %4902 = vmatpush1.bf16.msra.mxu1 %v6380_v53 }
 0x5aa   :  { %4872 = vmatprep.subr.bf16.mxu0 %v6382_v54  ;;  %4904 = vmatprep.subr.bf16.mxu1 %v6385_v58  ;;  %v1530_v39 = vld [vmem:[#allocation2 + $0xa8] sm:$0x3] }
 0x5ad   :  { %4874 = vmatpush1.bf16.msra.mxu0 %v6388_v1  ;;  %4906 = vmatpush1.bf16.msra.mxu1 %v6392_v2 }
 0x5ae   :  { %4876 = vmatprep.subr.bf16.mxu0 %v6394_v3  ;;  %4908 = vmatprep.subr.bf16.mxu1 %v6397_v8 }
 0x5b1   :  { %4878 = vmatpush1.bf16.msra.mxu0 %v6400_v17  ;;  %4910 = vmatpush1.bf16.msra.mxu1 %v6404_v22 }
 0x5b2   :  { %4880 = vmatprep.subr.bf16.mxu0 %v6406_v24  ;;  %4912 = vmatprep.subr.bf16.mxu1 %v7488_v37 }
 0x5b5   :  { %4882 = vmatpush1.bf16.msra.mxu0 %v7489_v12  ;;  %4914 = vmatpush1.bf16.msra.mxu1 %v7490_v21 }
 0x5b6   :  { %4884 = vmatprep.subr.bf16.mxu0 %v7491_v25  ;;  %4916 = vmatprep.subr.bf16.mxu1 %v7497_v51 }
 0x5b9   :  { %4886 = vmatpush1.bf16.msra.mxu0 %v7521_v50  ;;  %4918 = vmatpush1.bf16.msra.mxu1 %v7522_v38 }
 0x5ba   :  { %4920 = vmatprep.subr.bf16.mxu0 %v7523_v30  ;;  %4952 = vmatprep.subr.bf16.mxu1 %v7524_v42  ;;  %v1531_v42 = vld [vmem:[#allocation2 + $0xb0] sm:$0x3] }
 0x66f   :  { %v1599_v4 = vpop.f32.mrb[10].mxu0  ;;  %v1670_v5 = vpop.f32.mrb[10].mxu1 }
 0x670   :  { %v1675_v43 = vadd.f32 %v1599_v4, %v1529_v33  ;;  %v1601_v31 = vpop.f32.mrb[11].mxu0  ;;  %v1672_v62 = vpop.f32.mrb[11].mxu1  ;;  %v1677_v57 = vadd.f32 %v1670_v5, %v1531_v42 }
 0x671   :  { %v1676_v29 = vadd.f32 %v1601_v31, %v1530_v39  ;;  %v1678_v30 = vadd.f32 %v1672_v62, %v1532_v15 }
 0x672   :  { %v4351_v47 = vmul.f32 -1.442695, %v1675_v43 }
 0x673   :  { %v4352_v34 = vmul.f32 -1.442695, %v1676_v29  ;;  %v4353_v27 = vmul.f32 -1.442695, %v1678_v30 }
 0x674   :  { %5833 = vpow2.f32 %v4351_v47 }
 0x675   :  { %5835 = vpow2.f32 %v4352_v34 }
 0x676   :  { %5837 = vpow2.f32 %v4353_v27 }
 0x677   :  { %5839 = vtanh.f32 %v1677_v57 }
 0x67e   :  { %v5834_v35 = vpop.eup %5833 }
 0x67f   :  { %v5836_v38 = vpop.eup %5835  ;;  %v1682_v26 = vadd.f32 1.0, %v5834_v35 }
 0x680   :  { %v1688_v50 = vadd.f32 1.0, %v5836_v38  ;;  %v5838_v33 = vpop.eup %5837  ;;  %v524_v38 = vpop.permute.xlu0 %523 }
 0x681   :  { %5841 = vrcp.f32 %v1682_v26  ;;  %v5840_v4 = vpop.eup %5839  ;;  %v1695_v29 = vadd.f32 1.0, %v5838_v33  ;;  %v526_v30 = vmul.f32 %v524_v38, %v6539_v63  ;;  %v527_v42 = vmul.f32 %v524_v38, %v6542_v6 }
 0x682   :  { %5843 = vrcp.f32 %v1688_v50  ;;  %v512_v50 = vpop.permute.xlu1 %511  ;;  %v528_v27 = vmul.f32 %v524_v38, %v6545_v7 }
 0x683   :  { %5845 = vrcp.f32 %v1695_v29  ;;  %v514_v57 = vmul.f32 %v512_v50, %v6514_v44  ;;  %v516_v26 = vmul.f32 %v512_v50, %v6520_v48  ;;  %v517_v15 = vmul.f32 %v512_v50, %v6523_v49 }
 0x68b   :  { %v5842_v39 = vpop.eup %5841 }
 0x68c   :  { %v5844_v43 = vpop.eup %5843  ;;  %v1699_v31 = vmul.f32 %v5842_v39, %v5840_v4  ;;  %v520_v4 = vadd.f32 %v516_v26, %v6532_v60  ;;  %v521_v39 = vadd.f32 %v517_v15, %v6536_v61 }
 0x68d   :  { %v1698_v47 = vmul.f32 %v5844_v43, %v6826_v9  ;;  %v5846_v5 = vpop.eup %5845  ;;  %v515_v9 = vmul.f32 %v512_v50, %v6517_v46  ;;  %v7528_v43 = vld [vmem:[#allocation20_spill] sm:$0xff] }
 0x68f   :  { %v6883_v62 = vadd.f32 %v1699_v31, %v1698_v47  ;;  %v519_v33 = vadd.f32 %v515_v9, %v6529_v59  ;;  %v532_v47 = vadd.f32 %v528_v27, %v520_v4 }
 0x691   :  { %5847 = vtanh.f32 %v6883_v62  ;;  %v531_v29 = vadd.f32 %v527_v42, %v519_v33 }
 0x69b   :  { %v5848_v35 = vpop.eup %5847 }
 0x69c   :  { %v1702_v34 = vmul.f32 %v5848_v35, %v5846_v5 }
 0x69e   :  { %1703 = vst [vmem:[#allocation3 + $0x28] sm:$0x3] %v1702_v34  ;;  %1773 = vmatmul.mubr.f32.vlgmr.msra.gmra.mrb[12].mxu0 %v1702_v34  ;;  %1844 = vmatmul.mubr.f32.vlgmr.msra.gmra.mrb[12].mxu1 %v1702_v34 }
 0x69f   :  { %4922 = vmatpush1.bf16.msra.mxu0 %v6341_v10  ;;  %4954 = vmatpush1.bf16.msra.mxu1 %v6344_v14  ;;  %v529_v10 = vmul.f32 %v524_v38, %v6548_v11  ;;  %v518_v14 = vadd.f32 %v514_v57, %v6526_v55 }
 0x6a0   :  { %4924 = vmatprep.subr.bf16.mxu0 %v6348_v18  ;;  %4956 = vmatprep.subr.bf16.mxu1 %v6350_v19  ;;  %v536_v18 = vpop.permute.xlu1 %535 }
 0x6a1   :  { %1947 = vmatprep.mubr.f32.mxu0 %v6714_v56  ;;  %v530_v31 = vadd.f32 %v526_v30, %v518_v14  ;;  %v533_v5 = vadd.f32 %v529_v10, %v521_v39  ;;  %v538_v19 = vmul.f32 %v536_v18, %v6551_v13  ;;  %v539_v35 = vmul.f32 %v536_v18, %v6554_v0 }
 0x6a2   :  { %v540_v34 = vmul.f32 %v536_v18, %v6557_v16  ;;  %v541_v50 = vmul.f32 %v536_v18, %v6560_v20  ;;  %2018 = vmatprep.mubr.f32.mxu1 %v6714_v56 }
 0x6a3   :  { %4926 = vmatpush1.bf16.msra.mxu0 %v6353_v23  ;;  %4958 = vmatpush1.bf16.msra.mxu1 %v7528_v43  ;;  %v542_v23 = vadd.f32 %v538_v19, %v530_v31  ;;  %v543_v38 = vadd.f32 %v539_v35, %v531_v29  ;;  %v2062_v35 = vld [vmem:[#allocation8] sm:$0xff] }
 0x6a4   :  { %4928 = vmatprep.subr.bf16.mxu0 %v6359_v28  ;;  %4960 = vmatprep.subr.bf16.mxu1 %v6361_v32  ;;  %v544_v57 = vadd.f32 %v540_v34, %v532_v47  ;;  %v545_v9 = vadd.f32 %v541_v50, %v533_v5  ;;  %v7529_v28 = vld [vmem:[#allocation29_spill] sm:$0xff]  ;;  %v7530_v32 = vld [vmem:[#allocation30_spill] sm:$0xff]  ;;  %v2064_v50 = vld [vmem:[#allocation8 + $0x10] sm:$0xff] }
 0x6a5   :  { %546 = vst [vmem:[#allocation2 + $0xc0] sm:$0x3] %v542_v23  ;;  %547 = vst [vmem:[#allocation2 + $0xc8] sm:$0x3] %v543_v38  ;;  %v2066_v34 = vld [vmem:[#allocation8 + $0x20] sm:$0xff]  ;;  %v2068_v23 = vld [vmem:[#allocation8 + $0x30] sm:$0xff] }
 0x6a6   :  { %548 = vst [vmem:[#allocation2 + $0xd0] sm:$0x3] %v544_v57  ;;  %549 = vst [vmem:[#allocation2 + $0xd8] sm:$0x3] %v545_v9  ;;  %v2071_v38 = vld [vmem:[#allocation8 + $0x48] sm:$0xff]  ;;  %v2073_v9 = vld [vmem:[#allocation8 + $0x58] sm:$0xff] }
 0x6a7   :  { %4930 = vmatpush1.bf16.msra.mxu0 %v6364_v36  ;;  %4962 = vmatpush1.bf16.msra.mxu1 %v6368_v40  ;;  %v2063_v36 = vld [vmem:[#allocation8 + $0x8] sm:$0xff] }
 0x6a8   :  { %4932 = vmatprep.subr.bf16.mxu0 %v6370_v41  ;;  %4964 = vmatprep.subr.bf16.mxu1 %v6373_v45  ;;  %v2067_v40 = vld [vmem:[#allocation8 + $0x28] sm:$0xff]  ;;  %v2065_v41 = vld [vmem:[#allocation8 + $0x18] sm:$0xff] }
 0x6a9   :  { %v4983_v45 = vpack.c.bf16 %v2067_v40, %v2063_v36  ;;  %v2075_v57 = vld [vmem:[#allocation8 + $0x68] sm:$0xff]  ;;  %v4985_v40 = vpack.c.bf16 %v2066_v34, %v2062_v35  ;;  %v2101_v35 = vld [vmem:[#allocation8 + $0x138] sm:$0xff] }
 0x6ab   :  { %4934 = vmatpush1.bf16.msra.mxu0 %v6376_v52  ;;  %4966 = vmatpush1.bf16.msra.mxu1 %v6380_v53  ;;  %v2069_v52 = vld [vmem:[#allocation8 + $0x38] sm:$0xff] }
 0x6ac   :  { %4936 = vmatprep.subr.bf16.mxu0 %v6382_v54  ;;  %4968 = vmatprep.subr.bf16.mxu1 %v6385_v58  ;;  %v5015_v53 = vpack.c.bf16 %v2069_v52, %v2065_v41  ;;  %v6172_v54 = vmov 7   ;;  %v7531_v58 = vld [vmem:[#allocation22_spill] sm:$0xff]  ;;  %v5017_v41 = vpack.c.bf16 %v2068_v23, %v2064_v50 }
 0x6ad   :  { %5751 = vset.pattern.permute.xlu1 %v6172_v54  ;;  %5752 = vset.pattern.permute.xlu0 %v6172_v54  ;;  %v1707_v26 = vld [vmem:[#allocation2 + $0xd8] sm:$0x3]  ;;  %v1706_v30 = vld [vmem:[#allocation2 + $0xd0] sm:$0x3] }
 0x6ae   :  { %551 = vperm.xlu1 %5751, %v7531_v58   ;;  %v2074_v52 = vld [vmem:[#allocation8 + $0x60] sm:$0xff]  ;;  %v2072_v58 = vld [vmem:[#allocation8 + $0x50] sm:$0xff] }
 0x6af   :  { %4938 = vmatpush1.bf16.msra.mxu0 %v6388_v1  ;;  %4970 = vmatpush1.bf16.msra.mxu1 %v6392_v2  ;;  %v7532_v1 = vld [vmem:[#allocation25_spill] sm:$0xff]  ;;  %v7533_v2 = vld [vmem:[#allocation26_spill] sm:$0xff] }
 0x6b0   :  { %4940 = vmatprep.subr.bf16.mxu0 %v6394_v3  ;;  %4972 = vmatprep.subr.bf16.mxu1 %v6397_v8  ;;  %v1704_v3 = vld [vmem:[#allocation2 + $0xc0] sm:$0x3]  ;;  %v2094_v50 = vld [vmem:[#allocation8 + $0x100] sm:$0xff] }
 0x6b1   :  { %563 = vperm.xlu0 %5752, %v7532_v1   ;;  %v2076_v1 = vld [vmem:[#allocation8 + $0x70] sm:$0xff]  ;;  %v2098_v23 = vld [vmem:[#allocation8 + $0x120] sm:$0xff] }
 0x6b2   :  { %575 = vperm.xlu1 %5751, %v7533_v2   ;;  %v2079_v2 = vld [vmem:[#allocation8 + $0x88] sm:$0xff] }
 0x6b3   :  { %4942 = vmatpush1.bf16.msra.mxu0 %v6400_v17  ;;  %4974 = vmatpush1.bf16.msra.mxu1 %v6404_v22 }
 0x6b4   :  { %4944 = vmatprep.subr.bf16.mxu0 %v6406_v24  ;;  %4976 = vmatprep.subr.bf16.mxu1 %v7488_v37  ;;  %v1705_v24 = vld [vmem:[#allocation2 + $0xc8] sm:$0x3] }
 0x6b7   :  { %4946 = vmatpush1.bf16.msra.mxu0 %v7489_v12  ;;  %4978 = vmatpush1.bf16.msra.mxu1 %v7490_v21 }
 0x6b8   :  { %4948 = vmatprep.subr.bf16.mxu0 %v7491_v25  ;;  %4980 = vmatprep.subr.bf16.mxu1 %v7497_v51 }
 0x6bb   :  { %4950 = vmatpush1.bf16.msra.mxu0 %v7529_v28  ;;  %4982 = vmatpush1.bf16.msra.mxu1 %v7530_v32  ;;  %v2077_v28 = vld [vmem:[#allocation8 + $0x78] sm:$0xff] }
 0x6bc   :  { %4984 = vmatprep.subr.bf16.mxu0 %v4983_v45  ;;  %5016 = vmatprep.subr.bf16.mxu1 %v5015_v53  ;;  %v2070_v45 = vld [vmem:[#allocation8 + $0x40] sm:$0xff]  ;;  %v4987_v53 = vpack.c.bf16 %v2075_v57, %v2071_v38  ;;  %v5019_v54 = vpack.c.bf16 %v2077_v28, %v2073_v9  ;;  %v2096_v9 = vld [vmem:[#allocation8 + $0x110] sm:$0xff] }
 0x6bd   :  { %v2100_v28 = vld [vmem:[#allocation8 + $0x130] sm:$0xff] }
 0x771   :  { %v1774_v8 = vpop.f32.mrb[12].mxu0  ;;  %v1845_v17 = vpop.f32.mrb[12].mxu1 }
 0x772   :  { %v1850_v22 = vadd.f32 %v1774_v8, %v1704_v3  ;;  %v1776_v37 = vpop.f32.mrb[13].mxu0  ;;  %v1847_v12 = vpop.f32.mrb[13].mxu1  ;;  %v1852_v27 = vadd.f32 %v1845_v17, %v1706_v30  ;;  %v2083_v3 = vld [vmem:[#allocation8 + $0xa8] sm:$0xff]  ;;  %v2081_v8 = vld [vmem:[#allocation8 + $0x98] sm:$0xff] }
 0x773   :  { %v1851_v21 = vadd.f32 %v1776_v37, %v1705_v24  ;;  %v1853_v15 = vadd.f32 %v1847_v12, %v1707_v26  ;;  %v2085_v17 = vld [vmem:[#allocation8 + $0xb8] sm:$0xff]  ;;  %v5021_v24 = vpack.c.bf16 %v2076_v1, %v2072_v58  ;;  %v2078_v37 = vld [vmem:[#allocation8 + $0x80] sm:$0xff]  ;;  %v2084_v26 = vld [vmem:[#allocation8 + $0xb0] sm:$0xff] }
 0x774   :  { %v4354_v25 = vmul.f32 -1.442695, %v1850_v22  ;;  %v4989_v22 = vpack.c.bf16 %v2074_v52, %v2070_v45  ;;  %v2082_v12 = vld [vmem:[#allocation8 + $0xa0] sm:$0xff]  ;;  %v2091_v30 = vld [vmem:[#allocation8 + $0xe8] sm:$0xff]  ;;  %v5001_v45 = vpack.c.bf16 %v2098_v23, %v2094_v50  ;;  %v5033_v52 = vpack.c.bf16 %v2100_v28, %v2096_v9  ;;  %v2104_v1 = vld [vmem:[#allocation8 + $0x150] sm:$0xff]  ;;  %v552_v28 = vpop.permute.xlu1 %551 }
 0x775   :  { %v4355_v51 = vmul.f32 -1.442695, %v1851_v21  ;;  %v4356_v42 = vmul.f32 -1.442695, %v1853_v15  ;;  %v4991_v21 = vpack.c.bf16 %v2083_v3, %v2079_v2  ;;  %v2087_v15 = vld [vmem:[#allocation8 + $0xc8] sm:$0xff]  ;;  %v2108_v2 = vld [vmem:[#allocation8 + $0x170] sm:$0xff] }
 0x776   :  { %5849 = vpow2.f32 %v4354_v25  ;;  %v5023_v25 = vpack.c.bf16 %v2085_v17, %v2081_v8  ;;  %v2111_v3 = vld [vmem:[#allocation8 + $0x188] sm:$0xff]  ;;  %v2113_v17 = vld [vmem:[#allocation8 + $0x198] sm:$0xff]  ;;  %v2056_v50 = vld [vmem:[#allocation3 + $0x10] sm:$0xff] }
 0x777   :  { %5851 = vpow2.f32 %v4355_v51  ;;  %v2080_v51 = vld [vmem:[#allocation8 + $0x90] sm:$0xff]  ;;  %v2115_v8 = vld [vmem:[#allocation8 + $0x1a8] sm:$0xff] }
 0x778   :  { %5853 = vpow2.f32 %v4356_v42  ;;  %v2089_v42 = vld [vmem:[#allocation8 + $0xd8] sm:$0xff]  ;;  %v2057_v23 = vld [vmem:[#allocation3 + $0x18] sm:$0xff] }
 0x779   :  { %5855 = vtanh.f32 %v1852_v27  ;;  %v2093_v27 = vld [vmem:[#allocation8 + $0xf8] sm:$0xff] }
 0x780   :  { %v5850_v10 = vpop.eup %5849 }
 0x781   :  { %v5852_v14 = vpop.eup %5851  ;;  %v1857_v33 = vadd.f32 1.0, %v5850_v10  ;;  %v4993_v10 = vpack.c.bf16 %v2082_v12, %v2078_v37  ;;  %v5037_v37 = vpack.c.bf16 %v2108_v2, %v2104_v1  ;;  %v2110_v12 = vld [vmem:[#allocation8 + $0x180] sm:$0xff]  ;;  %v576_v2 = vpop.permute.xlu1 %575 }
 0x782   :  { %v1863_v4 = vadd.f32 1.0, %v5852_v14  ;;  %v5854_v39 = vpop.eup %5853  ;;  %v5025_v14 = vpack.c.bf16 %v2084_v26, %v2080_v51  ;;  %v2112_v26 = vld [vmem:[#allocation8 + $0x190] sm:$0xff] }
 0x783   :  { %5857 = vrcp.f32 %v1857_v33  ;;  %v5856_v18 = vpop.eup %5855  ;;  %v1870_v47 = vadd.f32 1.0, %v5854_v39  ;;  %v2086_v33 = vld [vmem:[#allocation8 + $0xc0] sm:$0xff]  ;;  %v4995_v39 = vpack.c.bf16 %v2091_v30, %v2087_v15  ;;  %v2116_v15 = vld [vmem:[#allocation8 + $0x1b0] sm:$0xff]  ;;  %v2119_v30 = vld [vmem:[#allocation8 + $0x1c8] sm:$0xff] }
 0x784   :  { %5859 = vrcp.f32 %v1863_v4  ;;  %v2090_v4 = vld [vmem:[#allocation8 + $0xe0] sm:$0xff] }
 0x785   :  { %5861 = vrcp.f32 %v1870_v47  ;;  %v2099_v47 = vld [vmem:[#allocation8 + $0x128] sm:$0xff]  ;;  %v4997_v34 = vpack.c.bf16 %v2090_v4, %v2086_v33  ;;  %v5041_v33 = vpack.c.bf16 %v2116_v15, %v2112_v26  ;;  %v2118_v4 = vld [vmem:[#allocation8 + $0x1c0] sm:$0xff] }
 0x786   :  { %v2415_v26 = vld [vmem:[#allocation9 + $0x48] sm:$0xff] }
 0x787   :  { %v2419_v15 = vld [vmem:[#allocation9 + $0x68] sm:$0xff] }
 0x78d   :  { %v5858_v43 = vpop.eup %5857 }
 0x78e   :  { %v5860_v31 = vpop.eup %5859  ;;  %v1874_v29 = vmul.f32 %v5858_v43, %v5856_v18  ;;  %v5027_v18 = vpack.c.bf16 %v2093_v27, %v2089_v42  ;;  %v2088_v43 = vld [vmem:[#allocation8 + $0xd0] sm:$0xff]  ;;  %v2123_v42 = vld [vmem:[#allocation8 + $0x1e8] sm:$0xff]  ;;  %v2121_v27 = vld [vmem:[#allocation8 + $0x1d8] sm:$0xff] }
 0x78f   :  { %v1873_v5 = vmul.f32 %v5860_v31, %v6883_v62  ;;  %v5862_v32 = vpop.eup %5861  ;;  %v2092_v31 = vld [vmem:[#allocation8 + $0xf0] sm:$0xff] }
 0x791   :  { %v6938_v19 = vadd.f32 %v1874_v29, %v1873_v5  ;;  %v2095_v29 = vld [vmem:[#allocation8 + $0x108] sm:$0xff]  ;;  %v2097_v5 = vld [vmem:[#allocation8 + $0x118] sm:$0xff] }
 0x792   :  { %v4999_v38 = vpack.c.bf16 %v2099_v47, %v2095_v29  ;;  %v5031_v57 = vpack.c.bf16 %v2101_v35, %v2097_v5  ;;  %v2124_v29 = vld [vmem:[#allocation8 + $0x1f0] sm:$0xff] }
 0x793   :  { %5863 = vtanh.f32 %v6938_v19  ;;  %v2054_v35 = vld [vmem:[#allocation3] sm:$0xff] }
 0x79d   :  { %v5864_v36 = vpop.eup %5863 }
 0x79e   :  { %v1877_v62 = vmul.f32 %v5864_v36, %v5862_v32  ;;  %v2103_v32 = vld [vmem:[#allocation8 + $0x148] sm:$0xff] }
 0x79f   :  { %v2107_v36 = vld [vmem:[#allocation8 + $0x168] sm:$0xff] }
 0x7a0   :  { %1878 = vst [vmem:[#allocation3 + $0x30] sm:$0x3] %v1877_v62  ;;  %1948 = vmatmul.mubr.f32.vlgmr.msra.gmra.mrb[14].mxu0 %v1877_v62  ;;  %2019 = vmatmul.mubr.f32.vlgmr.msra.gmra.mrb[14].mxu1 %v1877_v62  ;;  %v2102_v62 = vld [vmem:[#allocation8 + $0x140] sm:$0xff] }
 0x7a1   :  { %4986 = vmatpush1.bf16.msra.mxu0 %v4985_v40  ;;  %5018 = vmatpush1.bf16.msra.mxu1 %v5017_v41  ;;  %v2105_v40 = vld [vmem:[#allocation8 + $0x158] sm:$0xff] }
 0x7a2   :  { %4988 = vmatprep.subr.bf16.mxu0 %v4987_v53  ;;  %5020 = vmatprep.subr.bf16.mxu1 %v5019_v54  ;;  %v2109_v41 = vld [vmem:[#allocation8 + $0x178] sm:$0xff]  ;;  %v2106_v53 = vld [vmem:[#allocation8 + $0x160] sm:$0xff]  ;;  %v5003_v54 = vpack.c.bf16 %v2107_v36, %v2103_v32  ;;  %v564_v32 = vpop.permute.xlu0 %563  ;;  %v554_v36 = vmul.f32 %v552_v28, %v6514_v44 }
 0x7a3   :  { %2212 = vmatprep.mubr.f32.mxu0 %v6714_v56  ;;  %2325 = vmatprep.mubr.f32.mxu1 %v6714_v56  ;;  %v5029_v56 = vpack.c.bf16 %v2092_v31, %v2088_v43  ;;  %v5035_v58 = vpack.c.bf16 %v2109_v41, %v2105_v40  ;;  %v2122_v43 = vld [vmem:[#allocation8 + $0x1e0] sm:$0xff]  ;;  %v2120_v31 = vld [vmem:[#allocation8 + $0x1d0] sm:$0xff]  ;;  %v555_v40 = vmul.f32 %v552_v28, %v6517_v46 }
 0x7a4   :  { %v5013_v47 = vpack.c.bf16 %v2122_v43, %v2118_v4  ;;  %v5045_v5 = vpack.c.bf16 %v2124_v29, %v2120_v31  ;;  %v556_v41 = vmul.f32 %v552_v28, %v6520_v48  ;;  %v2416_v4 = vld [vmem:[#allocation9 + $0x50] sm:$0xff]  ;;  %v2423_v31 = vld [vmem:[#allocation9 + $0x88] sm:$0xff] }
 0x7a5   :  { %4990 = vmatpush1.bf16.msra.mxu0 %v4989_v22  ;;  %5022 = vmatpush1.bf16.msra.mxu1 %v5021_v24  ;;  %v2117_v22 = vld [vmem:[#allocation8 + $0x1b8] sm:$0xff]  ;;  %v5005_v24 = vpack.c.bf16 %v2106_v53, %v2102_v62  ;;  %v567_v62 = vmul.f32 %v564_v32, %v6542_v6  ;;  %v568_v53 = vmul.f32 %v564_v32, %v6545_v7  ;;  %v2427_v29 = vld [vmem:[#allocation9 + $0xa8] sm:$0xff] }
 0x7a6   :  { %4992 = vmatprep.subr.bf16.mxu0 %v4991_v21  ;;  %5024 = vmatprep.subr.bf16.mxu1 %v5023_v25  ;;  %v2114_v21 = vld [vmem:[#allocation8 + $0x1a0] sm:$0xff]  ;;  %v5007_v25 = vpack.c.bf16 %v2115_v8, %v2111_v3  ;;  %v5039_v51 = vpack.c.bf16 %v2117_v22, %v2113_v17  ;;  %v559_v1 = vadd.f32 %v555_v40, %v6529_v59  ;;  %v2433_v40 = vld [vmem:[#allocation9 + $0xd8] sm:$0xff] }
 0x7a7   :  { %v2060_v9 = vld [vmem:[#allocation3 + $0x30] sm:$0xff]  ;;  %v560_v44 = vadd.f32 %v556_v41, %v6532_v60  ;;  %v579_v6 = vmul.f32 %v576_v2, %v6554_v0  ;;  %v580_v7 = vmul.f32 %v576_v2, %v6557_v16  ;;  %v2407_v60 = vld [vmem:[#allocation9 + $0x8] sm:$0xff]  ;;  %v2413_v0 = vld [vmem:[#allocation9 + $0x38] sm:$0xff] }
 0x7a8   :  { %v571_v3 = vadd.f32 %v567_v62, %v559_v1  ;;  %v2437_v62 = vld [vmem:[#allocation9 + $0xf8] sm:$0xff]  ;;  %v2436_v1 = vld [vmem:[#allocation9 + $0xf0] sm:$0xff] }
 0x7a9   :  { %4994 = vmatpush1.bf16.msra.mxu0 %v4993_v10  ;;  %5026 = vmatpush1.bf16.msra.mxu1 %v5025_v14  ;;  %v2125_v10 = vld [vmem:[#allocation8 + $0x1f8] sm:$0xff]  ;;  %v5009_v14 = vpack.c.bf16 %v2114_v21, %v2110_v12  ;;  %v2410_v12 = vld [vmem:[#allocation9 + $0x20] sm:$0xff] }
 0x7aa   :  { %4996 = vmatprep.subr.bf16.mxu0 %v4995_v39  ;;  %5028 = vmatprep.subr.bf16.mxu1 %v5027_v18  ;;  %v5011_v39 = vpack.c.bf16 %v2123_v42, %v2119_v30  ;;  %v5043_v18 = vpack.c.bf16 %v2125_v10, %v2121_v27  ;;  %v583_v17 = vadd.f32 %v579_v6, %v571_v3  ;;  %v2417_v30 = vld [vmem:[#allocation9 + $0x58] sm:$0xff]  ;;  %v2414_v27 = vld [vmem:[#allocation9 + $0x40] sm:$0xff] }
 0x7ab   :  { %v6987_v42 = vpack.c.bf16 %v2419_v15, %v2415_v26  ;;  %v2418_v10 = vld [vmem:[#allocation9 + $0x60] sm:$0xff]  ;;  %v2452_v26 = vld [vmem:[#allocation9 + $0x170] sm:$0xff] }
 0x7ac   :  { %587 = vst [vmem:[#allocation2 + $0xe8] sm:$0x3] %v583_v17 }
 0x7ad   :  { %4998 = vmatpush1.bf16.msra.mxu0 %v4997_v34  ;;  %5030 = vmatpush1.bf16.msra.mxu1 %v5029_v56  ;;  %v6943_v34 = vld [vmem:[#allocation3 + $0x38] sm:$0xff]  ;;  %v2055_v56 = vld [vmem:[#allocation3 + $0x8] sm:$0xff] }
 0x7ae   :  { %5000 = vmatprep.subr.bf16.mxu0 %v4999_v38  ;;  %5032 = vmatprep.subr.bf16.mxu1 %v5031_v57  ;;  %v2058_v38 = vld [vmem:[#allocation3 + $0x20] sm:$0xff]  ;;  %v2059_v57 = vld [vmem:[#allocation3 + $0x28] sm:$0xff] }
 0x7b1   :  { %5002 = vmatpush1.bf16.msra.mxu0 %v5001_v45  ;;  %5034 = vmatpush1.bf16.msra.mxu1 %v5033_v52  ;;  %v557_v45 = vmul.f32 %v552_v28, %v6523_v49  ;;  %v566_v52 = vmul.f32 %v564_v32, %v6539_v63  ;;  %v572_v49 = vadd.f32 %v568_v53, %v560_v44 }
 0x7b2   :  { %5004 = vmatprep.subr.bf16.mxu0 %v5003_v54  ;;  %5036 = vmatprep.subr.bf16.mxu1 %v5035_v58  ;;  %v569_v54 = vmul.f32 %v564_v32, %v6548_v11  ;;  %v558_v58 = vadd.f32 %v554_v36, %v6526_v55  ;;  %v578_v63 = vmul.f32 %v576_v2, %v6551_v13  ;;  %v2406_v13 = vld [vmem:[#allocation9] sm:$0xff]  ;;  %v2431_v32 = vld [vmem:[#allocation9 + $0xc8] sm:$0xff] }
 0x7b3   :  { %v561_v46 = vadd.f32 %v557_v45, %v6536_v61  ;;  %v581_v11 = vmul.f32 %v576_v2, %v6560_v20  ;;  %v584_v59 = vadd.f32 %v580_v7, %v572_v49  ;;  %v2411_v61 = vld [vmem:[#allocation9 + $0x28] sm:$0xff]  ;;  %v6977_v21 = vpack.c.bf16 %v2410_v12, %v2406_v13  ;;  %v2408_v20 = vld [vmem:[#allocation9 + $0x10] sm:$0xff]  ;;  %v2430_v45 = vld [vmem:[#allocation9 + $0xc0] sm:$0xff] }
 0x7b4   :  { %v570_v48 = vadd.f32 %v566_v52, %v558_v58  ;;  %v2435_v36 = vld [vmem:[#allocation9 + $0xe8] sm:$0xff]  ;;  %v2434_v52 = vld [vmem:[#allocation9 + $0xe0] sm:$0xff]  ;;  %v2432_v58 = vld [vmem:[#allocation9 + $0xd0] sm:$0xff] }
 0x7b5   :  { %5006 = vmatpush1.bf16.msra.mxu0 %v5005_v24  ;;  %5038 = vmatpush1.bf16.msra.mxu1 %v5037_v37  ;;  %v573_v8 = vadd.f32 %v569_v54, %v561_v46  ;;  %588 = vst [vmem:[#allocation2 + $0xf0] sm:$0x3] %v584_v59  ;;  %v2409_v24 = vld [vmem:[#allocation9 + $0x18] sm:$0xff]  ;;  %v6975_v37 = vpack.c.bf16 %v2411_v61, %v2407_v60  ;;  %v2439_v46 = vld [vmem:[#allocation9 + $0x108] sm:$0xff]  ;;  %v2438_v49 = vld [vmem:[#allocation9 + $0x100] sm:$0xff] }
 0x7b6   :  { %5008 = vmatprep.subr.bf16.mxu0 %v5007_v25  ;;  %5040 = vmatprep.subr.bf16.mxu1 %v5039_v51  ;;  %v582_v55 = vadd.f32 %v578_v63, %v570_v48  ;;  %v6979_v16 = vpack.c.bf16 %v2413_v0, %v2409_v24  ;;  %v2412_v25 = vld [vmem:[#allocation9 + $0x30] sm:$0xff]  ;;  %v7010_v41 = vpack.c.bf16 %v2435_v36, %v2431_v32  ;;  %v2443_v2 = vld [vmem:[#allocation9 + $0x128] sm:$0xff]  ;;  %v2441_v48 = vld [vmem:[#allocation9 + $0x118] sm:$0xff] }
 0x7b7   :  { %v585_v22 = vadd.f32 %v581_v11, %v573_v8  ;;  %v6982_v51 = vpack.c.bf16 %v2412_v25, %v2408_v20  ;;  %v7013_v53 = vpack.c.bf16 %v2434_v52, %v2430_v45  ;;  %v7015_v54 = vpack.c.bf16 %v2437_v62, %v2433_v40  ;;  %v2442_v8 = vld [vmem:[#allocation9 + $0x120] sm:$0xff]  ;;  %v2445_v63 = vld [vmem:[#allocation9 + $0x138] sm:$0xff]  ;;  %v2440_v11 = vld [vmem:[#allocation9 + $0x110] sm:$0xff] }
 0x7b8   :  { %586 = vst [vmem:[#allocation2 + $0xe0] sm:$0x3] %v582_v55  ;;  %v7018_v44 = vpack.c.bf16 %v2436_v1, %v2432_v58  ;;  %v7022_v3 = vpack.c.bf16 %v2443_v2, %v2439_v46  ;;  %v7025_v6 = vpack.c.bf16 %v2442_v8, %v2438_v49  ;;  %v7027_v7 = vpack.c.bf16 %v2445_v63, %v2441_v48  ;;  %v2444_v55 = vld [vmem:[#allocation9 + $0x130] sm:$0xff]  ;;  %v2447_v59 = vld [vmem:[#allocation9 + $0x148] sm:$0xff]  ;;  %v2449_v60 = vld [vmem:[#allocation9 + $0x158] sm:$0xff] }
 0x7b9   :  { %5010 = vmatpush1.bf16.msra.mxu0 %v5009_v14  ;;  %5042 = vmatpush1.bf16.msra.mxu1 %v5041_v33  ;;  %589 = vst [vmem:[#allocation2 + $0xf8] sm:$0x3] %v585_v22  ;;  %v6989_v14 = vpack.c.bf16 %v2418_v10, %v2414_v27  ;;  %v2421_v33 = vld [vmem:[#allocation9 + $0x78] sm:$0xff]  ;;  %v7030_v17 = vpack.c.bf16 %v2444_v55, %v2440_v11  ;;  %v2451_v22 = vld [vmem:[#allocation9 + $0x168] sm:$0xff]  ;;  %v2446_v24 = vld [vmem:[#allocation9 + $0x140] sm:$0xff] }
 0x7ba   :  { %5012 = vmatprep.subr.bf16.mxu0 %v5011_v39  ;;  %5044 = vmatprep.subr.bf16.mxu1 %v5043_v18  ;;  %v2420_v39 = vld [vmem:[#allocation9 + $0x70] sm:$0xff]  ;;  %v6992_v18 = vpack.c.bf16 %v2421_v33, %v2417_v30  ;;  %v7034_v61 = vpack.c.bf16 %v2451_v22, %v2447_v59  ;;  %v2450_v13 = vld [vmem:[#allocation9 + $0x160] sm:$0xff]  ;;  %v2453_v12 = vld [vmem:[#allocation9 + $0x178] sm:$0xff] }
 0x7bb   :  { %v6994_v43 = vpack.c.bf16 %v2420_v39, %v2416_v4  ;;  %v7037_v0 = vpack.c.bf16 %v2450_v13, %v2446_v24  ;;  %v7039_v20 = vpack.c.bf16 %v2453_v12, %v2449_v60  ;;  %v2448_v25 = vld [vmem:[#allocation9 + $0x150] sm:$0xff]  ;;  %v2455_v30 = vld [vmem:[#allocation9 + $0x188] sm:$0xff]  ;;  %v2457_v10 = vld [vmem:[#allocation9 + $0x198] sm:$0xff] }
 0x7bc   :  { %v7042_v15 = vpack.c.bf16 %v2452_v26, %v2448_v25  ;;  %v2459_v27 = vld [vmem:[#allocation9 + $0x1a8] sm:$0xff]  ;;  %v2454_v4 = vld [vmem:[#allocation9 + $0x180] sm:$0xff]  ;;  %v2465_v32 = vld [vmem:[#allocation9 + $0x1d8] sm:$0xff] }
 0x7bd   :  { %5014 = vmatpush1.bf16.msra.mxu0 %v5013_v47  ;;  %5046 = vmatpush1.bf16.msra.mxu1 %v5045_v5  ;;  %v2425_v47 = vld [vmem:[#allocation9 + $0x98] sm:$0xff]  ;;  %v6998_v5 = vpack.c.bf16 %v2427_v29, %v2423_v31  ;;  %v7046_v33 = vpack.c.bf16 %v2459_v27, %v2455_v30  ;;  %v2458_v39 = vld [vmem:[#allocation9 + $0x1a0] sm:$0xff]  ;;  %v2464_v1 = vld [vmem:[#allocation9 + $0x1d0] sm:$0xff] }
 0x7be   :  { %5048 = vmatprep.subr.bf16.mxu0 %v6975_v37  ;;  %5080 = vmatprep.subr.bf16.mxu1 %v6979_v16  ;;  %v2461_v31 = vld [vmem:[#allocation9 + $0x1b8] sm:$0xff]  ;;  %v7049_v29 = vpack.c.bf16 %v2458_v39, %v2454_v4  ;;  %v2462_v40 = vld [vmem:[#allocation9 + $0x1c0] sm:$0xff]  ;;  %v2468_v46 = vld [vmem:[#allocation9 + $0x1f0] sm:$0xff] }
 0x7bf   :  { %v2466_v45 = vld [vmem:[#allocation9 + $0x1e0] sm:$0xff]  ;;  %v2469_v52 = vld [vmem:[#allocation9 + $0x1f8] sm:$0xff]  ;;  %v7066_v2 = vpack.c.bf16 %v2468_v46, %v2464_v1  ;;  %v1879_v48 = vld [vmem:[#allocation2 + $0xe0] sm:$0x3] }
 0x7c0   :  { %2213 = vmatmul.mubr.f32.vlgmr.msra.gmra.mrb[16].mxu0 %v2054_v35  ;;  %2326 = vmatmul.mubr.f32.vlgmr.msra.gmra.mrb[16].mxu1 %v2054_v35  ;;  %v2422_v35 = vld [vmem:[#allocation9 + $0x80] sm:$0xff]  ;;  %v7061_v62 = vpack.c.bf16 %v2466_v45, %v2462_v40  ;;  %v7063_v58 = vpack.c.bf16 %v2469_v52, %v2465_v32  ;;  %v1880_v11 = vld [vmem:[#allocation2 + $0xe8] sm:$0x3]  ;;  %v1882_v13 = vld [vmem:[#allocation2 + $0xf8] sm:$0x3] }
 0x7c1   :  { %2218 = vmatprep.mubr.f32.mxu0 %v6943_v34  ;;  %2331 = vmatprep.mubr.f32.mxu1 %v6943_v34  ;;  %v1881_v25 = vld [vmem:[#allocation2 + $0xf0] sm:$0x3]  ;;  %v7534_v45 = vld [vmem:[#allocation32_spill] sm:$0xff]  ;;  %v7535_v1 = vld [vmem:[#allocation34_spill] sm:$0xff] }
 0x7c2   :  { %5050 = vmatpush1.bf16.msra.mxu0 %v6977_v21  ;;  %5082 = vmatpush1.bf16.msra.mxu1 %v6982_v51 }
 0x7c3   :  { %5052 = vmatprep.subr.bf16.mxu0 %v6987_v42  ;;  %5084 = vmatprep.subr.bf16.mxu1 %v6992_v18 }
 0x7c4   :  { %2219 = vmatmul.mubr.f32.gmra.mrb[18].mxu0 %v2055_v56  ;;  %2332 = vmatmul.mubr.f32.gmra.mrb[18].mxu1 %v2055_v56  ;;  %v2426_v56 = vld [vmem:[#allocation9 + $0xa0] sm:$0xff] }
 0x7c5   :  { %2224 = vmatprep.mubr.f32.mxu0 %v6943_v34  ;;  %2337 = vmatprep.mubr.f32.mxu1 %v6943_v34 }
 0x7c6   :  { %5054 = vmatpush1.bf16.msra.mxu0 %v6989_v14  ;;  %5086 = vmatpush1.bf16.msra.mxu1 %v6994_v43 }
 0x7c7   :  { %5056 = vmatprep.subr.bf16.mxu0 %v6998_v5 }
 0x7c8   :  { %2225 = vmatmul.mubr.f32.gmra.mrb[20].mxu0 %v2056_v50  ;;  %2338 = vmatmul.mubr.f32.gmra.mrb[20].mxu1 %v2056_v50  ;;  %v2429_v50 = vld [vmem:[#allocation9 + $0xb8] sm:$0xff] }
 0x7c9   :  { %2230 = vmatprep.mubr.f32.mxu0 %v6943_v34  ;;  %2343 = vmatprep.mubr.f32.mxu1 %v6943_v34 }
 0x7cc   :  { %2231 = vmatmul.mubr.f32.gmra.mrb[22].mxu0 %v2057_v23  ;;  %2344 = vmatmul.mubr.f32.gmra.mrb[22].mxu1 %v2057_v23  ;;  %v7001_v23 = vpack.c.bf16 %v2426_v56, %v2422_v35  ;;  %v2456_v35 = vld [vmem:[#allocation9 + $0x190] sm:$0xff] }
 0x7cd   :  { %2236 = vmatprep.mubr.f32.mxu0 %v6943_v34  ;;  %2349 = vmatprep.mubr.f32.mxu1 %v6943_v34  ;;  %v2460_v56 = vld [vmem:[#allocation9 + $0x1b0] sm:$0xff] }
 0x7ce   :  { %5058 = vmatpush1.bf16.msra.mxu0 %v7001_v23 }
 0x7cf   :  { %5060 = vmatprep.subr.bf16.mxu0 %v7010_v41 }
 0x7d0   :  { %2237 = vmatmul.mubr.f32.gmra.mrb[24].mxu0 %v2058_v38  ;;  %2350 = vmatmul.mubr.f32.gmra.mrb[24].mxu1 %v2058_v38  ;;  %v7003_v38 = vpack.c.bf16 %v2429_v50, %v2425_v47  ;;  %v7051_v47 = vpack.c.bf16 %v2461_v31, %v2457_v10  ;;  %v7054_v50 = vpack.c.bf16 %v2460_v56, %v2456_v35  ;;  %v2126_v35 = vld [vmem:[%s7423_s10] sm:$0xf] }
 0x7d1   :  { %2242 = vmatprep.mubr.f32.mxu0 %v6943_v34  ;;  %2355 = vmatprep.mubr.f32.mxu1 %v6943_v34  ;;  %v7077_v52 = vrot.slane %v2126_v35, %v7534_v45  ;;  %v7080_v46 = vrot.slane %v2126_v35, %v7535_v1 }
 0x7d2   :  { %5088 = vmatprep.subr.bf16.mxu1 %v7003_v38  ;;  %5062 = vmatpush1.bf16.msra.mxu0 %v7013_v53 }
 0x7d3   :  { %5064 = vmatprep.subr.bf16.mxu0 %v7022_v3 }
 0x7d4   :  { %2243 = vmatmul.mubr.f32.gmra.mrb[26].mxu0 %v2059_v57  ;;  %2356 = vmatmul.mubr.f32.gmra.mrb[26].mxu1 %v2059_v57  ;;  %v2424_v57 = vld [vmem:[#allocation9 + $0x90] sm:$0xff] }
 0x7d5   :  { %2248 = vmatprep.mubr.f32.mxu0 %v6943_v34  ;;  %2361 = vmatprep.mubr.f32.mxu1 %v6943_v34 }
 0x7d6   :  { %5066 = vmatpush1.bf16.msra.mxu0 %v7025_v6 }
 0x7d7   :  { %5068 = vmatprep.subr.bf16.mxu0 %v7034_v61 }
 0x7d8   :  { %2249 = vmatmul.mubr.f32.gmra.mrb[28].mxu0 %v2060_v9  ;;  %2362 = vmatmul.mubr.f32.gmra.mrb[28].mxu1 %v2060_v9  ;;  %v2428_v9 = vld [vmem:[#allocation9 + $0xb0] sm:$0xff] }
 0x7d9   :  { %2254 = vmatprep.mubr.f32.mxu0 %v6943_v34  ;;  %2367 = vmatprep.mubr.f32.mxu1 %v6943_v34  ;;  %v7006_v28 = vpack.c.bf16 %v2428_v9, %v2424_v57  ;;  %v2463_v57 = vld [vmem:[#allocation9 + $0x1c8] sm:$0xff] }
 0x7da   :  { %5070 = vmatpush1.bf16.msra.mxu0 %v7037_v0  ;;  %v2467_v9 = vld [vmem:[#allocation9 + $0x1e8] sm:$0xff] }
 0x7db   :  { %5090 = vmatpush1.bf16.msra.mxu1 %v7006_v28  ;;  %5072 = vmatprep.subr.bf16.mxu0 %v7046_v33  ;;  %v7058_v36 = vpack.c.bf16 %v2467_v9, %v2463_v57 }
 0x7dc   :  { %5092 = vmatprep.subr.bf16.mxu1 %v7015_v54 }
 0x7de   :  { %5074 = vmatpush1.bf16.msra.mxu0 %v7049_v29 }
 0x7df   :  { %5094 = vmatpush1.bf16.msra.mxu1 %v7018_v44  ;;  %5076 = vmatprep.subr.bf16.mxu0 %v7058_v36 }
 0x7e0   :  { %5096 = vmatprep.subr.bf16.mxu1 %v7027_v7 }
 0x7e2   :  { %5078 = vmatpush1.bf16.msra.mxu0 %v7061_v62 }
 0x7e3   :  { %5098 = vmatpush1.bf16.msra.mxu1 %v7030_v17  ;;  %5112 = vmatprep.subr.bf16.mxu0 %v6975_v37 }
 0x7e4   :  { %5100 = vmatprep.subr.bf16.mxu1 %v7039_v20 }
 0x7e7   :  { %5102 = vmatpush1.bf16.msra.mxu1 %v7042_v15 }
 0x7e8   :  { %5104 = vmatprep.subr.bf16.mxu1 %v7051_v47 }
 0x7eb   :  { %5106 = vmatpush1.bf16.msra.mxu1 %v7054_v50 }
 0x7ec   :  { %5108 = vmatprep.subr.bf16.mxu1 %v7063_v58 }
 0x7ef   :  { %5110 = vmatpush1.bf16.msra.mxu1 %v7066_v2 }
 0x7f0   :  { %5144 = vmatprep.subr.bf16.mxu1 %v6979_v16 }
 0x873   :  { %v1949_v49 = vpop.f32.mrb[14].mxu0  ;;  %v2020_v8 = vpop.f32.mrb[14].mxu1 }
 0x874   :  { %v2025_v63 = vadd.f32 %v1949_v49, %v1879_v48  ;;  %v1951_v55 = vpop.f32.mrb[15].mxu0  ;;  %v2022_v59 = vpop.f32.mrb[15].mxu1  ;;  %v2027_v30 = vadd.f32 %v2020_v8, %v1881_v25  ;;  %v7536_v49 = vld [vmem:[#allocation33_spill] sm:$0xff] }
 0x875   :  { %v2026_v22 = vadd.f32 %v1951_v55, %v1880_v11  ;;  %v2028_v12 = vadd.f32 %v2022_v59, %v1882_v13  ;;  %v7084_v8 = vrot.slane %v2126_v35, %v7536_v49 }
 0x876   :  { %v4357_v60 = vmul.f32 -1.442695, %v2025_v63  ;;  %v7537_v63 = vld [vmem:[#allocation31_spill] sm:$0xff] }
 0x877   :  { %v4358_v24 = vmul.f32 -1.442695, %v2026_v22  ;;  %v4359_v26 = vmul.f32 -1.442695, %v2028_v12  ;;  %v7538_v11 = vsub.s32 3, %v7537_v63 }
 0x878   :  { %5865 = vpow2.f32 %v4357_v60 }
 0x879   :  { %5867 = vpow2.f32 %v4358_v24  ;;  %v7088_v55 = vrot.slane %v2126_v35, %v7538_v11 }
 0x87a   :  { %5869 = vpow2.f32 %v4359_v26 }
 0x87b   :  { %5871 = vtanh.f32 %v2027_v30 }
 0x882   :  { %v5866_v27 = vpop.eup %5865 }
 0x883   :  { %v5868_v10 = vpop.eup %5867  ;;  %v2032_v4 = vadd.f32 1.0, %v5866_v27 }
 0x884   :  { %v2038_v39 = vadd.f32 1.0, %v5868_v10  ;;  %v5870_v31 = vpop.eup %5869 }
 0x885   :  { %5873 = vrcp.f32 %v2032_v4  ;;  %v5872_v56 = vpop.eup %5871  ;;  %v2045_v40 = vadd.f32 1.0, %v5870_v31 }
 0x886   :  { %5875 = vrcp.f32 %v2038_v39 }
 0x887   :  { %5877 = vrcp.f32 %v2045_v40 }
 0x88f   :  { %v5874_v57 = vpop.eup %5873 }
 0x890   :  { %v5876_v9 = vpop.eup %5875  ;;  %v2049_v32 = vmul.f32 %v5874_v57, %v5872_v56 }
 0x891   :  { %v2048_v48 = vmul.f32 %v5876_v9, %v6938_v19 }
 0x893   :  { %v2050_v59 = vadd.f32 %v2049_v32, %v2048_v48  ;;  %v2214_v22 = vpop.f32.mrb[16].mxu0  ;;  %v2327_v60 = vpop.f32.mrb[16].mxu1 }
 0x894   :  { %v2215_v24 = vadd.f32 %v2214_v22, %v7077_v52  ;;  %v2328_v13 = vadd.f32 %v2327_v60, %v7080_v46  ;;  %v2216_v12 = vpop.f32.mrb[17].mxu0  ;;  %v2329_v25 = vpop.f32.mrb[17].mxu1 }
 0x895   :  { %5879 = vtanh.f32 %v2050_v59  ;;  %v2217_v19 = vadd.f32 %v2216_v12, %v7084_v8  ;;  %v2330_v26 = vadd.f32 %v2329_v25, %v7088_v55  ;;  %v5878_v60 = vpop.eup %5877 }
 0x896   :  { %2374 = vst [vmem:[#allocation2] sm:$0xff] %v2215_v24  ;;  %2376 = vst [vmem:[#allocation2 + $0x10] sm:$0xff] %v2328_v13 }
 0x897   :  { %2375 = vst [vmem:[#allocation2 + $0x8] sm:$0xff] %v2217_v19  ;;  %2377 = vst [vmem:[#allocation2 + $0x18] sm:$0xff] %v2330_v26  ;;  %v2220_v30 = vpop.f32.mrb[18].mxu0  ;;  %v2333_v27 = vpop.f32.mrb[18].mxu1 }
 0x898   :  { %v2221_v10 = vadd.f32 %v2220_v30, %v7077_v52  ;;  %v2334_v4 = vadd.f32 %v2333_v27, %v7080_v46  ;;  %v2222_v39 = vpop.f32.mrb[19].mxu0  ;;  %v2335_v31 = vpop.f32.mrb[19].mxu1 }
 0x899   :  { %v2223_v35 = vadd.f32 %v2222_v39, %v7084_v8  ;;  %v2336_v56 = vadd.f32 %v2335_v31, %v7088_v55 }
 0x89a   :  { %2378 = vst [vmem:[#allocation2 + $0x20] sm:$0xff] %v2221_v10  ;;  %2380 = vst [vmem:[#allocation2 + $0x30] sm:$0xff] %v2334_v4 }
 0x89b   :  { %2379 = vst [vmem:[#allocation2 + $0x28] sm:$0xff] %v2223_v35  ;;  %2381 = vst [vmem:[#allocation2 + $0x38] sm:$0xff] %v2336_v56  ;;  %v2226_v57 = vpop.f32.mrb[20].mxu0  ;;  %v2339_v9 = vpop.f32.mrb[20].mxu1 }
 0x89c   :  { %v2227_v32 = vadd.f32 %v2226_v57, %v7077_v52  ;;  %v2340_v40 = vadd.f32 %v2339_v9, %v7080_v46  ;;  %v2228_v48 = vpop.f32.mrb[21].mxu0  ;;  %v2341_v11 = vpop.f32.mrb[21].mxu1 }
 0x89d   :  { %v2229_v59 = vadd.f32 %v2228_v48, %v7084_v8  ;;  %v2342_v22 = vadd.f32 %v2341_v11, %v7088_v55 }
 0x89e   :  { %2382 = vst [vmem:[#allocation2 + $0x40] sm:$0xff] %v2227_v32  ;;  %2384 = vst [vmem:[#allocation2 + $0x50] sm:$0xff] %v2340_v40 }
 0x89f   :  { %v5880_v24 = vpop.eup %5879  ;;  %2383 = vst [vmem:[#allocation2 + $0x48] sm:$0xff] %v2229_v59  ;;  %2385 = vst [vmem:[#allocation2 + $0x58] sm:$0xff] %v2342_v22  ;;  %v2232_v13 = vpop.f32.mrb[22].mxu0 }
 0x8a0   :  { %v2345_v12 = vpop.f32.mrb[22].mxu1  ;;  %v2052_v25 = vmul.f32 %v5880_v24, %v5878_v60  ;;  %v2233_v19 = vadd.f32 %v2232_v13, %v7077_v52  ;;  %v2234_v30 = vpop.f32.mrb[23].mxu0 }
 0x8a1   :  { %v2346_v26 = vadd.f32 %v2345_v12, %v7080_v46  ;;  %v2347_v27 = vpop.f32.mrb[23].mxu1  ;;  %v2235_v10 = vadd.f32 %v2234_v30, %v7084_v8 }
 0x8a2   :  { %v2348_v4 = vadd.f32 %v2347_v27, %v7088_v55  ;;  %2053 = vst [vmem:[#allocation3 + $0x38] sm:$0x3] %v2052_v25  ;;  %2386 = vst [vmem:[#allocation2 + $0x60] sm:$0xff] %v2233_v19 }
 0x8a3   :  { %2388 = vst [vmem:[#allocation2 + $0x70] sm:$0xff] %v2346_v26  ;;  %2387 = vst [vmem:[#allocation2 + $0x68] sm:$0xff] %v2235_v10  ;;  %v2238_v39 = vpop.f32.mrb[24].mxu0  ;;  %v2351_v31 = vpop.f32.mrb[24].mxu1 }
 0x8a4   :  { %2389 = vst [vmem:[#allocation2 + $0x78] sm:$0xff] %v2348_v4  ;;  %v2239_v35 = vadd.f32 %v2238_v39, %v7077_v52  ;;  %v2352_v56 = vadd.f32 %v2351_v31, %v7080_v46  ;;  %v2240_v57 = vpop.f32.mrb[25].mxu0  ;;  %v2353_v9 = vpop.f32.mrb[25].mxu1 }
 0x8a5   :  { %v2241_v32 = vadd.f32 %v2240_v57, %v7084_v8  ;;  %v2354_v40 = vadd.f32 %v2353_v9, %v7088_v55 }
 0x8a6   :  { %2390 = vst [vmem:[#allocation2 + $0x80] sm:$0xff] %v2239_v35  ;;  %2392 = vst [vmem:[#allocation2 + $0x90] sm:$0xff] %v2352_v56 }
 0x8a7   :  { %2391 = vst [vmem:[#allocation2 + $0x88] sm:$0xff] %v2241_v32  ;;  %2393 = vst [vmem:[#allocation2 + $0x98] sm:$0xff] %v2354_v40  ;;  %v2244_v48 = vpop.f32.mrb[26].mxu0  ;;  %v2357_v11 = vpop.f32.mrb[26].mxu1 }
 0x8a8   :  { %v2245_v59 = vadd.f32 %v2244_v48, %v7077_v52  ;;  %v2358_v22 = vadd.f32 %v2357_v11, %v7080_v46  ;;  %v2246_v60 = vpop.f32.mrb[27].mxu0  ;;  %v2359_v24 = vpop.f32.mrb[27].mxu1 }
 0x8a9   :  { %v2247_v13 = vadd.f32 %v2246_v60, %v7084_v8  ;;  %v2360_v12 = vadd.f32 %v2359_v24, %v7088_v55  ;;  %v2061_v25 = vld [vmem:[#allocation3 + $0x38] sm:$0xff] }
 0x8aa   :  { %2394 = vst [vmem:[#allocation2 + $0xa0] sm:$0xff] %v2245_v59  ;;  %2396 = vst [vmem:[#allocation2 + $0xb0] sm:$0xff] %v2358_v22  ;;  %2255 = vmatmul.mubr.f32.gmra.mrb[30].mxu0 %v2061_v25  ;;  %2368 = vmatmul.mubr.f32.gmra.mrb[30].mxu1 %v2061_v25  ;;  %v2470_v59 = vld [vmem:[#allocation2] sm:$0x3] }
 0x8ab   :  { %2395 = vst [vmem:[#allocation2 + $0xa8] sm:$0xff] %v2247_v13  ;;  %2397 = vst [vmem:[#allocation2 + $0xb8] sm:$0xff] %v2360_v12  ;;  %v2250_v19 = vpop.f32.mrb[28].mxu0  ;;  %v2363_v26 = vpop.f32.mrb[28].mxu1  ;;  %2538 = vmatprep.mubr.f32.mxu0 %v6943_v34  ;;  %2609 = vmatprep.mubr.f32.mxu1 %v6943_v34  ;;  %v2471_v13 = vld [vmem:[#allocation2 + $0x8] sm:$0x3] }
 0x8ac   :  { %v2251_v30 = vadd.f32 %v2250_v19, %v7077_v52  ;;  %v2364_v27 = vadd.f32 %v2363_v26, %v7080_v46  ;;  %v2252_v10 = vpop.f32.mrb[29].mxu0  ;;  %v2365_v4 = vpop.f32.mrb[29].mxu1  ;;  %v2473_v26 = vld [vmem:[#allocation2 + $0x18] sm:$0x3] }
 0x8ad   :  { %v2253_v39 = vadd.f32 %v2252_v10, %v7084_v8  ;;  %v2366_v31 = vadd.f32 %v2365_v4, %v7088_v55 }
 0x8ae   :  { %2398 = vst [vmem:[#allocation2 + $0xc0] sm:$0xff] %v2251_v30  ;;  %2400 = vst [vmem:[#allocation2 + $0xd0] sm:$0xff] %v2364_v27  ;;  %2539 = vmatmul.mubr.f32.vlgmr.msra.gmra.mrb[32].mxu0 %v6943_v34  ;;  %2610 = vmatmul.mubr.f32.vlgmr.msra.gmra.mrb[32].mxu1 %v6943_v34  ;;  %v2472_v30 = vld [vmem:[#allocation2 + $0x10] sm:$0x3] }
 0x8af   :  { %2399 = vst [vmem:[#allocation2 + $0xc8] sm:$0xff] %v2253_v39  ;;  %2401 = vst [vmem:[#allocation2 + $0xd8] sm:$0xff] %v2366_v31  ;;  %5114 = vmatpush1.bf16.msra.mxu0 %v6977_v21  ;;  %5146 = vmatpush1.bf16.msra.mxu1 %v6982_v51 }
 0x8b0   :  { %5116 = vmatprep.subr.bf16.mxu0 %v6987_v42  ;;  %5148 = vmatprep.subr.bf16.mxu1 %v6992_v18 }
 0x8b1   :  { %2712 = vmatprep.mubr.f32.mxu0 %v6943_v34  ;;  %2783 = vmatprep.mubr.f32.mxu1 %v6943_v34 }
 0x8b3   :  { %5118 = vmatpush1.bf16.msra.mxu0 %v6989_v14  ;;  %5150 = vmatpush1.bf16.msra.mxu1 %v6994_v43 }
 0x8b4   :  { %5120 = vmatprep.subr.bf16.mxu0 %v6998_v5  ;;  %5152 = vmatprep.subr.bf16.mxu1 %v7003_v38 }
 0x8b7   :  { %5122 = vmatpush1.bf16.msra.mxu0 %v7001_v23  ;;  %5154 = vmatpush1.bf16.msra.mxu1 %v7006_v28 }
 0x8b8   :  { %5124 = vmatprep.subr.bf16.mxu0 %v7010_v41  ;;  %5156 = vmatprep.subr.bf16.mxu1 %v7015_v54 }
 0x8bb   :  { %5126 = vmatpush1.bf16.msra.mxu0 %v7013_v53  ;;  %5158 = vmatpush1.bf16.msra.mxu1 %v7018_v44 }
 0x8bc   :  { %5128 = vmatprep.subr.bf16.mxu0 %v7022_v3  ;;  %5160 = vmatprep.subr.bf16.mxu1 %v7027_v7 }
 0x8bf   :  { %5130 = vmatpush1.bf16.msra.mxu0 %v7025_v6  ;;  %5162 = vmatpush1.bf16.msra.mxu1 %v7030_v17 }
 0x8c0   :  { %5132 = vmatprep.subr.bf16.mxu0 %v7034_v61  ;;  %5164 = vmatprep.subr.bf16.mxu1 %v7039_v20 }
 0x8c3   :  { %5134 = vmatpush1.bf16.msra.mxu0 %v7037_v0  ;;  %5166 = vmatpush1.bf16.msra.mxu1 %v7042_v15 }
 0x8c4   :  { %5136 = vmatprep.subr.bf16.mxu0 %v7046_v33  ;;  %5168 = vmatprep.subr.bf16.mxu1 %v7051_v47 }
 0x8c7   :  { %5138 = vmatpush1.bf16.msra.mxu0 %v7049_v29  ;;  %5170 = vmatpush1.bf16.msra.mxu1 %v7054_v50 }
 0x8c8   :  { %5140 = vmatprep.subr.bf16.mxu0 %v7058_v36  ;;  %5172 = vmatprep.subr.bf16.mxu1 %v7063_v58 }
 0x8cb   :  { %5142 = vmatpush1.bf16.msra.mxu0 %v7061_v62  ;;  %5174 = vmatpush1.bf16.msra.mxu1 %v7066_v2 }
 0x8cc   :  { %5176 = vmatprep.subr.bf16.mxu0 %v6975_v37  ;;  %5208 = vmatprep.subr.bf16.mxu1 %v6979_v16 }
 0x97d   :  { %v2256_v35 = vpop.f32.mrb[30].mxu0  ;;  %v2369_v56 = vpop.f32.mrb[30].mxu1 }
 0x97e   :  { %v2257_v57 = vadd.f32 %v2256_v35, %v7077_v52  ;;  %v2370_v9 = vadd.f32 %v2369_v56, %v7080_v46  ;;  %v2258_v32 = vpop.f32.mrb[31].mxu0  ;;  %v2371_v40 = vpop.f32.mrb[31].mxu1 }
 0x97f   :  { %v2259_v48 = vadd.f32 %v2258_v32, %v7084_v8  ;;  %v2372_v11 = vadd.f32 %v2371_v40, %v7088_v55 }
 0x980   :  { %2402 = vst [vmem:[#allocation2 + $0xe0] sm:$0xff] %v2257_v57  ;;  %2404 = vst [vmem:[#allocation2 + $0xf0] sm:$0xff] %v2370_v9 }
 0x981   :  { %2403 = vst [vmem:[#allocation2 + $0xe8] sm:$0xff] %v2259_v48  ;;  %2405 = vst [vmem:[#allocation2 + $0xf8] sm:$0xff] %v2372_v11  ;;  %v2540_v22 = vpop.f32.mrb[32].mxu0  ;;  %v2611_v60 = vpop.f32.mrb[32].mxu1 }
 0x982   :  { %v2616_v24 = vadd.f32 %v2540_v22, %v2470_v59  ;;  %v2542_v12 = vpop.f32.mrb[33].mxu0  ;;  %v2613_v25 = vpop.f32.mrb[33].mxu1  ;;  %v2618_v27 = vadd.f32 %v2611_v60, %v2472_v30 }
 0x983   :  { %v2617_v52 = vadd.f32 %v2542_v12, %v2471_v13  ;;  %v2619_v8 = vadd.f32 %v2613_v25, %v2473_v26 }
 0x984   :  { %v4360_v19 = vmul.f32 -1.442695, %v2616_v24  ;;  %v2644_v24 = vld [vmem:[#allocation2 + $0x20] sm:$0x3] }
 0x985   :  { %v4361_v46 = vmul.f32 -1.442695, %v2617_v52  ;;  %v4362_v55 = vmul.f32 -1.442695, %v2619_v8  ;;  %v2645_v52 = vld [vmem:[#allocation2 + $0x28] sm:$0x3] }
 0x986   :  { %5881 = vpow2.f32 %v4360_v19 }
 0x987   :  { %5883 = vpow2.f32 %v4361_v46 }
 0x988   :  { %5885 = vpow2.f32 %v4362_v55  ;;  %v2647_v55 = vld [vmem:[#allocation2 + $0x38] sm:$0x3] }
 0x989   :  { %5887 = vtanh.f32 %v2618_v27 }
 0x990   :  { %v5882_v10 = vpop.eup %5881 }
 0x991   :  { %v5884_v4 = vpop.eup %5883  ;;  %v2623_v39 = vadd.f32 1.0, %v5882_v10  ;;  %v2646_v10 = vld [vmem:[#allocation2 + $0x30] sm:$0x3] }
 0x992   :  { %v2629_v31 = vadd.f32 1.0, %v5884_v4  ;;  %v5886_v35 = vpop.eup %5885 }
 0x993   :  { %5889 = vrcp.f32 %v2623_v39  ;;  %v5888_v56 = vpop.eup %5887  ;;  %v2636_v40 = vadd.f32 1.0, %v5886_v35 }
 0x994   :  { %5891 = vrcp.f32 %v2629_v31 }
 0x995   :  { %5893 = vrcp.f32 %v2636_v40 }
 0x99d   :  { %v5890_v57 = vpop.eup %5889 }
 0x99e   :  { %v5892_v9 = vpop.eup %5891  ;;  %v2640_v32 = vmul.f32 %v5890_v57, %v5888_v56 }
 0x99f   :  { %v2639_v48 = vmul.f32 0.0, %v5892_v9  ;;  %v5894_v59 = vpop.eup %5893 }
 0x9a1   :  { %v7160_v11 = vadd.f32 %v2640_v32, %v2639_v48 }
 0x9a3   :  { %5895 = vtanh.f32 %v7160_v11 }
 0x9ad   :  { %v5896_v22 = vpop.eup %5895 }
 0x9ae   :  { %v2643_v60 = vmul.f32 %v5896_v22, %v5894_v59 }
 0x9b0   :  { %2713 = vmatmul.mubr.f32.vlgmr.msra.gmra.mrb[34].mxu0 %v2643_v60  ;;  %2784 = vmatmul.mubr.f32.vlgmr.msra.gmra.mrb[34].mxu1 %v2643_v60 }
 0x9b1   :  { %5178 = vmatpush1.bf16.msra.mxu0 %v6977_v21  ;;  %5210 = vmatpush1.bf16.msra.mxu1 %v6982_v51 }
 0x9b2   :  { %5180 = vmatprep.subr.bf16.mxu0 %v6987_v42  ;;  %5212 = vmatprep.subr.bf16.mxu1 %v6992_v18 }
 0x9b3   :  { %2886 = vmatprep.mubr.f32.mxu0 %v6943_v34  ;;  %2957 = vmatprep.mubr.f32.mxu1 %v6943_v34 }
 0x9b5   :  { %5182 = vmatpush1.bf16.msra.mxu0 %v6989_v14  ;;  %5214 = vmatpush1.bf16.msra.mxu1 %v6994_v43 }
 0x9b6   :  { %5184 = vmatprep.subr.bf16.mxu0 %v6998_v5  ;;  %5216 = vmatprep.subr.bf16.mxu1 %v7003_v38 }
 0x9b9   :  { %5186 = vmatpush1.bf16.msra.mxu0 %v7001_v23  ;;  %5218 = vmatpush1.bf16.msra.mxu1 %v7006_v28 }
 0x9ba   :  { %5188 = vmatprep.subr.bf16.mxu0 %v7010_v41  ;;  %5220 = vmatprep.subr.bf16.mxu1 %v7015_v54 }
 0x9bd   :  { %5190 = vmatpush1.bf16.msra.mxu0 %v7013_v53  ;;  %5222 = vmatpush1.bf16.msra.mxu1 %v7018_v44 }
 0x9be   :  { %5192 = vmatprep.subr.bf16.mxu0 %v7022_v3  ;;  %5224 = vmatprep.subr.bf16.mxu1 %v7027_v7 }
 0x9c1   :  { %5194 = vmatpush1.bf16.msra.mxu0 %v7025_v6  ;;  %5226 = vmatpush1.bf16.msra.mxu1 %v7030_v17 }
 0x9c2   :  { %5196 = vmatprep.subr.bf16.mxu0 %v7034_v61  ;;  %5228 = vmatprep.subr.bf16.mxu1 %v7039_v20 }
 0x9c5   :  { %5198 = vmatpush1.bf16.msra.mxu0 %v7037_v0  ;;  %5230 = vmatpush1.bf16.msra.mxu1 %v7042_v15 }
 0x9c6   :  { %5200 = vmatprep.subr.bf16.mxu0 %v7046_v33  ;;  %5232 = vmatprep.subr.bf16.mxu1 %v7051_v47 }
 0x9c9   :  { %5202 = vmatpush1.bf16.msra.mxu0 %v7049_v29  ;;  %5234 = vmatpush1.bf16.msra.mxu1 %v7054_v50 }
 0x9ca   :  { %5204 = vmatprep.subr.bf16.mxu0 %v7058_v36  ;;  %5236 = vmatprep.subr.bf16.mxu1 %v7063_v58 }
 0x9cd   :  { %5206 = vmatpush1.bf16.msra.mxu0 %v7061_v62  ;;  %5238 = vmatpush1.bf16.msra.mxu1 %v7066_v2 }
 0x9ce   :  { %5240 = vmatprep.subr.bf16.mxu0 %v6975_v37  ;;  %5272 = vmatprep.subr.bf16.mxu1 %v6979_v16 }
 0xa83   :  { %v2714_v13 = vpop.f32.mrb[34].mxu0  ;;  %v2785_v12 = vpop.f32.mrb[34].mxu1 }
 0xa84   :  { %v2790_v25 = vadd.f32 %v2714_v13, %v2644_v24  ;;  %v2716_v19 = vpop.f32.mrb[35].mxu0  ;;  %v2787_v46 = vpop.f32.mrb[35].mxu1  ;;  %v2792_v39 = vadd.f32 %v2785_v12, %v2646_v10 }
 0xa85   :  { %v2791_v26 = vadd.f32 %v2716_v19, %v2645_v52  ;;  %v2793_v27 = vadd.f32 %v2787_v46, %v2647_v55 }
 0xa86   :  { %v4363_v8 = vmul.f32 -1.442695, %v2790_v25 }
 0xa87   :  { %v4364_v30 = vmul.f32 -1.442695, %v2791_v26  ;;  %v4365_v4 = vmul.f32 -1.442695, %v2793_v27  ;;  %v2819_v26 = vld [vmem:[#allocation2 + $0x48] sm:$0x3] }
 0xa88   :  { %5897 = vpow2.f32 %v4363_v8 }
 0xa89   :  { %5899 = vpow2.f32 %v4364_v30 }
 0xa8a   :  { %5901 = vpow2.f32 %v4365_v4  ;;  %v2821_v4 = vld [vmem:[#allocation2 + $0x58] sm:$0x3] }
 0xa8b   :  { %5903 = vtanh.f32 %v2792_v39 }
 0xa92   :  { %v5898_v31 = vpop.eup %5897 }
 0xa93   :  { %v5900_v35 = vpop.eup %5899  ;;  %v2797_v56 = vadd.f32 1.0, %v5898_v31  ;;  %v2820_v31 = vld [vmem:[#allocation2 + $0x50] sm:$0x3] }
 0xa94   :  { %v2803_v57 = vadd.f32 1.0, %v5900_v35  ;;  %v5902_v9 = vpop.eup %5901 }
 0xa95   :  { %5905 = vrcp.f32 %v2797_v56  ;;  %v5904_v32 = vpop.eup %5903  ;;  %v2810_v22 = vadd.f32 1.0, %v5902_v9 }
 0xa96   :  { %5907 = vrcp.f32 %v2803_v57 }
 0xa97   :  { %5909 = vrcp.f32 %v2810_v22 }
 0xa9f   :  { %v5906_v40 = vpop.eup %5905 }
 0xaa0   :  { %v5908_v48 = vpop.eup %5907  ;;  %v2814_v59 = vmul.f32 %v5906_v40, %v5904_v32 }
 0xaa1   :  { %v2813_v60 = vmul.f32 %v5908_v48, %v7160_v11  ;;  %v5910_v13 = vpop.eup %5909  ;;  %v2818_v11 = vld [vmem:[#allocation2 + $0x40] sm:$0x3] }
 0xaa3   :  { %v7198_v24 = vadd.f32 %v2814_v59, %v2813_v60 }
 0xaa5   :  { %5911 = vtanh.f32 %v7198_v24 }
 0xaaf   :  { %v5912_v12 = vpop.eup %5911 }
 0xab0   :  { %v2817_v25 = vmul.f32 %v5912_v12, %v5910_v13 }
 0xab2   :  { %2887 = vmatmul.mubr.f32.vlgmr.msra.gmra.mrb[36].mxu0 %v2817_v25  ;;  %2958 = vmatmul.mubr.f32.vlgmr.msra.gmra.mrb[36].mxu1 %v2817_v25 }
 0xab3   :  { %5242 = vmatpush1.bf16.msra.mxu0 %v6977_v21  ;;  %5274 = vmatpush1.bf16.msra.mxu1 %v6982_v51 }
 0xab4   :  { %5244 = vmatprep.subr.bf16.mxu0 %v6987_v42  ;;  %5276 = vmatprep.subr.bf16.mxu1 %v6992_v18 }
 0xab5   :  { %3060 = vmatprep.mubr.f32.mxu0 %v6943_v34  ;;  %3131 = vmatprep.mubr.f32.mxu1 %v6943_v34 }
 0xab7   :  { %5246 = vmatpush1.bf16.msra.mxu0 %v6989_v14  ;;  %5278 = vmatpush1.bf16.msra.mxu1 %v6994_v43 }
 0xab8   :  { %5248 = vmatprep.subr.bf16.mxu0 %v6998_v5  ;;  %5280 = vmatprep.subr.bf16.mxu1 %v7003_v38 }
 0xabb   :  { %5250 = vmatpush1.bf16.msra.mxu0 %v7001_v23  ;;  %5282 = vmatpush1.bf16.msra.mxu1 %v7006_v28 }
 0xabc   :  { %5252 = vmatprep.subr.bf16.mxu0 %v7010_v41  ;;  %5284 = vmatprep.subr.bf16.mxu1 %v7015_v54 }
 0xabf   :  { %5254 = vmatpush1.bf16.msra.mxu0 %v7013_v53  ;;  %5286 = vmatpush1.bf16.msra.mxu1 %v7018_v44 }
 0xac0   :  { %5256 = vmatprep.subr.bf16.mxu0 %v7022_v3  ;;  %5288 = vmatprep.subr.bf16.mxu1 %v7027_v7 }
 0xac3   :  { %5258 = vmatpush1.bf16.msra.mxu0 %v7025_v6  ;;  %5290 = vmatpush1.bf16.msra.mxu1 %v7030_v17 }
 0xac4   :  { %5260 = vmatprep.subr.bf16.mxu0 %v7034_v61  ;;  %5292 = vmatprep.subr.bf16.mxu1 %v7039_v20 }
 0xac7   :  { %5262 = vmatpush1.bf16.msra.mxu0 %v7037_v0  ;;  %5294 = vmatpush1.bf16.msra.mxu1 %v7042_v15 }
 0xac8   :  { %5264 = vmatprep.subr.bf16.mxu0 %v7046_v33  ;;  %5296 = vmatprep.subr.bf16.mxu1 %v7051_v47 }
 0xacb   :  { %5266 = vmatpush1.bf16.msra.mxu0 %v7049_v29  ;;  %5298 = vmatpush1.bf16.msra.mxu1 %v7054_v50 }
 0xacc   :  { %5268 = vmatprep.subr.bf16.mxu0 %v7058_v36  ;;  %5300 = vmatprep.subr.bf16.mxu1 %v7063_v58 }
 0xacf   :  { %5270 = vmatpush1.bf16.msra.mxu0 %v7061_v62  ;;  %5302 = vmatpush1.bf16.msra.mxu1 %v7066_v2 }
 0xad0   :  { %5304 = vmatprep.subr.bf16.mxu0 %v6975_v37  ;;  %5336 = vmatprep.subr.bf16.mxu1 %v6979_v16 }
 0xb85   :  { %v2888_v52 = vpop.f32.mrb[36].mxu0  ;;  %v2959_v19 = vpop.f32.mrb[36].mxu1 }
 0xb86   :  { %v2964_v46 = vadd.f32 %v2888_v52, %v2818_v11  ;;  %v2890_v8 = vpop.f32.mrb[37].mxu0  ;;  %v2961_v30 = vpop.f32.mrb[37].mxu1  ;;  %v2966_v56 = vadd.f32 %v2959_v19, %v2820_v31 }
 0xb87   :  { %v2965_v55 = vadd.f32 %v2890_v8, %v2819_v26  ;;  %v2967_v39 = vadd.f32 %v2961_v30, %v2821_v4 }
 0xb88   :  { %v4366_v27 = vmul.f32 -1.442695, %v2964_v46 }
 0xb89   :  { %v4367_v10 = vmul.f32 -1.442695, %v2965_v55  ;;  %v4368_v35 = vmul.f32 -1.442695, %v2967_v39  ;;  %v2993_v55 = vld [vmem:[#allocation2 + $0x68] sm:$0x3] }
 0xb8a   :  { %5913 = vpow2.f32 %v4366_v27 }
 0xb8b   :  { %5915 = vpow2.f32 %v4367_v10 }
 0xb8c   :  { %5917 = vpow2.f32 %v4368_v35  ;;  %v2995_v35 = vld [vmem:[#allocation2 + $0x78] sm:$0x3] }
 0xb8d   :  { %5919 = vtanh.f32 %v2966_v56 }
 0xb94   :  { %v5914_v57 = vpop.eup %5913 }
 0xb95   :  { %v5916_v9 = vpop.eup %5915  ;;  %v2971_v32 = vadd.f32 1.0, %v5914_v57  ;;  %v2994_v57 = vld [vmem:[#allocation2 + $0x70] sm:$0x3] }
 0xb96   :  { %v2977_v40 = vadd.f32 1.0, %v5916_v9  ;;  %v5918_v48 = vpop.eup %5917 }
 0xb97   :  { %5921 = vrcp.f32 %v2971_v32  ;;  %v5920_v59 = vpop.eup %5919  ;;  %v2984_v12 = vadd.f32 1.0, %v5918_v48 }
 0xb98   :  { %5923 = vrcp.f32 %v2977_v40 }
 0xb99   :  { %5925 = vrcp.f32 %v2984_v12 }
 0xba1   :  { %v5922_v22 = vpop.eup %5921 }
 0xba2   :  { %v5924_v60 = vpop.eup %5923  ;;  %v2988_v13 = vmul.f32 %v5922_v22, %v5920_v59 }
 0xba3   :  { %v2987_v25 = vmul.f32 %v5924_v60, %v7198_v24  ;;  %v5926_v52 = vpop.eup %5925  ;;  %v2992_v24 = vld [vmem:[#allocation2 + $0x60] sm:$0x3] }
 0xba5   :  { %v7236_v11 = vadd.f32 %v2988_v13, %v2987_v25 }
 0xba7   :  { %5927 = vtanh.f32 %v7236_v11 }
 0xbb1   :  { %v5928_v19 = vpop.eup %5927 }
 0xbb2   :  { %v2991_v46 = vmul.f32 %v5928_v19, %v5926_v52 }
 0xbb4   :  { %3061 = vmatmul.mubr.f32.vlgmr.msra.gmra.mrb[38].mxu0 %v2991_v46  ;;  %3132 = vmatmul.mubr.f32.vlgmr.msra.gmra.mrb[38].mxu1 %v2991_v46 }
 0xbb5   :  { %5306 = vmatpush1.bf16.msra.mxu0 %v6977_v21  ;;  %5338 = vmatpush1.bf16.msra.mxu1 %v6982_v51 }
 0xbb6   :  { %5308 = vmatprep.subr.bf16.mxu0 %v6987_v42  ;;  %5340 = vmatprep.subr.bf16.mxu1 %v6992_v18 }
 0xbb7   :  { %3234 = vmatprep.mubr.f32.mxu0 %v6943_v34  ;;  %3305 = vmatprep.mubr.f32.mxu1 %v6943_v34 }
 0xbb9   :  { %5310 = vmatpush1.bf16.msra.mxu0 %v6989_v14  ;;  %5342 = vmatpush1.bf16.msra.mxu1 %v6994_v43 }
 0xbba   :  { %5312 = vmatprep.subr.bf16.mxu0 %v6998_v5  ;;  %5344 = vmatprep.subr.bf16.mxu1 %v7003_v38 }
 0xbbd   :  { %5314 = vmatpush1.bf16.msra.mxu0 %v7001_v23  ;;  %5346 = vmatpush1.bf16.msra.mxu1 %v7006_v28 }
 0xbbe   :  { %5316 = vmatprep.subr.bf16.mxu0 %v7010_v41  ;;  %5348 = vmatprep.subr.bf16.mxu1 %v7015_v54 }
 0xbc1   :  { %5318 = vmatpush1.bf16.msra.mxu0 %v7013_v53  ;;  %5350 = vmatpush1.bf16.msra.mxu1 %v7018_v44 }
 0xbc2   :  { %5320 = vmatprep.subr.bf16.mxu0 %v7022_v3  ;;  %5352 = vmatprep.subr.bf16.mxu1 %v7027_v7 }
 0xbc5   :  { %5322 = vmatpush1.bf16.msra.mxu0 %v7025_v6  ;;  %5354 = vmatpush1.bf16.msra.mxu1 %v7030_v17 }
 0xbc6   :  { %5324 = vmatprep.subr.bf16.mxu0 %v7034_v61  ;;  %5356 = vmatprep.subr.bf16.mxu1 %v7039_v20 }
 0xbc9   :  { %5326 = vmatpush1.bf16.msra.mxu0 %v7037_v0  ;;  %5358 = vmatpush1.bf16.msra.mxu1 %v7042_v15 }
 0xbca   :  { %5328 = vmatprep.subr.bf16.mxu0 %v7046_v33  ;;  %5360 = vmatprep.subr.bf16.mxu1 %v7051_v47 }
 0xbcd   :  { %5330 = vmatpush1.bf16.msra.mxu0 %v7049_v29  ;;  %5362 = vmatpush1.bf16.msra.mxu1 %v7054_v50 }
 0xbce   :  { %5332 = vmatprep.subr.bf16.mxu0 %v7058_v36  ;;  %5364 = vmatprep.subr.bf16.mxu1 %v7063_v58 }
 0xbd1   :  { %5334 = vmatpush1.bf16.msra.mxu0 %v7061_v62  ;;  %5366 = vmatpush1.bf16.msra.mxu1 %v7066_v2 }
 0xbd2   :  { %5368 = vmatprep.subr.bf16.mxu0 %v6975_v37  ;;  %5400 = vmatprep.subr.bf16.mxu1 %v6979_v16 }
 0xc87   :  { %v3062_v26 = vpop.f32.mrb[38].mxu0  ;;  %v3133_v8 = vpop.f32.mrb[38].mxu1 }
 0xc88   :  { %v3138_v30 = vadd.f32 %v3062_v26, %v2992_v24  ;;  %v3064_v27 = vpop.f32.mrb[39].mxu0  ;;  %v3135_v10 = vpop.f32.mrb[39].mxu1  ;;  %v3140_v32 = vadd.f32 %v3133_v8, %v2994_v57 }
 0xc89   :  { %v3139_v4 = vadd.f32 %v3064_v27, %v2993_v55  ;;  %v3141_v56 = vadd.f32 %v3135_v10, %v2995_v35 }
 0xc8a   :  { %v4369_v39 = vmul.f32 -1.442695, %v3138_v30 }
 0xc8b   :  { %v4370_v31 = vmul.f32 -1.442695, %v3139_v4  ;;  %v4371_v9 = vmul.f32 -1.442695, %v3141_v56  ;;  %v3167_v4 = vld [vmem:[#allocation2 + $0x88] sm:$0x3] }
 0xc8c   :  { %5929 = vpow2.f32 %v4369_v39 }
 0xc8d   :  { %5931 = vpow2.f32 %v4370_v31 }
 0xc8e   :  { %5933 = vpow2.f32 %v4371_v9  ;;  %v3169_v9 = vld [vmem:[#allocation2 + $0x98] sm:$0x3] }
 0xc8f   :  { %5935 = vtanh.f32 %v3140_v32 }
 0xc96   :  { %v5930_v40 = vpop.eup %5929 }
 0xc97   :  { %v5932_v48 = vpop.eup %5931  ;;  %v3145_v59 = vadd.f32 1.0, %v5930_v40  ;;  %v3168_v40 = vld [vmem:[#allocation2 + $0x90] sm:$0x3] }
 0xc98   :  { %v3151_v22 = vadd.f32 1.0, %v5932_v48  ;;  %v5934_v60 = vpop.eup %5933 }
 0xc99   :  { %5937 = vrcp.f32 %v3145_v59  ;;  %v5936_v13 = vpop.eup %5935  ;;  %v3158_v19 = vadd.f32 1.0, %v5934_v60 }
 0xc9a   :  { %5939 = vrcp.f32 %v3151_v22 }
 0xc9b   :  { %5941 = vrcp.f32 %v3158_v19 }
 0xca3   :  { %v5938_v12 = vpop.eup %5937 }
 0xca4   :  { %v5940_v25 = vpop.eup %5939  ;;  %v3162_v52 = vmul.f32 %v5938_v12, %v5936_v13 }
 0xca5   :  { %v3161_v46 = vmul.f32 %v5940_v25, %v7236_v11  ;;  %v5942_v26 = vpop.eup %5941  ;;  %v3166_v11 = vld [vmem:[#allocation2 + $0x80] sm:$0x3] }
 0xca7   :  { %v7274_v24 = vadd.f32 %v3162_v52, %v3161_v46 }
 0xca9   :  { %5943 = vtanh.f32 %v7274_v24 }
 0xcb3   :  { %v5944_v8 = vpop.eup %5943 }
 0xcb4   :  { %v3165_v30 = vmul.f32 %v5944_v8, %v5942_v26 }
 0xcb6   :  { %3235 = vmatmul.mubr.f32.vlgmr.msra.gmra.mrb[40].mxu0 %v3165_v30  ;;  %3306 = vmatmul.mubr.f32.vlgmr.msra.gmra.mrb[40].mxu1 %v3165_v30 }
 0xcb7   :  { %5370 = vmatpush1.bf16.msra.mxu0 %v6977_v21  ;;  %5402 = vmatpush1.bf16.msra.mxu1 %v6982_v51 }
 0xcb8   :  { %5372 = vmatprep.subr.bf16.mxu0 %v6987_v42  ;;  %5404 = vmatprep.subr.bf16.mxu1 %v6992_v18 }
 0xcb9   :  { %3408 = vmatprep.mubr.f32.mxu0 %v6943_v34  ;;  %3479 = vmatprep.mubr.f32.mxu1 %v6943_v34 }
 0xcbb   :  { %5374 = vmatpush1.bf16.msra.mxu0 %v6989_v14  ;;  %5406 = vmatpush1.bf16.msra.mxu1 %v6994_v43 }
 0xcbc   :  { %5376 = vmatprep.subr.bf16.mxu0 %v6998_v5  ;;  %5408 = vmatprep.subr.bf16.mxu1 %v7003_v38 }
 0xcbf   :  { %5378 = vmatpush1.bf16.msra.mxu0 %v7001_v23  ;;  %5410 = vmatpush1.bf16.msra.mxu1 %v7006_v28 }
 0xcc0   :  { %5380 = vmatprep.subr.bf16.mxu0 %v7010_v41  ;;  %5412 = vmatprep.subr.bf16.mxu1 %v7015_v54 }
 0xcc3   :  { %5382 = vmatpush1.bf16.msra.mxu0 %v7013_v53  ;;  %5414 = vmatpush1.bf16.msra.mxu1 %v7018_v44 }
 0xcc4   :  { %5384 = vmatprep.subr.bf16.mxu0 %v7022_v3  ;;  %5416 = vmatprep.subr.bf16.mxu1 %v7027_v7 }
 0xcc7   :  { %5386 = vmatpush1.bf16.msra.mxu0 %v7025_v6  ;;  %5418 = vmatpush1.bf16.msra.mxu1 %v7030_v17 }
 0xcc8   :  { %5388 = vmatprep.subr.bf16.mxu0 %v7034_v61  ;;  %5420 = vmatprep.subr.bf16.mxu1 %v7039_v20 }
 0xccb   :  { %5390 = vmatpush1.bf16.msra.mxu0 %v7037_v0  ;;  %5422 = vmatpush1.bf16.msra.mxu1 %v7042_v15 }
 0xccc   :  { %5392 = vmatprep.subr.bf16.mxu0 %v7046_v33  ;;  %5424 = vmatprep.subr.bf16.mxu1 %v7051_v47 }
 0xccf   :  { %5394 = vmatpush1.bf16.msra.mxu0 %v7049_v29  ;;  %5426 = vmatpush1.bf16.msra.mxu1 %v7054_v50 }
 0xcd0   :  { %5396 = vmatprep.subr.bf16.mxu0 %v7058_v36  ;;  %5428 = vmatprep.subr.bf16.mxu1 %v7063_v58 }
 0xcd3   :  { %5398 = vmatpush1.bf16.msra.mxu0 %v7061_v62  ;;  %5430 = vmatpush1.bf16.msra.mxu1 %v7066_v2 }
 0xcd4   :  { %5432 = vmatprep.subr.bf16.mxu0 %v6975_v37  ;;  %5464 = vmatprep.subr.bf16.mxu1 %v6979_v16 }
 0xd89   :  { %v3236_v55 = vpop.f32.mrb[40].mxu0  ;;  %v3307_v27 = vpop.f32.mrb[40].mxu1 }
 0xd8a   :  { %v3312_v10 = vadd.f32 %v3236_v55, %v3166_v11  ;;  %v3238_v39 = vpop.f32.mrb[41].mxu0  ;;  %v3309_v31 = vpop.f32.mrb[41].mxu1  ;;  %v3314_v59 = vadd.f32 %v3307_v27, %v3168_v40 }
 0xd8b   :  { %v3313_v35 = vadd.f32 %v3238_v39, %v3167_v4  ;;  %v3315_v32 = vadd.f32 %v3309_v31, %v3169_v9 }
 0xd8c   :  { %v4372_v56 = vmul.f32 -1.442695, %v3312_v10 }
 0xd8d   :  { %v4373_v57 = vmul.f32 -1.442695, %v3313_v35  ;;  %v4374_v48 = vmul.f32 -1.442695, %v3315_v32  ;;  %v3341_v35 = vld [vmem:[#allocation2 + $0xa8] sm:$0x3] }
 0xd8e   :  { %5945 = vpow2.f32 %v4372_v56 }
 0xd8f   :  { %5947 = vpow2.f32 %v4373_v57 }
 0xd90   :  { %5949 = vpow2.f32 %v4374_v48  ;;  %v3343_v48 = vld [vmem:[#allocation2 + $0xb8] sm:$0x3] }
 0xd91   :  { %5951 = vtanh.f32 %v3314_v59 }
 0xd98   :  { %v5946_v22 = vpop.eup %5945 }
 0xd99   :  { %v5948_v60 = vpop.eup %5947  ;;  %v3319_v13 = vadd.f32 1.0, %v5946_v22  ;;  %v3342_v22 = vld [vmem:[#allocation2 + $0xb0] sm:$0x3] }
 0xd9a   :  { %v3325_v12 = vadd.f32 1.0, %v5948_v60  ;;  %v5950_v25 = vpop.eup %5949 }
 0xd9b   :  { %5953 = vrcp.f32 %v3319_v13  ;;  %v5952_v52 = vpop.eup %5951  ;;  %v3332_v8 = vadd.f32 1.0, %v5950_v25 }
 0xd9c   :  { %5955 = vrcp.f32 %v3325_v12 }
 0xd9d   :  { %5957 = vrcp.f32 %v3332_v8 }
 0xda5   :  { %v5954_v19 = vpop.eup %5953 }
 0xda6   :  { %v5956_v46 = vpop.eup %5955  ;;  %v3336_v26 = vmul.f32 %v5954_v19, %v5952_v52 }
 0xda7   :  { %v3335_v30 = vmul.f32 %v5956_v46, %v7274_v24  ;;  %v5958_v55 = vpop.eup %5957  ;;  %v3340_v24 = vld [vmem:[#allocation2 + $0xa0] sm:$0x3] }
 0xda9   :  { %v7312_v11 = vadd.f32 %v3336_v26, %v3335_v30 }
 0xdab   :  { %5959 = vtanh.f32 %v7312_v11 }
 0xdb5   :  { %v5960_v27 = vpop.eup %5959 }
 0xdb6   :  { %v3339_v10 = vmul.f32 %v5960_v27, %v5958_v55 }
 0xdb8   :  { %3409 = vmatmul.mubr.f32.vlgmr.msra.gmra.mrb[42].mxu0 %v3339_v10  ;;  %3480 = vmatmul.mubr.f32.vlgmr.msra.gmra.mrb[42].mxu1 %v3339_v10 }
 0xdb9   :  { %5434 = vmatpush1.bf16.msra.mxu0 %v6977_v21  ;;  %5466 = vmatpush1.bf16.msra.mxu1 %v6982_v51 }
 0xdba   :  { %5436 = vmatprep.subr.bf16.mxu0 %v6987_v42  ;;  %5468 = vmatprep.subr.bf16.mxu1 %v6992_v18 }
 0xdbb   :  { %3582 = vmatprep.mubr.f32.mxu0 %v6943_v34  ;;  %3653 = vmatprep.mubr.f32.mxu1 %v6943_v34 }
 0xdbd   :  { %5438 = vmatpush1.bf16.msra.mxu0 %v6989_v14  ;;  %5470 = vmatpush1.bf16.msra.mxu1 %v6994_v43 }
 0xdbe   :  { %5440 = vmatprep.subr.bf16.mxu0 %v6998_v5  ;;  %5472 = vmatprep.subr.bf16.mxu1 %v7003_v38 }
 0xdc1   :  { %5442 = vmatpush1.bf16.msra.mxu0 %v7001_v23  ;;  %5474 = vmatpush1.bf16.msra.mxu1 %v7006_v28 }
 0xdc2   :  { %5444 = vmatprep.subr.bf16.mxu0 %v7010_v41  ;;  %5476 = vmatprep.subr.bf16.mxu1 %v7015_v54 }
 0xdc5   :  { %5446 = vmatpush1.bf16.msra.mxu0 %v7013_v53  ;;  %5478 = vmatpush1.bf16.msra.mxu1 %v7018_v44 }
 0xdc6   :  { %5448 = vmatprep.subr.bf16.mxu0 %v7022_v3  ;;  %5480 = vmatprep.subr.bf16.mxu1 %v7027_v7 }
 0xdc9   :  { %5450 = vmatpush1.bf16.msra.mxu0 %v7025_v6  ;;  %5482 = vmatpush1.bf16.msra.mxu1 %v7030_v17 }
 0xdca   :  { %5452 = vmatprep.subr.bf16.mxu0 %v7034_v61  ;;  %5484 = vmatprep.subr.bf16.mxu1 %v7039_v20 }
 0xdcd   :  { %5454 = vmatpush1.bf16.msra.mxu0 %v7037_v0  ;;  %5486 = vmatpush1.bf16.msra.mxu1 %v7042_v15 }
 0xdce   :  { %5456 = vmatprep.subr.bf16.mxu0 %v7046_v33  ;;  %5488 = vmatprep.subr.bf16.mxu1 %v7051_v47 }
 0xdd1   :  { %5458 = vmatpush1.bf16.msra.mxu0 %v7049_v29  ;;  %5490 = vmatpush1.bf16.msra.mxu1 %v7054_v50 }
 0xdd2   :  { %5460 = vmatprep.subr.bf16.mxu0 %v7058_v36  ;;  %5492 = vmatprep.subr.bf16.mxu1 %v7063_v58 }
 0xdd5   :  { %5462 = vmatpush1.bf16.msra.mxu0 %v7061_v62  ;;  %5494 = vmatpush1.bf16.msra.mxu1 %v7066_v2 }
 0xdd6   :  { %5496 = vmatprep.subr.bf16.mxu0 %v6975_v37  ;;  %5528 = vmatprep.subr.bf16.mxu1 %v6979_v16 }
 0xe8b   :  { %v3410_v4 = vpop.f32.mrb[42].mxu0  ;;  %v3481_v39 = vpop.f32.mrb[42].mxu1 }
 0xe8c   :  { %v3486_v31 = vadd.f32 %v3410_v4, %v3340_v24  ;;  %v3412_v56 = vpop.f32.mrb[43].mxu0  ;;  %v3483_v57 = vpop.f32.mrb[43].mxu1  ;;  %v3488_v13 = vadd.f32 %v3481_v39, %v3342_v22  ;;  %v3867_v39 = vld [vmem:[#allocation11 + $0x18] sm:$0xff]  ;;  %v3877_v22 = vld [vmem:[#allocation11 + $0x68] sm:$0xff] }
 0xe8d   :  { %v3487_v9 = vadd.f32 %v3412_v56, %v3341_v35  ;;  %v3489_v59 = vadd.f32 %v3483_v57, %v3343_v48  ;;  %v3874_v35 = vld [vmem:[#allocation11 + $0x50] sm:$0xff] }
 0xe8e   :  { %v4375_v32 = vmul.f32 -1.442695, %v3486_v31  ;;  %v3871_v31 = vld [vmem:[#allocation11 + $0x38] sm:$0xff]  ;;  %v3870_v48 = vld [vmem:[#allocation11 + $0x30] sm:$0xff] }
 0xe8f   :  { %v4376_v40 = vmul.f32 -1.442695, %v3487_v9  ;;  %v4377_v60 = vmul.f32 -1.442695, %v3489_v59  ;;  %v3873_v59 = vld [vmem:[#allocation11 + $0x48] sm:$0xff] }
 0xe90   :  { %5961 = vpow2.f32 %v4375_v32 }
 0xe91   :  { %5963 = vpow2.f32 %v4376_v40  ;;  %v5563_v40 = vpack.c.bf16 %v3874_v35, %v3871_v31  ;;  %v3919_v31 = vld [vmem:[#allocation11 + $0x1b8] sm:$0xff]  ;;  %v3922_v35 = vld [vmem:[#allocation11 + $0x1d0] sm:$0xff] }
 0xe92   :  { %5965 = vpow2.f32 %v4377_v60  ;;  %v3880_v60 = vld [vmem:[#allocation11 + $0x80] sm:$0xff] }
 0xe93   :  { %5967 = vtanh.f32 %v3488_v13  ;;  %v5565_v13 = vpack.c.bf16 %v3873_v59, %v3870_v48 }
 0xe9a   :  { %v5962_v37 = vpop.eup %5961 }
 0xe9b   :  { %v5964_v12 = vpop.eup %5963  ;;  %v3493_v16 = vadd.f32 1.0, %v5962_v37  ;;  %v5567_v37 = vpack.c.bf16 %v3880_v60, %v3877_v22  ;;  %v3872_v22 = vld [vmem:[#allocation11 + $0x40] sm:$0xff]  ;;  %v3875_v60 = vld [vmem:[#allocation11 + $0x58] sm:$0xff] }
 0xe9c   :  { %v3499_v25 = vadd.f32 1.0, %v5964_v12  ;;  %v5966_v52 = vpop.eup %5965  ;;  %v3876_v12 = vld [vmem:[#allocation11 + $0x60] sm:$0xff] }
 0xe9d   :  { %5969 = vrcp.f32 %v3493_v16  ;;  %v5968_v19 = vpop.eup %5967  ;;  %v3506_v30 = vadd.f32 1.0, %v5966_v52  ;;  %v3879_v16 = vld [vmem:[#allocation11 + $0x78] sm:$0xff]  ;;  %v3886_v52 = vld [vmem:[#allocation11 + $0xb0] sm:$0xff] }
 0xe9e   :  { %5971 = vrcp.f32 %v3499_v25  ;;  %v3883_v25 = vld [vmem:[#allocation11 + $0x98] sm:$0xff] }
 0xe9f   :  { %5973 = vrcp.f32 %v3506_v30  ;;  %v3889_v30 = vld [vmem:[#allocation11 + $0xc8] sm:$0xff] }
 0xea7   :  { %v5970_v46 = vpop.eup %5969 }
 0xea8   :  { %v5972_v26 = vpop.eup %5971  ;;  %v3510_v8 = vmul.f32 %v5970_v46, %v5968_v19  ;;  %v5569_v19 = vpack.c.bf16 %v3879_v16, %v3876_v12  ;;  %v5571_v46 = vpack.c.bf16 %v3886_v52, %v3883_v25  ;;  %v3928_v12 = vld [vmem:[#allocation11 + $0x200] sm:$0xff]  ;;  %v3926_v16 = vld [vmem:[#allocation11 + $0x1f0] sm:$0xff]  ;;  %v3929_v52 = vld [vmem:[#allocation11 + $0x208] sm:$0xff] }
 0xea9   :  { %v3509_v55 = vmul.f32 %v5972_v26, %v7312_v11  ;;  %v5974_v10 = vpop.eup %5973  ;;  %v3864_v11 = vld [vmem:[#allocation11] sm:$0xff]  ;;  %v3882_v26 = vld [vmem:[#allocation11 + $0x90] sm:$0xff] }
 0xeaa   :  { %v5561_v9 = vpack.c.bf16 %v3867_v39, %v3864_v11  ;;  %v3869_v11 = vld [vmem:[#allocation11 + $0x28] sm:$0xff] }
 0xeab   :  { %v7350_v27 = vadd.f32 %v3510_v8, %v3509_v55  ;;  %v3885_v8 = vld [vmem:[#allocation11 + $0xa8] sm:$0xff]  ;;  %v3892_v55 = vld [vmem:[#allocation11 + $0xe0] sm:$0xff] }
 0xead   :  { %5975 = vtanh.f32 %v7350_v27 }
 0xeb7   :  { %v5976_v24 = vpop.eup %5975 }
 0xeb8   :  { %v3513_v4 = vmul.f32 %v5976_v24, %v5974_v10  ;;  %v5575_v10 = vpack.c.bf16 %v3892_v55, %v3889_v30  ;;  %v3888_v24 = vld [vmem:[#allocation11 + $0xc0] sm:$0xff]  ;;  %v3878_v30 = vld [vmem:[#allocation11 + $0x70] sm:$0xff]  ;;  %v3881_v55 = vld [vmem:[#allocation11 + $0x88] sm:$0xff] }
 0xeba   :  { %3583 = vmatmul.mubr.f32.vlgmr.msra.gmra.mrb[44].mxu0 %v3513_v4  ;;  %3654 = vmatmul.mubr.f32.vlgmr.msra.gmra.mrb[44].mxu1 %v3513_v4  ;;  %v3891_v4 = vld [vmem:[#allocation11 + $0xd8] sm:$0xff] }
 0xebb   :  { %5498 = vmatpush1.bf16.msra.mxu0 %v6977_v21  ;;  %5530 = vmatpush1.bf16.msra.mxu1 %v6982_v51  ;;  %v3865_v21 = vld [vmem:[#allocation11 + $0x8] sm:$0xff]  ;;  %v3868_v51 = vld [vmem:[#allocation11 + $0x20] sm:$0xff] }
 0xebc   :  { %5500 = vmatprep.subr.bf16.mxu0 %v6987_v42  ;;  %5532 = vmatprep.subr.bf16.mxu1 %v6992_v18  ;;  %v5559_v42 = vpack.c.bf16 %v3868_v51, %v3865_v21  ;;  %v5577_v21 = vpack.c.bf16 %v3891_v4, %v3888_v24  ;;  %v3895_v51 = vld [vmem:[#allocation11 + $0xf8] sm:$0xff]  ;;  %v3934_v24 = vld [vmem:[#allocation11 + $0x230] sm:$0xff]  ;;  %v3932_v4 = vld [vmem:[#allocation11 + $0x220] sm:$0xff] }
 0xebd   :  { %3756 = vmatprep.mubr.f32.mxu0 %v6943_v34  ;;  %3827 = vmatprep.mubr.f32.mxu1 %v6943_v34 }
 0xebf   :  { %5502 = vmatpush1.bf16.msra.mxu0 %v6989_v14  ;;  %5534 = vmatpush1.bf16.msra.mxu1 %v6994_v43  ;;  %v3514_v14 = vld [vmem:[#allocation2 + $0xc0] sm:$0x3] }
 0xec0   :  { %5504 = vmatprep.subr.bf16.mxu0 %v6998_v5  ;;  %5536 = vmatprep.subr.bf16.mxu1 %v7003_v38 }
 0xec3   :  { %5506 = vmatpush1.bf16.msra.mxu0 %v7001_v23  ;;  %5538 = vmatpush1.bf16.msra.mxu1 %v7006_v28  ;;  %v3515_v23 = vld [vmem:[#allocation2 + $0xc8] sm:$0x3] }
 0xec4   :  { %5508 = vmatprep.subr.bf16.mxu0 %v7010_v41  ;;  %5540 = vmatprep.subr.bf16.mxu1 %v7015_v54 }
 0xec7   :  { %5510 = vmatpush1.bf16.msra.mxu0 %v7013_v53  ;;  %5542 = vmatpush1.bf16.msra.mxu1 %v7018_v44  ;;  %v3517_v44 = vld [vmem:[#allocation2 + $0xd8] sm:$0x3] }
 0xec8   :  { %5512 = vmatprep.subr.bf16.mxu0 %v7022_v3  ;;  %5544 = vmatprep.subr.bf16.mxu1 %v7027_v7 }
 0xecb   :  { %5514 = vmatpush1.bf16.msra.mxu0 %v7025_v6  ;;  %5546 = vmatpush1.bf16.msra.mxu1 %v7030_v17  ;;  %v3516_v6 = vld [vmem:[#allocation2 + $0xd0] sm:$0x3] }
 0xecc   :  { %5516 = vmatprep.subr.bf16.mxu0 %v7034_v61  ;;  %5548 = vmatprep.subr.bf16.mxu1 %v7039_v20 }
 0xecf   :  { %5518 = vmatpush1.bf16.msra.mxu0 %v7037_v0  ;;  %5550 = vmatpush1.bf16.msra.mxu1 %v7042_v15 }
 0xed0   :  { %5520 = vmatprep.subr.bf16.mxu0 %v7046_v33  ;;  %5552 = vmatprep.subr.bf16.mxu1 %v7051_v47 }
 0xed3   :  { %5522 = vmatpush1.bf16.msra.mxu0 %v7049_v29  ;;  %5554 = vmatpush1.bf16.msra.mxu1 %v7054_v50 }
 0xed4   :  { %5524 = vmatprep.subr.bf16.mxu0 %v7058_v36  ;;  %5556 = vmatprep.subr.bf16.mxu1 %v7063_v58 }
 0xed7   :  { %5526 = vmatpush1.bf16.msra.mxu0 %v7061_v62  ;;  %5558 = vmatpush1.bf16.msra.mxu1 %v7066_v2 }
 0xed8   :  { %5560 = vmatprep.subr.bf16.mxu0 %v5559_v42  ;;  %v3898_v42 = vld [vmem:[#allocation11 + $0x110] sm:$0xff] }
 0xf8d   :  { %v3584_v18 = vpop.f32.mrb[44].mxu0  ;;  %v3655_v43 = vpop.f32.mrb[44].mxu1 }
 0xf8e   :  { %v3660_v5 = vadd.f32 %v3584_v18, %v3514_v14  ;;  %v3586_v38 = vpop.f32.mrb[45].mxu0  ;;  %v3657_v28 = vpop.f32.mrb[45].mxu1  ;;  %v3662_v17 = vadd.f32 %v3655_v43, %v3516_v6  ;;  %v5579_v14 = vpack.c.bf16 %v3898_v42, %v3895_v51  ;;  %v3894_v18 = vld [vmem:[#allocation11 + $0xf0] sm:$0xff]  ;;  %v3897_v43 = vld [vmem:[#allocation11 + $0x108] sm:$0xff]  ;;  %v3935_v51 = vld [vmem:[#allocation11 + $0x238] sm:$0xff] }
 0xf8f   :  { %v3661_v41 = vadd.f32 %v3586_v38, %v3515_v23  ;;  %v3663_v3 = vadd.f32 %v3657_v28, %v3517_v44  ;;  %v3901_v23 = vld [vmem:[#allocation11 + $0x128] sm:$0xff]  ;;  %v3904_v38 = vld [vmem:[#allocation11 + $0x140] sm:$0xff]  ;;  %v3907_v44 = vld [vmem:[#allocation11 + $0x158] sm:$0xff] }
 0xf90   :  { %v4378_v53 = vmul.f32 -1.442695, %v3660_v5  ;;  %v5581_v5 = vpack.c.bf16 %v3897_v43, %v3894_v18  ;;  %v5583_v28 = vpack.c.bf16 %v3904_v38, %v3901_v23  ;;  %v3930_v42 = vld [vmem:[#allocation11 + $0x210] sm:$0xff]  ;;  %v5667_v18 = vpack.c.bf16 %v3935_v51, %v3932_v4  ;;  %v3887_v23 = vld [vmem:[#allocation11 + $0xb8] sm:$0xff]  ;;  %v3961_v4 = vld [vmem:[#allocation11 + $0x308] sm:$0xff] }
 0xf91   :  { %v4379_v54 = vmul.f32 -1.442695, %v3661_v41  ;;  %v4380_v7 = vmul.f32 -1.442695, %v3663_v3  ;;  %v3900_v41 = vld [vmem:[#allocation11 + $0x120] sm:$0xff]  ;;  %v3910_v3 = vld [vmem:[#allocation11 + $0x170] sm:$0xff] }
 0xf92   :  { %5977 = vpow2.f32 %v4378_v53  ;;  %v3903_v53 = vld [vmem:[#allocation11 + $0x138] sm:$0xff]  ;;  %v5587_v6 = vpack.c.bf16 %v3910_v3, %v3907_v44  ;;  %v3941_v44 = vld [vmem:[#allocation11 + $0x268] sm:$0xff]  ;;  %v3936_v3 = vld [vmem:[#allocation11 + $0x240] sm:$0xff] }
 0xf93   :  { %5979 = vpow2.f32 %v4379_v54  ;;  %v5585_v54 = vpack.c.bf16 %v3903_v53, %v3900_v41  ;;  %v3940_v41 = vld [vmem:[#allocation11 + $0x260] sm:$0xff]  ;;  %v3938_v53 = vld [vmem:[#allocation11 + $0x250] sm:$0xff] }
 0xf94   :  { %5981 = vpow2.f32 %v4380_v7  ;;  %v3906_v7 = vld [vmem:[#allocation11 + $0x150] sm:$0xff] }
 0xf95   :  { %5983 = vtanh.f32 %v3662_v17  ;;  %v3909_v17 = vld [vmem:[#allocation11 + $0x168] sm:$0xff] }
 0xf9c   :  { %v5978_v61 = vpop.eup %5977 }
 0xf9d   :  { %v5980_v0 = vpop.eup %5979  ;;  %v3667_v20 = vadd.f32 1.0, %v5978_v61  ;;  %v5589_v61 = vpack.c.bf16 %v3909_v17, %v3906_v7  ;;  %v5671_v7 = vpack.c.bf16 %v3941_v44, %v3938_v53  ;;  %v3691_v44 = vld [vmem:[#allocation2 + $0xf8] sm:$0x3] }
 0xf9e   :  { %v3673_v15 = vadd.f32 1.0, %v5980_v0  ;;  %v5982_v33 = vpop.eup %5981  ;;  %v3913_v0 = vld [vmem:[#allocation11 + $0x188] sm:$0xff] }
 0xf9f   :  { %5985 = vrcp.f32 %v3667_v20  ;;  %v5984_v29 = vpop.eup %5983  ;;  %v3680_v62 = vadd.f32 1.0, %v5982_v33  ;;  %v3916_v20 = vld [vmem:[#allocation11 + $0x1a0] sm:$0xff] }
 0xfa0   :  { %5987 = vrcp.f32 %v3673_v15  ;;  %v3914_v15 = vld [vmem:[#allocation11 + $0x190] sm:$0xff]  ;;  %v5591_v33 = vpack.c.bf16 %v3916_v20, %v3913_v0  ;;  %v3893_v0 = vld [vmem:[#allocation11 + $0xe8] sm:$0xff]  ;;  %v3943_v20 = vld [vmem:[#allocation11 + $0x278] sm:$0xff] }
 0xfa1   :  { %5989 = vrcp.f32 %v3680_v62 }
 0xfa9   :  { %v5986_v47 = vpop.eup %5985 }
 0xfaa   :  { %v5988_v50 = vpop.eup %5987  ;;  %v3684_v36 = vmul.f32 %v5986_v47, %v5984_v29  ;;  %v3917_v29 = vld [vmem:[#allocation11 + $0x1a8] sm:$0xff]  ;;  %v3912_v47 = vld [vmem:[#allocation11 + $0x180] sm:$0xff] }
 0xfab   :  { %v3683_v58 = vmul.f32 %v5988_v50, %v7350_v27  ;;  %v5990_v56 = vpop.eup %5989  ;;  %v5573_v27 = vpack.c.bf16 %v3885_v8, %v3882_v26  ;;  %v3915_v50 = vld [vmem:[#allocation11 + $0x198] sm:$0xff]  ;;  %v5663_v26 = vpack.c.bf16 %v3929_v52, %v3926_v16  ;;  %v3958_v16 = vld [vmem:[#allocation11 + $0x2f0] sm:$0xff] }
 0xfac   :  { %v5593_v62 = vpack.c.bf16 %v3915_v50, %v3912_v47  ;;  %v3947_v47 = vld [vmem:[#allocation11 + $0x298] sm:$0xff] }
 0xfad   :  { %v7386_v2 = vadd.f32 %v3684_v36, %v3683_v58  ;;  %v5655_v36 = vpack.c.bf16 %v3917_v29, %v3914_v15  ;;  %v3866_v58 = vld [vmem:[#allocation11 + $0x10] sm:$0xff]  ;;  %v3944_v29 = vld [vmem:[#allocation11 + $0x280] sm:$0xff] }
 0xfae   :  { %v5657_v39 = vpack.c.bf16 %v3869_v11, %v3866_v58  ;;  %v3945_v58 = vld [vmem:[#allocation11 + $0x288] sm:$0xff]  ;;  %v3896_v11 = vld [vmem:[#allocation11 + $0x100] sm:$0xff] }
 0xfaf   :  { %5991 = vtanh.f32 %v7386_v2  ;;  %5656 = vmatprep.subr.bf16.mxu1 %v5655_v36  ;;  %v5675_v36 = vpack.c.bf16 %v3947_v47, %v3944_v29 }
 0xfb9   :  { %v5992_v57 = vpop.eup %5991 }
 0xfba   :  { %v3687_v32 = vmul.f32 %v5992_v57, %v5990_v56  ;;  %v3920_v56 = vld [vmem:[#allocation11 + $0x1c0] sm:$0xff]  ;;  %v5595_v57 = vpack.c.bf16 %v3922_v35, %v3919_v31  ;;  %v3899_v31 = vld [vmem:[#allocation11 + $0x118] sm:$0xff]  ;;  %v3949_v35 = vld [vmem:[#allocation11 + $0x2a8] sm:$0xff] }
 0xfbc   :  { %3757 = vmatmul.mubr.f32.vlgmr.msra.gmra.mrb[46].mxu0 %v3687_v32  ;;  %3828 = vmatmul.mubr.f32.vlgmr.msra.gmra.mrb[46].mxu1 %v3687_v32  ;;  %v3918_v32 = vld [vmem:[#allocation11 + $0x1b0] sm:$0xff] }
 0xfbd   :  { %5562 = vmatpush1.bf16.msra.mxu0 %v5561_v9  ;;  %5658 = vmatpush3.bf16.msra.mxu1 %v5657_v39  ;;  %v3923_v9 = vld [vmem:[#allocation11 + $0x1d8] sm:$0xff] }
 0xfbe   :  { %5564 = vmatprep.subr.bf16.mxu0 %v5563_v40  ;;  %v3921_v40 = vld [vmem:[#allocation11 + $0x1c8] sm:$0xff]  ;;  %v5659_v48 = vpack.c.bf16 %v3923_v9, %v3920_v56  ;;  %v3952_v56 = vld [vmem:[#allocation11 + $0x2c0] sm:$0xff] }
 0xfbf   :  { %v5597_v59 = vpack.c.bf16 %v3921_v40, %v3918_v32  ;;  %v5615_v9 = vpack.c.bf16 %v3952_v56, %v3949_v35  ;;  %v3950_v32 = vld [vmem:[#allocation11 + $0x2b0] sm:$0xff]  ;;  %v3953_v40 = vld [vmem:[#allocation11 + $0x2c8] sm:$0xff] }
 0xfc0   :  { %5660 = vmatprep.subr.bf16.mxu1 %v5659_v48  ;;  %v3948_v48 = vld [vmem:[#allocation11 + $0x2a0] sm:$0xff]  ;;  %v3962_v35 = vld [vmem:[#allocation11 + $0x310] sm:$0xff]  ;;  %v3965_v56 = vld [vmem:[#allocation11 + $0x328] sm:$0xff] }
 0xfc1   :  { %5566 = vmatpush1.bf16.msra.mxu0 %v5565_v13  ;;  %v5661_v13 = vpack.c.bf16 %v3875_v60, %v3872_v22  ;;  %v3951_v22 = vld [vmem:[#allocation11 + $0x2b8] sm:$0xff]  ;;  %v3902_v60 = vld [vmem:[#allocation11 + $0x130] sm:$0xff] }
 0xfc2   :  { %5568 = vmatprep.subr.bf16.mxu0 %v5567_v37  ;;  %v3925_v37 = vld [vmem:[#allocation11 + $0x1e8] sm:$0xff] }
 0xfc3   :  { %5662 = vmatpush3.bf16.msra.mxu1 %v5661_v13  ;;  %v5599_v25 = vpack.c.bf16 %v3928_v12, %v3925_v37  ;;  %v3905_v13 = vld [vmem:[#allocation11 + $0x148] sm:$0xff]  ;;  %v5617_v37 = vpack.c.bf16 %v3951_v22, %v3948_v48  ;;  %v3955_v12 = vld [vmem:[#allocation11 + $0x2d8] sm:$0xff] }
 0xfc4   :  { %5664 = vmatprep.subr.bf16.mxu1 %v5663_v26  ;;  %v5681_v52 = vpack.c.bf16 %v3905_v13, %v3902_v60  ;;  %v3954_v26 = vld [vmem:[#allocation11 + $0x2d0] sm:$0xff]  ;;  %v5688_v60 = vpack.c.bf16 %v3965_v56, %v3962_v35  ;;  %v4001_v35 = vld [vmem:[#allocation11 + $0x448] sm:$0xff]  ;;  %v4003_v56 = vld [vmem:[#allocation11 + $0x458] sm:$0xff] }
 0xfc5   :  { %5570 = vmatpush1.bf16.msra.mxu0 %v5569_v19  ;;  %v3924_v19 = vld [vmem:[#allocation11 + $0x1e0] sm:$0xff]  ;;  %v3966_v13 = vld [vmem:[#allocation11 + $0x330] sm:$0xff] }
 0xfc6   :  { %5572 = vmatprep.subr.bf16.mxu0 %v5571_v46  ;;  %v3927_v46 = vld [vmem:[#allocation11 + $0x1f8] sm:$0xff] }
 0xfc7   :  { %v5601_v8 = vpack.c.bf16 %v3927_v46, %v3924_v19  ;;  %v5619_v19 = vpack.c.bf16 %v3958_v16, %v3955_v12  ;;  %v3959_v46 = vld [vmem:[#allocation11 + $0x2f8] sm:$0xff]  ;;  %v3968_v12 = vld [vmem:[#allocation11 + $0x340] sm:$0xff] }
 0xfc8   :  { %v3971_v16 = vld [vmem:[#allocation11 + $0x358] sm:$0xff] }
 0xfc9   :  { %5574 = vmatpush1.bf16.msra.mxu0 %v5573_v27  ;;  %v5665_v27 = vpack.c.bf16 %v3881_v55, %v3878_v30  ;;  %v3908_v55 = vld [vmem:[#allocation11 + $0x160] sm:$0xff] }
 0xfca   :  { %5576 = vmatprep.subr.bf16.mxu0 %v5575_v10  ;;  %v3931_v10 = vld [vmem:[#allocation11 + $0x218] sm:$0xff] }
 0xfcb   :  { %5666 = vmatpush3.bf16.msra.mxu1 %v5665_v27  ;;  %v3911_v27 = vld [vmem:[#allocation11 + $0x178] sm:$0xff] }
 0xfcc   :  { %5668 = vmatprep.subr.bf16.mxu1 %v5667_v18 }
 0xfcd   :  { %5578 = vmatpush1.bf16.msra.mxu0 %v5577_v21  ;;  %v5603_v21 = vpack.c.bf16 %v3934_v24, %v3931_v10  ;;  %v5685_v24 = vpack.c.bf16 %v3911_v27, %v3908_v55  ;;  %v3974_v55 = vld [vmem:[#allocation11 + $0x370] sm:$0xff]  ;;  %v3977_v27 = vld [vmem:[#allocation11 + $0x388] sm:$0xff] }
 0xfce   :  { %5580 = vmatprep.subr.bf16.mxu0 %v5579_v14  ;;  %v3933_v14 = vld [vmem:[#allocation11 + $0x228] sm:$0xff] }
 0xfcf   :  { %v5605_v43 = vpack.c.bf16 %v3933_v14, %v3930_v42  ;;  %v6173_v42 = vmov 0.0|0.0   ;;  %v3688_v14 = vld [vmem:[#allocation2 + $0xe0] sm:$0x3] }
 0xfd1   :  { %5582 = vmatpush1.bf16.msra.mxu0 %v5581_v5  ;;  %v3884_v5 = vld [vmem:[#allocation11 + $0xa0] sm:$0xff] }
 0xfd2   :  { %5584 = vmatprep.subr.bf16.mxu0 %v5583_v28  ;;  %v5669_v38 = vpack.c.bf16 %v3887_v23, %v3884_v5  ;;  %v3937_v28 = vld [vmem:[#allocation11 + $0x248] sm:$0xff]  ;;  %v3689_v23 = vld [vmem:[#allocation2 + $0xe8] sm:$0x3] }
 0xfd4   :  { %5670 = vmatpush3.bf16.msra.mxu1 %v5669_v38 }
 0xfd5   :  { %5586 = vmatpush1.bf16.msra.mxu0 %v5585_v54  ;;  %v5607_v54 = vpack.c.bf16 %v3940_v41, %v3937_v28  ;;  %5672 = vmatprep.subr.bf16.mxu1 %v5671_v7 }
 0xfd6   :  { %5588 = vmatprep.subr.bf16.mxu0 %v5587_v6  ;;  %v3939_v6 = vld [vmem:[#allocation11 + $0x258] sm:$0xff] }
 0xfd7   :  { %v5609_v17 = vpack.c.bf16 %v3939_v6, %v3936_v3  ;;  %v3690_v6 = vld [vmem:[#allocation2 + $0xf0] sm:$0x3] }
 0xfd9   :  { %5590 = vmatpush1.bf16.msra.mxu0 %v5589_v61  ;;  %v3890_v61 = vld [vmem:[#allocation11 + $0xd0] sm:$0xff] }
 0xfda   :  { %5592 = vmatprep.subr.bf16.mxu0 %v5591_v33  ;;  %v5673_v15 = vpack.c.bf16 %v3893_v0, %v3890_v61  ;;  %v3946_v33 = vld [vmem:[#allocation11 + $0x290] sm:$0xff] }
 0xfdb   :  { %v5611_v50 = vpack.c.bf16 %v3946_v33, %v3943_v20 }
 0xfdc   :  { %5674 = vmatpush3.bf16.msra.mxu1 %v5673_v15 }
 0xfdd   :  { %5594 = vmatpush1.bf16.msra.mxu0 %v5593_v62  ;;  %v3942_v62 = vld [vmem:[#allocation11 + $0x270] sm:$0xff]  ;;  %5676 = vmatprep.subr.bf16.mxu1 %v5675_v36 }
 0xfde   :  { %5596 = vmatprep.subr.bf16.mxu0 %v5595_v57  ;;  %v5613_v39 = vpack.c.bf16 %v3945_v58, %v3942_v62  ;;  %v5677_v57 = vpack.c.bf16 %v3899_v31, %v3896_v11  ;;  %v3963_v31 = vld [vmem:[#allocation11 + $0x318] sm:$0xff] }
 0xfe0   :  { %5678 = vmatpush3.bf16.msra.mxu1 %v5677_v57 }
 0xfe1   :  { %5598 = vmatpush1.bf16.msra.mxu0 %v5597_v59  ;;  %v5679_v59 = vpack.c.bf16 %v3953_v40, %v3950_v32  ;;  %v3970_v32 = vld [vmem:[#allocation11 + $0x350] sm:$0xff] }
 0xfe2   :  { %5600 = vmatprep.subr.bf16.mxu0 %v5599_v25  ;;  %v3956_v25 = vld [vmem:[#allocation11 + $0x2e0] sm:$0xff] }
 0xfe3   :  { %5680 = vmatprep.subr.bf16.mxu1 %v5679_v59  ;;  %v5683_v30 = vpack.c.bf16 %v3959_v46, %v3956_v25  ;;  %v3862_v59 = vld [vmem:[%s7416_s3] sm:$0x3]  ;;  %v3973_v25 = vld [vmem:[#allocation11 + $0x368] sm:$0xff]  ;;  %v5691_v46 = vpack.c.bf16 %v3971_v16, %v3968_v12 }
 0xfe4   :  { %5682 = vmatpush3.bf16.msra.mxu1 %v5681_v52  ;;  %v3976_v52 = vld [vmem:[#allocation11 + $0x380] sm:$0xff] }
 0xfe5   :  { %5602 = vmatpush1.bf16.msra.mxu0 %v5601_v8  ;;  %v3957_v8 = vld [vmem:[#allocation11 + $0x2e8] sm:$0xff]  ;;  %5684 = vmatprep.subr.bf16.mxu1 %v5683_v30  ;;  %v3975_v30 = vld [vmem:[#allocation11 + $0x378] sm:$0xff] }
 0xfe6   :  { %5604 = vmatprep.subr.bf16.mxu0 %v5603_v21  ;;  %v5621_v10 = vpack.c.bf16 %v3957_v8, %v3954_v26  ;;  %v3964_v21 = vld [vmem:[#allocation11 + $0x320] sm:$0xff]  ;;  %v5631_v8 = vpack.c.bf16 %v3976_v52, %v3973_v25 }
 0xfe7   :  { %v5623_v51 = vpack.c.bf16 %v3964_v21, %v3961_v4  ;;  %v3972_v26 = vld [vmem:[#allocation11 + $0x360] sm:$0xff]  ;;  %v5694_v21 = vpack.c.bf16 %v3977_v27, %v3974_v55 }
 0xfe8   :  { %5686 = vmatpush3.bf16.msra.mxu1 %v5685_v24  ;;  %v3982_v24 = vld [vmem:[#allocation11 + $0x3b0] sm:$0xff]  ;;  %v5633_v4 = vpack.c.bf16 %v3975_v30, %v3972_v26  ;;  %v4008_v52 = vld [vmem:[#allocation12] sm:$0x7] }
 0xfe9   :  { %5606 = vmatpush1.bf16.msra.mxu0 %v5605_v43  ;;  %5687 = vmatprep.subr.bf16.mxu1 %v6173_v42  ;;  %v4021_v26 = vrot.slane %v4008_v52, %v7535_v1 }
 0xfea   :  { %5608 = vmatprep.subr.bf16.mxu0 %v5607_v54 }
 0xfed   :  { %5610 = vmatpush1.bf16.msra.mxu0 %v5609_v17 }
 0xfee   :  { %5612 = vmatprep.subr.bf16.mxu0 %v5611_v50 }
 0xff1   :  { %5614 = vmatpush1.bf16.msra.mxu0 %v5613_v39  ;;  %v3960_v39 = vld [vmem:[#allocation11 + $0x300] sm:$0xff] }
 0xff2   :  { %5616 = vmatprep.subr.bf16.mxu0 %v5615_v9  ;;  %v3967_v9 = vld [vmem:[#allocation11 + $0x338] sm:$0xff]  ;;  %v5625_v22 = vpack.c.bf16 %v3963_v31, %v3960_v39  ;;  %v3998_v31 = vld [vmem:[#allocation11 + $0x430] sm:$0xff] }
 0xff3   :  { %v3999_v39 = vld [vmem:[#allocation11 + $0x438] sm:$0xff] }
 0xff5   :  { %5618 = vmatpush1.bf16.msra.mxu0 %v5617_v37  ;;  %v3969_v37 = vld [vmem:[#allocation11 + $0x348] sm:$0xff] }
 0xff6   :  { %5620 = vmatprep.subr.bf16.mxu0 %v5619_v19  ;;  %v5629_v19 = vpack.c.bf16 %v3969_v37, %v3966_v13  ;;  %v3863_v37 = vld [vmem:[%s7417_s4] sm:$0x3] }
 0xff9   :  { %5622 = vmatpush1.bf16.msra.mxu0 %v5621_v10  ;;  %v3979_v10 = vld [vmem:[#allocation11 + $0x398] sm:$0xff] }
 0xffa   :  { %5624 = vmatprep.subr.bf16.mxu0 %v5623_v51  ;;  %v3978_v51 = vld [vmem:[#allocation11 + $0x390] sm:$0xff] }
0x108f   :  { %v3758_v18 = vpop.f32.mrb[46].mxu0  ;;  %v3829_v43 = vpop.f32.mrb[46].mxu1 }
0x1090   :  { %v3834_v5 = vadd.f32 %v3758_v18, %v3688_v14  ;;  %v3760_v38 = vpop.f32.mrb[47].mxu0  ;;  %v3831_v28 = vpop.f32.mrb[47].mxu1  ;;  %v3836_v17 = vadd.f32 %v3829_v43, %v3690_v6  ;;  %v5635_v14 = vpack.c.bf16 %v3982_v24, %v3979_v10  ;;  %v3981_v18 = vld [vmem:[#allocation11 + $0x3a8] sm:$0xff]  ;;  %v3980_v43 = vld [vmem:[#allocation11 + $0x3a0] sm:$0xff]  ;;  %v3991_v6 = vld [vmem:[#allocation11 + $0x3f8] sm:$0xff] }
0x1091   :  { %v3835_v41 = vadd.f32 %v3760_v38, %v3689_v23  ;;  %v3837_v3 = vadd.f32 %v3831_v28, %v3691_v44  ;;  %v3985_v23 = vld [vmem:[#allocation11 + $0x3c8] sm:$0xff]  ;;  %v3988_v38 = vld [vmem:[#allocation11 + $0x3e0] sm:$0xff]  ;;  %v5637_v28 = vpack.c.bf16 %v3981_v18, %v3978_v51  ;;  %v3986_v44 = vld [vmem:[#allocation11 + $0x3d0] sm:$0xff] }
0x1092   :  { %v4381_v53 = vmul.f32 -1.442695, %v3834_v5  ;;  %v3983_v5 = vld [vmem:[#allocation11 + $0x3b8] sm:$0xff] }
0x1093   :  { %v4382_v54 = vmul.f32 -1.442695, %v3835_v41  ;;  %v4383_v7 = vmul.f32 -1.442695, %v3837_v3  ;;  %v5697_v41 = vpack.c.bf16 %v3983_v5, %v3980_v43  ;;  %v3989_v3 = vld [vmem:[#allocation11 + $0x3e8] sm:$0xff] }
0x1094   :  { %5993 = vpow2.f32 %v4381_v53  ;;  %v3984_v53 = vld [vmem:[#allocation11 + $0x3c0] sm:$0xff] }
0x1095   :  { %5995 = vpow2.f32 %v4382_v54  ;;  %v3987_v54 = vld [vmem:[#allocation11 + $0x3d8] sm:$0xff] }
0x1096   :  { %5997 = vpow2.f32 %v4383_v7  ;;  %v3994_v7 = vld [vmem:[#allocation11 + $0x410] sm:$0xff] }
0x1097   :  { %5999 = vtanh.f32 %v3836_v17  ;;  %v5641_v17 = vpack.c.bf16 %v3987_v54, %v3984_v53 }
0x109e   :  { %v5994_v61 = vpop.eup %5993 }
0x109f   :  { %v5996_v0 = vpop.eup %5995  ;;  %v3841_v20 = vadd.f32 1.0, %v5994_v61  ;;  %v5700_v61 = vpack.c.bf16 %v3989_v3, %v3986_v44 }
0x10a0   :  { %v3847_v15 = vadd.f32 1.0, %v5996_v0  ;;  %v5998_v33 = vpop.eup %5997  ;;  %v3990_v0 = vld [vmem:[#allocation11 + $0x3f0] sm:$0xff] }
0x10a1   :  { %6001 = vrcp.f32 %v3841_v20  ;;  %v6000_v29 = vpop.eup %5999  ;;  %v3854_v62 = vadd.f32 1.0, %v5998_v33  ;;  %v5643_v20 = vpack.c.bf16 %v3994_v7, %v3991_v6  ;;  %v3992_v33 = vld [vmem:[#allocation11 + $0x400] sm:$0xff] }
0x10a2   :  { %6003 = vrcp.f32 %v3847_v15  ;;  %v3993_v15 = vld [vmem:[#allocation11 + $0x408] sm:$0xff] }
0x10a3   :  { %6005 = vrcp.f32 %v3854_v62 }
0x10ab   :  { %v6002_v47 = vpop.eup %6001 }
0x10ac   :  { %v6004_v50 = vpop.eup %6003  ;;  %v3858_v36 = vmul.f32 %v6002_v47, %v6000_v29  ;;  %v3995_v29 = vld [vmem:[#allocation11 + $0x418] sm:$0xff]  ;;  %v3997_v47 = vld [vmem:[#allocation11 + $0x428] sm:$0xff] }
0x10ad   :  { %v3857_v58 = vmul.f32 %v6004_v50, %v7386_v2  ;;  %v6006_v57 = vpop.eup %6005  ;;  %v5627_v2 = vpack.c.bf16 %v3970_v32, %v3967_v9  ;;  %v4000_v50 = vld [vmem:[#allocation11 + $0x440] sm:$0xff]  ;;  %v5703_v62 = vpack.c.bf16 %v3995_v29, %v3992_v33  ;;  %v5706_v32 = vpack.c.bf16 %v4001_v35, %v3998_v31 }
0x10af   :  { %v3859_v11 = vadd.f32 %v3858_v36, %v3857_v58  ;;  %v5645_v36 = vpack.c.bf16 %v3993_v15, %v3990_v0  ;;  %v3996_v58 = vld [vmem:[#allocation11 + $0x420] sm:$0xff] }
0x10b0   :  { %v5649_v9 = vpack.c.bf16 %v3999_v39, %v3996_v58 }
0x10b1   :  { %6007 = vtanh.f32 %v3859_v11  ;;  %v5647_v11 = vpack.c.bf16 %v4000_v50, %v3997_v47 }
0x10bb   :  { %v6008_v40 = vpop.eup %6007 }
0x10bc   :  { %v3861_v48 = vmul.f32 %v6008_v40, %v6006_v57  ;;  %v4006_v57 = vld [vmem:[#allocation11 + $0x470] sm:$0xff] }
0x10bd   :  { %v4002_v40 = vld [vmem:[#allocation11 + $0x450] sm:$0xff] }
0x10be   :  { %4089 = vmatprep.mubr.f32.mxu0 %v3861_v48  ;;  %4231 = vmatprep.mubr.f32.mxu1 %v3861_v48  ;;  %v5651_v48 = vpack.c.bf16 %v4006_v57, %v4003_v56 }
0x10bf   :  { %4090 = vmatmul.mubr.f32.vlgmr.msra.gmra.mrb[48].mxu0 %v3862_v59  ;;  %4232 = vmatmul.mubr.f32.vlgmr.msra.gmra.mrb[48].mxu1 %v3862_v59  ;;  %v4005_v59 = vld [vmem:[#allocation11 + $0x468] sm:$0xff] }
0x10c0   :  { %5626 = vmatpush1.bf16.msra.mxu0 %v5625_v22  ;;  %5689 = vmatpush3.bf16.msra.mxu1 %v5688_v60  ;;  %v4004_v22 = vld [vmem:[#allocation11 + $0x460] sm:$0xff]  ;;  %v4007_v60 = vld [vmem:[#allocation11 + $0x478] sm:$0xff]  ;;  %v5653_v13 = vpack.c.bf16 %v4005_v59, %v4002_v40 }
0x10c1   :  { %5628 = vmatprep.subr.bf16.mxu0 %v5627_v2  ;;  %5690 = vmatprep.subr.bf16.mxu1 %v6173_v42  ;;  %v5709_v2 = vpack.c.bf16 %v4007_v60, %v4004_v22 }
0x10c2   :  { %4160 = vmatprep.mubr.f32.mxu0 %v6943_v34  ;;  %4468 = vmatprep.mubr.msk.f32.mxu1 %vm6174_vm0, %v6943_v34  ;;  %v5639_v34 = vpack.c.bf16 %v3988_v38, %v3985_v23 }
0x10c4   :  { %5630 = vmatpush1.bf16.msra.mxu0 %v5629_v19  ;;  %5692 = vmatpush3.bf16.msra.mxu1 %v5691_v46  ;;  %v6175_v19 = vmov 1983009808  }
0x10c5   :  { %5632 = vmatprep.subr.bf16.mxu0 %v5631_v8  ;;  %5693 = vmatprep.subr.bf16.mxu1 %v6173_v42  ;;  %v4312_v46 = vunpack.c.l.s4 %v6175_v19  ;;  %v4013_v8 = vrot.slane %v4008_v52, %v7534_v45 }
0x10c7   :  { %v4313_v30 = vunpack.c.0.s8 %v4312_v46 }
0x10c8   :  { %5634 = vmatpush1.bf16.msra.mxu0 %v5633_v4  ;;  %5695 = vmatpush3.bf16.msra.mxu1 %v5694_v21 }
0x10c9   :  { %5636 = vmatprep.subr.bf16.mxu0 %v5635_v14  ;;  %5696 = vmatprep.subr.bf16.mxu1 %v6173_v42  ;;  %v4316_v14 = vsub.s32 %v4313_v30, %v7537_v63 }
0x10cc   :  { %5638 = vmatpush1.bf16.msra.mxu0 %v5637_v28  ;;  %5698 = vmatpush3.bf16.msra.mxu1 %v5697_v41 }
0x10cd   :  { %5640 = vmatprep.subr.bf16.mxu0 %v5639_v34  ;;  %5699 = vmatprep.subr.bf16.mxu1 %v6173_v42 }
0x10d0   :  { %5642 = vmatpush1.bf16.msra.mxu0 %v5641_v17  ;;  %5701 = vmatpush3.bf16.msra.mxu1 %v5700_v61 }
0x10d1   :  { %5644 = vmatprep.subr.bf16.mxu0 %v5643_v20  ;;  %5702 = vmatprep.subr.bf16.mxu1 %v6173_v42 }
0x10d4   :  { %5646 = vmatpush1.bf16.msra.mxu0 %v5645_v36  ;;  %5704 = vmatpush3.bf16.msra.mxu1 %v5703_v62 }
0x10d5   :  { %5648 = vmatprep.subr.bf16.mxu0 %v5647_v11  ;;  %5705 = vmatprep.subr.bf16.mxu1 %v6173_v42 }
0x10d8   :  { %5650 = vmatpush1.bf16.msra.mxu0 %v5649_v9  ;;  %5707 = vmatpush3.bf16.msra.mxu1 %v5706_v32 }
0x10d9   :  { %5652 = vmatprep.subr.bf16.mxu0 %v5651_v48  ;;  %5708 = vmatprep.subr.bf16.mxu1 %v6173_v42  ;;  %v4017_v42 = vrot.slane %v4008_v52, %v7536_v49 }
0x10dc   :  { %5654 = vmatpush1.bf16.msra.mxu0 %v5653_v13  ;;  %5710 = vmatpush3.bf16.msra.mxu1 %v5709_v2 }
0x10df   :  { %4161 = vmatmul.mubr.f32.vlgmr.msra.gmra.mrb[48].mxu0 %v3863_v37  ;;  %4469 = vmatmul.mubr.f32.vlgmr.msra.gmra.mrb[50].mxu1 %v3863_v37 }
0x1192   :  { %v4416_v12 = vpop.f32.mrb[48].mxu1 }
0x1193   :  { %v4417_v16 = vpop.f32.mrb[49].mxu1 }
0x1194   :  { %v4418_v25 = vadd.f32 %v4417_v16, %v4416_v12 }
0x1196   :  { %v4234_v55 = vadd.f32 %v4418_v25, %v4021_v26 }
0x11b2   :  { %v4162_v27 = vpop.f32.mrb[48].mxu0  ;;  %v4303_v10 = vpop.f32.mrb[50].mxu1 }
0x11b3   :  { %v5711_v24 = vadd.f32 %v4162_v27, %v4013_v8  ;;  %v4304_v4 = vadd.f32 %v4303_v10, %v4234_v55  ;;  %v4164_v21 = vpop.f32.mrb[49].mxu0  ;;  %v4470_v51 = vpop.f32.mrb[51].mxu1 }
0x11b4   :  { %v5712_v18 = vadd.f32 %v4164_v21, %v4017_v42 }
0x11b5   :  { %v4324_v5 = vrot.slane %v4304_v4, %v4316_v14 }
0x11b6   :  { %v4310_v43 = vcombine.low %v5711_v24, %v5712_v18 }
0x11b8   :  { %v4317_v23 = vrot.slane %v4310_v43, %v4316_v14 }
0x11ba   :  { %v4325_v38 = vcombine.low %v4317_v23, %v4324_v5 }
0x11bc   :  { %4327 = vst [vmem:[%s7426_s13] sm:$0x3f] %v4325_v38 }
0x11bd   :  { %4332 = vsyncpa [#allocation5], 1 }
0x11be   :  { %4333 = vsyncpa [#allocation7], 1 }
0x11bf   :  { %4334 = vsyncpa [#allocation10], 1 }
0x11c0   :  { %4335 = vsyncpa [#allocation13], 1 }

</bundles_post_ra>
